<compile_context>
chip_gen: v7x
topology: tpu7x:2x2x1
jax: 0.10.0
libtpu: 0.0.40
codegen_flags: <defaults>
</compile_context>

<pallas_src>
import functools
import math

import jax
import jax.numpy as jnp
from jax.experimental import pallas as pl
from jax.experimental.pallas import tpu as pltpu


# ----------------------------- in-kernel helpers -----------------------------

def _mm(a, w_bf16):
    """bf16 x bf16 MXU matmul with f32 accumulation."""
    return jnp.dot(a.astype(jnp.bfloat16), w_bf16,
                   preferred_element_type=jnp.float32)


def _layernorm(x, g, b, eps=1e-5):
    m = jnp.mean(x, axis=-1, keepdims=True)
    v = jnp.mean(jnp.square(x - m), axis=-1, keepdims=True)
    return (x - m) * jax.lax.rsqrt(v + eps) * g + b


def _mha(q_bf16, k_bf16, v_bf16, score_bias, ow_ref, ob, *, n_head, d_head):
    """Multi-head attention for one Q-row tile against a resident K/V block.

    q is already scaled by 1/sqrt(d_head).  Per-head scores are only (TQ, S)
    (Q tiled over the grid), QK^T uses dot_general contracting dims ((1,),(1,))
    (no explicit transpose), the softmax normalization uses the EUP reciprocal,
    and the head outputs are concatenated so a SINGLE full-depth (TQ,C)@(C,C)
    output projection runs on the MXU.
    """
    outs = []
    for h in range(n_head):
        lo = h * d_head
        s = jax.lax.dot_general(
            q_bf16[:, lo:lo + d_head], k_bf16[:, lo:lo + d_head],
            (((1,), (1,)), ((), ())), preferred_element_type=jnp.float32)
        if score_bias is not None:
            s = s + score_bias
        m = jnp.max(s, axis=-1, keepdims=True)
        p = jnp.exp(s - m)
        denom = jnp.sum(p, axis=-1, keepdims=True)
        p = (p * pl.reciprocal(denom, approx=True)).astype(jnp.bfloat16)
        outs.append(jnp.dot(p, v_bf16[:, lo:lo + d_head],
                            preferred_element_type=jnp.float32))
    o = jnp.concatenate(outs, axis=-1)             # (TQ, C) f32
    return _mm(o, ow_ref[...]) + ob


# --------------------------------- kernels -----------------------------------

def _proj_kv_kernel(x_ref, mean_ref, rstd_ref,
                    gn_g_ref, gn_b_ref, ci_w_ref, ci_b_ref,
                    ln1_g_ref, ln1_b_ref, wq_ref, wk_ref, wv_ref,
                    h_ref, q_ref, k_ref, v_ref, *, d_head):
    x = x_ref[0]                                            # (TQ, C) f32
    # GroupNorm(32, eps=1e-6): global per-(batch, group) stats precomputed; apply + affine.
    h = (x - mean_ref[0]) * rstd_ref[0] * gn_g_ref[...] + gn_b_ref[...]
    # conv_input: 1x1 conv == per-token matmul.
    h = _mm(h, ci_w_ref[...]) + ci_b_ref[...]
    h_ref[0] = h                                            # residue_short (f32)
    # layernorm_1 + self-attention projections (in_proj_bias=False).
    hn = _layernorm(h, ln1_g_ref[...], ln1_b_ref[...]).astype(jnp.bfloat16)
    scale = 1.0 / math.sqrt(d_head)
    q_ref[0] = (_mm(hn, wq_ref[...]) * scale).astype(jnp.bfloat16)
    k_ref[0] = _mm(hn, wk_ref[...]).astype(jnp.bfloat16)
    v_ref[0] = _mm(hn, wv_ref[...]).astype(jnp.bfloat16)


def _attn_ffn_kernel(x0_ref, h_ref, q_ref, k_ref, v_ref, kc_ref, vc_ref, bias_ref,
                     a1_ow_ref, a1_ob_ref,
                     ln2_g_ref, ln2_b_ref, a2_wq_ref, a2_ow_ref, a2_ob_ref,
                     ln3_g_ref, ln3_b_ref,
                     g1_w_ref, g1_b_ref, g2_w_ref, g2_b_ref,
                     co_w_ref, co_b_ref,
                     o_ref, *, n_head, d_head, ff_chunk):
    c = h_ref.shape[-1]
    hid = 4 * c
    scale = 1.0 / math.sqrt(d_head)

    h = h_ref[0]                                            # (TQ, C) f32 residual stream

    # --- self-attention (+ residue_short) ---
    h = h + _mha(q_ref[0], k_ref[0], v_ref[0], None,
                 a1_ow_ref, a1_ob_ref[...], n_head=n_head, d_head=d_head)

    # --- cross-attention over 128-padded, masked context (+ residue_short) ---
    hn = _layernorm(h, ln2_g_ref[...], ln2_b_ref[...])
    q2 = (_mm(hn, a2_wq_ref[...]) * scale).astype(jnp.bfloat16)
    h = h + _mha(q2, kc_ref[0], vc_ref[0], bias_ref[...],
                 a2_ow_ref, a2_ob_ref[...], n_head=n_head, d_head=d_head)

    # --- GEGLU feed-forward, chunked over the 4C hidden dim (+ residue_short) ---
    hn = _layernorm(h, ln3_g_ref[...], ln3_b_ref[...]).astype(jnp.bfloat16)
    ffn = jnp.zeros_like(h)
    for lo in range(0, hid, ff_chunk):
        xw = _mm(hn, g1_w_ref[:, lo:lo + ff_chunk]) + g1_b_ref[:, lo:lo + ff_chunk]
        gw = (_mm(hn, g1_w_ref[:, hid + lo:hid + lo + ff_chunk])
              + g1_b_ref[:, hid + lo:hid + lo + ff_chunk])
        act = xw * jax.nn.gelu(gw, approximate=False)       # exact (erf) GELU, as F.gelu
        ffn = ffn + _mm(act, g2_w_ref[lo:lo + ff_chunk, :])
    h = h + ffn + g2_b_ref[...]

    # --- conv_output (1x1) + residue_long ---
    o_ref[0] = _mm(h, co_w_ref[...]) + co_b_ref[...] + x0_ref[0]


# --------------------------------- wrapper ------------------------------------

_BF16_WEIGHTS = ("ci_w", "a1_wq", "a1_wk", "a1_wv", "a1_ow",
                 "a2_wq", "a2_wk", "a2_wv", "a2_ow",
                 "g1_w", "g2_w", "co_w")


def _prepare_params(params):
    out = {}
    for k, v in params.items():
        out[k] = v.astype(jnp.bfloat16 if k in _BF16_WEIGHTS else jnp.float32)
    return out


def _run_kernels(x_tok, gn_mean, gn_rstd, k_ctx, v_ctx, ctx_bias, pp,
                 *, n_head, d_head, tq, ff_chunk, weight_mode):
    n, hw, c = x_tok.shape
    t_pad = k_ctx.shape[1]
    grid = (n, hw // tq)

    def tile_map(b, q):
        return (b, q, 0)

    def batch_map(b, q):
        return (b, 0, 0)

    def wspec(a):
        # Grid-constant block; optionally single-buffered to halve resident VMEM.
        index_map = lambda b, q, _nd=a.ndim: (0,) * _nd
        if weight_mode is None:
            return pl.BlockSpec(a.shape, index_map)
        return pl.BlockSpec(a.shape, index_map, pipeline_mode=weight_mode)

    cparams = pltpu.CompilerParams(
        dimension_semantics=("parallel", "parallel"),
        vmem_limit_bytes=64 * 1024 * 1024)

    # ---- pass A: GroupNorm + conv_input + layernorm_1 + self-attn Q/K/V ----
    pa_w = [pp["gn_g"], pp["gn_b"], pp["ci_w"], pp["ci_b"],
            pp["ln1_g"], pp["ln1_b"], pp["a1_wq"], pp["a1_wk"], pp["a1_wv"]]
    h_tok, q_tok, k_tok, v_tok = pl.pallas_call(
        functools.partial(_proj_kv_kernel, d_head=d_head),
        grid=grid,
        in_specs=[pl.BlockSpec((1, tq, c), tile_map),
                  pl.BlockSpec((1, 1, c), batch_map),
                  pl.BlockSpec((1, 1, c), batch_map)] + [wspec(a) for a in pa_w],
        out_specs=[pl.BlockSpec((1, tq, c), tile_map)] * 4,
        out_shape=[jax.ShapeDtypeStruct((n, hw, c), jnp.float32),
                   jax.ShapeDtypeStruct((n, hw, c), jnp.bfloat16),
                   jax.ShapeDtypeStruct((n, hw, c), jnp.bfloat16),
                   jax.ShapeDtypeStruct((n, hw, c), jnp.bfloat16)],
        compiler_params=cparams,
    )(x_tok, gn_mean, gn_rstd, *pa_w)

    # ---- pass B: self/cross attention + chunked GEGLU + conv_output ----
    pb_w = [pp["a1_ow"], pp["a1_ob"],
            pp["ln2_g"], pp["ln2_b"], pp["a2_wq"], pp["a2_ow"], pp["a2_ob"],
            pp["ln3_g"], pp["ln3_b"], pp["g1_w"], pp["g1_b"], pp["g2_w"], pp["g2_b"],
            pp["co_w"], pp["co_b"]]
    out_tok = pl.pallas_call(
        functools.partial(_attn_ffn_kernel, n_head=n_head, d_head=d_head,
                          ff_chunk=ff_chunk),
        grid=grid,
        in_specs=[pl.BlockSpec((1, tq, c), tile_map),        # x0 (residue_long)
                  pl.BlockSpec((1, tq, c), tile_map),        # h  (residue_short)
                  pl.BlockSpec((1, tq, c), tile_map),        # Q  (prescaled, bf16)
                  pl.BlockSpec((1, hw, c), batch_map),       # K_self (per batch)
                  pl.BlockSpec((1, hw, c), batch_map),       # V_self (per batch)
                  pl.BlockSpec((1, t_pad, c), batch_map),    # K_ctx
                  pl.BlockSpec((1, t_pad, c), batch_map),    # V_ctx
                  wspec(ctx_bias)] + [wspec(a) for a in pb_w],
        out_specs=pl.BlockSpec((1, tq, c), tile_map),
        out_shape=jax.ShapeDtypeStruct((n, hw, c), jnp.float32),
        compiler_params=cparams,
    )(x_tok, h_tok, q_tok, k_tok, v_tok, k_ctx, v_ctx, ctx_bias, *pb_w)
    return out_tok


def unet_attention_block(x_nchw, context, params, *, n_head, n_groups=32,
                         tq=None, ff_chunk=None):
    n, c, hgt, wid = x_nchw.shape
    hw = hgt * wid
    d_head = c // n_head
    t = context.shape[1]

    if tq is None:                                   # Q-row tile size (token tiling)
        tq = hw
        for cand in range(min(hw, 256), 7, -8):
            if hw % cand == 0:
                tq = cand
                break
    assert hw % tq == 0 and (tq % 8 == 0 or tq == hw)

    if ff_chunk is None:                             # GEGLU hidden-dim chunk
        ff_chunk = 4 * c
        for cand in range(min(4 * c, 2048), 127, -128):
            if (4 * c) % cand == 0:
                ff_chunk = cand
                break
    assert (4 * c) % ff_chunk == 0

    pp = _prepare_params(params)

    # Token-major activations (N, HW, C); residual stream kept f32 for accuracy.
    x_tok = jnp.transpose(x_nchw.reshape(n, c, hw), (0, 2, 1)).astype(jnp.float32)

    # GroupNorm(32) statistics: a cheap global reduction (needs full-token view,
    # so it is done once here rather than inside the token-tiled grid).
    cpg = c // n_groups
    xg = x_tok.reshape(n, hw, n_groups, cpg)
    mean_g = jnp.mean(xg, axis=(1, 3), keepdims=True)
    var_g = jnp.mean(jnp.square(xg - mean_g), axis=(1, 3), keepdims=True)
    rstd_g = jax.lax.rsqrt(var_g + 1e-6)
    gn_mean = jnp.broadcast_to(mean_g, (n, 1, n_groups, cpg)).reshape(n, 1, c)
    gn_rstd = jnp.broadcast_to(rstd_g, (n, 1, n_groups, cpg)).reshape(n, 1, c)

    # Cross-attention K/V: pad context length to the 128-lane boundary and mask
    # the padded keys with a large negative score bias (in_proj_bias=False).
    t_pad = max(128, ((t + 127) // 128) * 128)
    ctx = context.astype(jnp.float32)
    if t_pad != t:
        ctx = jnp.pad(ctx, ((0, 0), (0, t_pad - t), (0, 0)))
    ctx_bias = jnp.where(jnp.arange(t_pad) < t, 0.0, -1e30)
    ctx_bias = ctx_bias.astype(jnp.float32).reshape(1, t_pad)
    ctx_b = ctx.astype(jnp.bfloat16)
    k_ctx = jnp.einsum("ntd,dc->ntc", ctx_b, pp["a2_wk"],
                       preferred_element_type=jnp.float32).astype(jnp.bfloat16)
    v_ctx = jnp.einsum("ntd,dc->ntc", ctx_b, pp["a2_wv"],
                       preferred_element_type=jnp.float32).astype(jnp.bfloat16)

    args = (x_tok, gn_mean, gn_rstd, k_ctx, v_ctx, ctx_bias, pp)
    kw = dict(n_head=n_head, d_head=d_head, tq=tq, ff_chunk=ff_chunk)
    try:
        # Single-buffer the grid-constant weight blocks (big VMEM saving, esp. v7x).
        out_tok = _run_kernels(*args, weight_mode=pl.Buffered(1), **kw)
    except Exception:
        # Fallback for jax versions that reject buffer_count=1 pipeline mode.
        out_tok = _run_kernels(*args, weight_mode=None, **kw)

    return jnp.transpose(out_tok, (0, 2, 1)).reshape(n, c, hgt, wid)


# ------------------------- pure-JAX f32 reference -----------------------------

def reference_forward(x_nchw, context, params, *, n_head, n_groups=32):
    n, c, hgt, wid = x_nchw.shape
    hw = hgt * wid
    d_head = c // n_head
    x_tok = jnp.transpose(x_nchw.reshape(n, c, hw), (0, 2, 1)).astype(jnp.float32)
    context = context.astype(jnp.float32)

    def ln(x, g, b, eps=1e-5):
        m = jnp.mean(x, -1, keepdims=True)
        v = jnp.mean(jnp.square(x - m), -1, keepdims=True)
        return (x - m) * jax.lax.rsqrt(v + eps) * g + b

    def mha(q, k, v, ow, ob):
        sq, sk = q.shape[1], k.shape[1]
        qh = q.reshape(n, sq, n_head, d_head).transpose(0, 2, 1, 3)
        kh = k.reshape(n, sk, n_head, d_head).transpose(0, 2, 1, 3)
        vh = v.reshape(n, sk, n_head, d_head).transpose(0, 2, 1, 3)
        s = jnp.einsum("nhqd,nhkd->nhqk", qh, kh) / math.sqrt(d_head)
        p = jax.nn.softmax(s, axis=-1)
        o = jnp.einsum("nhqk,nhkd->nhqd", p, vh).transpose(0, 2, 1, 3).reshape(n, sq, c)
        return o @ ow + ob

    xg = x_tok.reshape(n, hw, n_groups, c // n_groups)
    mean = jnp.mean(xg, axis=(1, 3), keepdims=True)
    var = jnp.mean(jnp.square(xg - mean), axis=(1, 3), keepdims=True)
    h = ((xg - mean) * jax.lax.rsqrt(var + 1e-6)).reshape(n, hw, c)
    h = h * params["gn_g"] + params["gn_b"]
    h = h @ params["ci_w"] + params["ci_b"]

    res = h
    hn = ln(h, params["ln1_g"], params["ln1_b"])
    h = mha(hn @ params["a1_wq"], hn @ params["a1_wk"], hn @ params["a1_wv"],
            params["a1_ow"], params["a1_ob"]) + res

    res = h
    hn = ln(h, params["ln2_g"], params["ln2_b"])
    h = mha(hn @ params["a2_wq"], context @ params["a2_wk"], context @ params["a2_wv"],
            params["a2_ow"], params["a2_ob"]) + res

    res = h
    hn = ln(h, params["ln3_g"], params["ln3_b"])
    hh = hn @ params["g1_w"] + params["g1_b"]
    xpart, gate = hh[..., :4 * c], hh[..., 4 * c:]
    h = (xpart * jax.nn.gelu(gate, approximate=False)) @ params["g2_w"] + params["g2_b"] + res

    out = h @ params["co_w"] + params["co_b"] + x_tok
    return jnp.transpose(out, (0, 2, 1)).reshape(n, c, hgt, wid)


def init_params(key, n_head, n_embd, d_context, n_groups=32):
    """Deterministic synthetic parameters (shapes match the PyTorch module).

    Linear / 1x1-conv weights are stored pre-transposed as (in, out) so kernels
    compute y = x @ W + b; the fused SelfAttention in_proj is stored as its three
    (C, C) chunks (identical to chunk(3, dim=-1))."""
    c = n_head * n_embd
    ks = iter(jax.random.split(key, 32))

    def w(shape, scale=0.08):
        return (scale * jax.random.normal(next(ks), shape)).astype(jnp.float32)

    return {
        "gn_g": 1.0 + w((1, c), 0.05), "gn_b": w((1, c), 0.05),
        "ci_w": w((c, c)), "ci_b": w((1, c)),
        "ln1_g": 1.0 + w((1, c), 0.05), "ln1_b": w((1, c), 0.05),
        "a1_wq": w((c, c)), "a1_wk": w((c, c)), "a1_wv": w((c, c)),
        "a1_ow": w((c, c)), "a1_ob": w((1, c)),
        "ln2_g": 1.0 + w((1, c), 0.05), "ln2_b": w((1, c), 0.05),
        "a2_wq": w((c, c)), "a2_wk": w((d_context, c)), "a2_wv": w((d_context, c)),
        "a2_ow": w((c, c)), "a2_ob": w((1, c)),
        "ln3_g": 1.0 + w((1, c), 0.05), "ln3_b": w((1, c), 0.05),
        "g1_w": w((c, 8 * c)), "g1_b": w((1, 8 * c)),
        "g2_w": w((4 * c, c)), "g2_b": w((1, c)),
        "co_w": w((c, c)), "co_b": w((1, c)),
    }


if __name__ == "__main__":
    # Small shapes: n_head=4, n_embd=16 -> channels=64 (divisible by 32 groups),
    # x: (2, 64, 8, 8), context: (2, 8, 32).  tq=32 / ff_chunk=128 exercise the
    # token-tile grid axis and the chunked GEGLU loop.
    n_head, n_embd, d_context = 4, 16, 32
    channels = n_head * n_embd
    N, H, W, T = 2, 8, 8, 8

    key = jax.random.PRNGKey(0)
    kx, kc, kp = jax.random.split(key, 3)
    x = jax.random.normal(kx, (N, channels, H, W), jnp.float32)
    ctx = jax.random.normal(kc, (N, T, d_context), jnp.float32)
    params = init_params(kp, n_head, n_embd, d_context)

    out = unet_attention_block(x, ctx, params, n_head=n_head, tq=32, ff_chunk=128)
    out = jax.block_until_ready(out)
    assert out.shape == x.shape and out.dtype == jnp.float32

    ref = reference_forward(x, ctx, params, n_head=n_head)
    max_err = float(jnp.max(jnp.abs(out - ref)))
    assert max_err < 5e-2, f"kernel mismatch vs reference: {max_err}"

    print("KERNEL_OK")
</pallas_src>

<mosaic_0001>
module attributes {stable_mosaic.version = 11 : i64} {
  func.func @_proj_kv_kernel(%arg0: i32, %arg1: i32, %arg2: memref<1x32x64xf32, #tpu.memory_space<vmem>>, %arg3: memref<1x1x64xf32, #tpu.memory_space<vmem>>, %arg4: memref<1x1x64xf32, #tpu.memory_space<vmem>>, %arg5: memref<1x64xf32, #tpu.memory_space<vmem>>, %arg6: memref<1x64xf32, #tpu.memory_space<vmem>>, %arg7: memref<64x64xbf16, #tpu.memory_space<vmem>>, %arg8: memref<1x64xf32, #tpu.memory_space<vmem>>, %arg9: memref<1x64xf32, #tpu.memory_space<vmem>>, %arg10: memref<1x64xf32, #tpu.memory_space<vmem>>, %arg11: memref<64x64xbf16, #tpu.memory_space<vmem>>, %arg12: memref<64x64xbf16, #tpu.memory_space<vmem>>, %arg13: memref<64x64xbf16, #tpu.memory_space<vmem>>, %arg14: memref<1x32x64xf32, #tpu.memory_space<vmem>>, %arg15: memref<1x32x64xbf16, #tpu.memory_space<vmem>>, %arg16: memref<1x32x64xbf16, #tpu.memory_space<vmem>>, %arg17: memref<1x32x64xbf16, #tpu.memory_space<vmem>>) attributes {dimension_semantics = [#tpu.dimension_semantics<parallel>, #tpu.dimension_semantics<parallel>], iteration_bounds = array<i64: 2, 2>, scalar_prefetch = 0 : i64, scratch_operands = 0 : i64, tpu.core_type = #tpu.core_type<tc>, window_params = [{transform_indices = @transform_0, window_bounds = array<i64: 1, 32, 64>}, {transform_indices = @transform_1, window_bounds = array<i64: 1, 1, 64>}, {transform_indices = @transform_2, window_bounds = array<i64: 1, 1, 64>}, {pipeline_mode = #tpu.pipeline_mode<synchronous>, transform_indices = @transform_3, window_bounds = array<i64: 1, 64>}, {pipeline_mode = #tpu.pipeline_mode<synchronous>, transform_indices = @transform_4, window_bounds = array<i64: 1, 64>}, {pipeline_mode = #tpu.pipeline_mode<synchronous>, transform_indices = @transform_5, window_bounds = array<i64: 64, 64>}, {pipeline_mode = #tpu.pipeline_mode<synchronous>, transform_indices = @transform_6, window_bounds = array<i64: 1, 64>}, {pipeline_mode = #tpu.pipeline_mode<synchronous>, transform_indices = @transform_7, window_bounds = array<i64: 1, 64>}, {pipeline_mode = #tpu.pipeline_mode<synchronous>, transform_indices = @transform_8, window_bounds = array<i64: 1, 64>}, {pipeline_mode = #tpu.pipeline_mode<synchronous>, transform_indices = @transform_9, window_bounds = array<i64: 64, 64>}, {pipeline_mode = #tpu.pipeline_mode<synchronous>, transform_indices = @transform_10, window_bounds = array<i64: 64, 64>}, {pipeline_mode = #tpu.pipeline_mode<synchronous>, transform_indices = @transform_11, window_bounds = array<i64: 64, 64>}, {transform_indices = @transform_12, window_bounds = array<i64: 1, 32, 64>}, {transform_indices = @transform_13, window_bounds = array<i64: 1, 32, 64>}, {transform_indices = @transform_14, window_bounds = array<i64: 1, 32, 64>}, {transform_indices = @transform_15, window_bounds = array<i64: 1, 32, 64>}]} {
    %c0 = arith.constant 0 : index
    %c0_0 = arith.constant 0 : index
    %c0_1 = arith.constant 0 : index
    %0 = vector.load %arg2[%c0, %c0_0, %c0_1] : memref<1x32x64xf32, #tpu.memory_space<vmem>>, vector<1x32x64xf32>
    %1 = vector.shape_cast %0 : vector<1x32x64xf32> to vector<32x64xf32>
    %c0_2 = arith.constant 0 : index
    %c0_3 = arith.constant 0 : index
    %c0_4 = arith.constant 0 : index
    %2 = vector.load %arg3[%c0_2, %c0_3, %c0_4] : memref<1x1x64xf32, #tpu.memory_space<vmem>>, vector<1x1x64xf32>
    %3 = vector.shape_cast %2 : vector<1x1x64xf32> to vector<1x64xf32>
    %4 = vector.broadcast %3 : vector<1x64xf32> to vector<32x64xf32>
    %5 = arith.subf %1, %4 : vector<32x64xf32>
    %c0_5 = arith.constant 0 : index
    %c0_6 = arith.constant 0 : index
    %c0_7 = arith.constant 0 : index
    %6 = vector.load %arg4[%c0_5, %c0_6, %c0_7] : memref<1x1x64xf32, #tpu.memory_space<vmem>>, vector<1x1x64xf32>
    %7 = vector.shape_cast %6 : vector<1x1x64xf32> to vector<1x64xf32>
    %8 = vector.broadcast %7 : vector<1x64xf32> to vector<32x64xf32>
    %9 = arith.mulf %5, %8 : vector<32x64xf32>
    %c0_8 = arith.constant 0 : index
    %c0_9 = arith.constant 0 : index
    %10 = vector.load %arg5[%c0_8, %c0_9] : memref<1x64xf32, #tpu.memory_space<vmem>>, vector<1x64xf32>
    %11 = vector.broadcast %10 : vector<1x64xf32> to vector<32x64xf32>
    %12 = arith.mulf %9, %11 : vector<32x64xf32>
    %c0_10 = arith.constant 0 : index
    %c0_11 = arith.constant 0 : index
    %13 = vector.load %arg6[%c0_10, %c0_11] : memref<1x64xf32, #tpu.memory_space<vmem>>, vector<1x64xf32>
    %14 = vector.broadcast %13 : vector<1x64xf32> to vector<32x64xf32>
    %15 = arith.addf %12, %14 : vector<32x64xf32>
    %c0_12 = arith.constant 0 : index
    %c0_13 = arith.constant 0 : index
    %16 = vector.load %arg7[%c0_12, %c0_13] : memref<64x64xbf16, #tpu.memory_space<vmem>>, vector<64x64xbf16>
    %17 = arith.truncf %15 : vector<32x64xf32> to vector<32x64xbf16>
    %cst = arith.constant dense<0.000000e+00> : vector<32x64xf32>
    %18 = tpu.matmul %17, %16, %cst {dimension_numbers = #tpu.dot_dimension_numbers<[1], [0], [0], [1], [0, 0, 1, 1], [], []>} : vector<32x64xbf16>, vector<64x64xbf16>, vector<32x64xf32> -> vector<32x64xf32>
    %c0_14 = arith.constant 0 : index
    %c0_15 = arith.constant 0 : index
    %19 = vector.load %arg8[%c0_14, %c0_15] : memref<1x64xf32, #tpu.memory_space<vmem>>, vector<1x64xf32>
    %20 = vector.broadcast %19 : vector<1x64xf32> to vector<32x64xf32>
    %21 = arith.addf %18, %20 : vector<32x64xf32>
    %c0_16 = arith.constant 0 : index
    %c0_17 = arith.constant 0 : index
    %c0_18 = arith.constant 0 : index
    %22 = vector.load %arg14[%c0_16, %c0_17, %c0_18] : memref<1x32x64xf32, #tpu.memory_space<vmem>>, vector<1x32x64xf32>
    %23 = vector.shape_cast %22 : vector<1x32x64xf32> to vector<32x64xf32>
    %24 = vector.shape_cast %21 : vector<32x64xf32> to vector<1x32x64xf32>
    tpu.vector_store %arg14[%c0_16, %c0_17, %c0_18], %24 {strides = array<i32>} : memref<1x32x64xf32, #tpu.memory_space<vmem>>, vector<1x32x64xf32>,
    %c0_19 = arith.constant 0 : index
    %c0_20 = arith.constant 0 : index
    %25 = vector.load %arg9[%c0_19, %c0_20] : memref<1x64xf32, #tpu.memory_space<vmem>>, vector<1x64xf32>
    %c0_21 = arith.constant 0 : index
    %c0_22 = arith.constant 0 : index
    %26 = vector.load %arg10[%c0_21, %c0_22] : memref<1x64xf32, #tpu.memory_space<vmem>>, vector<1x64xf32>
    %cst_23 = arith.constant dense<0.000000e+00> : vector<32xf32>
    %27 = vector.multi_reduction <add>, %21, %cst_23 [1] : vector<32x64xf32> to vector<32xf32>
    %28 = vector.shape_cast %27 : vector<32xf32> to vector<32x1xf32>
    %cst_24 = arith.constant 6.400000e+01 : f32
    %29 = vector.broadcast %cst_24 : f32 to vector<32x1xf32>
    %30 = arith.divf %28, %29 : vector<32x1xf32>
    %31 = vector.broadcast %30 : vector<32x1xf32> to vector<32x64xf32>
    %32 = arith.subf %21, %31 : vector<32x64xf32>
    %33 = arith.mulf %32, %32 : vector<32x64xf32>
    %cst_25 = arith.constant dense<0.000000e+00> : vector<32xf32>
    %34 = vector.multi_reduction <add>, %33, %cst_25 [1] : vector<32x64xf32> to vector<32xf32>
    %35 = vector.shape_cast %34 : vector<32xf32> to vector<32x1xf32>
    %cst_26 = arith.constant 6.400000e+01 : f32
    %36 = vector.broadcast %cst_26 : f32 to vector<32x1xf32>
    %37 = arith.divf %35, %36 : vector<32x1xf32>
    %38 = vector.broadcast %30 : vector<32x1xf32> to vector<32x64xf32>
    %39 = arith.subf %21, %38 : vector<32x64xf32>
    %cst_27 = arith.constant 9.99999974E-6 : f32
    %40 = vector.broadcast %cst_27 : f32 to vector<32x1xf32>
    %41 = arith.addf %37, %40 : vector<32x1xf32>
    %42 = math.rsqrt %41 : vector<32x1xf32>
    %43 = vector.broadcast %42 : vector<32x1xf32> to vector<32x64xf32>
    %44 = arith.mulf %39, %43 : vector<32x64xf32>
    %45 = vector.broadcast %25 : vector<1x64xf32> to vector<32x64xf32>
    %46 = arith.mulf %44, %45 : vector<32x64xf32>
    %47 = vector.broadcast %26 : vector<1x64xf32> to vector<32x64xf32>
    %48 = arith.addf %46, %47 : vector<32x64xf32>
    %49 = arith.truncf %48 : vector<32x64xf32> to vector<32x64xbf16>
    %c0_28 = arith.constant 0 : index
    %c0_29 = arith.constant 0 : index
    %50 = vector.load %arg11[%c0_28, %c0_29] : memref<64x64xbf16, #tpu.memory_space<vmem>>, vector<64x64xbf16>
    %cst_30 = arith.constant dense<0.000000e+00> : vector<32x64xf32>
    %51 = tpu.matmul %49, %50, %cst_30 {dimension_numbers = #tpu.dot_dimension_numbers<[1], [0], [0], [1], [0, 0, 1, 1], [], []>} : vector<32x64xbf16>, vector<64x64xbf16>, vector<32x64xf32> -> vector<32x64xf32>
    %cst_31 = arith.constant 2.500000e-01 : f32
    %52 = vector.broadcast %cst_31 : f32 to vector<32x64xf32>
    %53 = arith.mulf %51, %52 : vector<32x64xf32>
    %54 = arith.truncf %53 : vector<32x64xf32> to vector<32x64xbf16>
    %c0_32 = arith.constant 0 : index
    %c0_33 = arith.constant 0 : index
    %c0_34 = arith.constant 0 : index
    %55 = vector.load %arg15[%c0_32, %c0_33, %c0_34] : memref<1x32x64xbf16, #tpu.memory_space<vmem>>, vector<1x32x64xbf16>
    %56 = vector.shape_cast %55 : vector<1x32x64xbf16> to vector<32x64xbf16>
    %57 = vector.shape_cast %54 : vector<32x64xbf16> to vector<1x32x64xbf16>
    tpu.vector_store %arg15[%c0_32, %c0_33, %c0_34], %57 {strides = array<i32>} : memref<1x32x64xbf16, #tpu.memory_space<vmem>>, vector<1x32x64xbf16>,
    %c0_35 = arith.constant 0 : index
    %c0_36 = arith.constant 0 : index
    %58 = vector.load %arg12[%c0_35, %c0_36] : memref<64x64xbf16, #tpu.memory_space<vmem>>, vector<64x64xbf16>
    %cst_37 = arith.constant dense<0.000000e+00> : vector<32x64xf32>
    %59 = tpu.matmul %49, %58, %cst_37 {dimension_numbers = #tpu.dot_dimension_numbers<[1], [0], [0], [1], [0, 0, 1, 1], [], []>} : vector<32x64xbf16>, vector<64x64xbf16>, vector<32x64xf32> -> vector<32x64xf32>
    %60 = arith.truncf %59 : vector<32x64xf32> to vector<32x64xbf16>
    %c0_38 = arith.constant 0 : index
    %c0_39 = arith.constant 0 : index
    %c0_40 = arith.constant 0 : index
    %61 = vector.load %arg16[%c0_38, %c0_39, %c0_40] : memref<1x32x64xbf16, #tpu.memory_space<vmem>>, vector<1x32x64xbf16>
    %62 = vector.shape_cast %61 : vector<1x32x64xbf16> to vector<32x64xbf16>
    %63 = vector.shape_cast %60 : vector<32x64xbf16> to vector<1x32x64xbf16>
    tpu.vector_store %arg16[%c0_38, %c0_39, %c0_40], %63 {strides = array<i32>} : memref<1x32x64xbf16, #tpu.memory_space<vmem>>, vector<1x32x64xbf16>,
    %c0_41 = arith.constant 0 : index
    %c0_42 = arith.constant 0 : index
    %64 = vector.load %arg13[%c0_41, %c0_42] : memref<64x64xbf16, #tpu.memory_space<vmem>>, vector<64x64xbf16>
    %cst_43 = arith.constant dense<0.000000e+00> : vector<32x64xf32>
    %65 = tpu.matmul %49, %64, %cst_43 {dimension_numbers = #tpu.dot_dimension_numbers<[1], [0], [0], [1], [0, 0, 1, 1], [], []>} : vector<32x64xbf16>, vector<64x64xbf16>, vector<32x64xf32> -> vector<32x64xf32>
    %66 = arith.truncf %65 : vector<32x64xf32> to vector<32x64xbf16>
    %c0_44 = arith.constant 0 : index
    %c0_45 = arith.constant 0 : index
    %c0_46 = arith.constant 0 : index
    %67 = vector.load %arg17[%c0_44, %c0_45, %c0_46] : memref<1x32x64xbf16, #tpu.memory_space<vmem>>, vector<1x32x64xbf16>
    %68 = vector.shape_cast %67 : vector<1x32x64xbf16> to vector<32x64xbf16>
    %69 = vector.shape_cast %66 : vector<32x64xbf16> to vector<1x32x64xbf16>
    tpu.vector_store %arg17[%c0_44, %c0_45, %c0_46], %69 {strides = array<i32>} : memref<1x32x64xbf16, #tpu.memory_space<vmem>>, vector<1x32x64xbf16>,
    return
  }
  func.func @transform_0(%arg0: i32, %arg1: i32) -> (i32, i32, i32) {
    %c0_i32 = arith.constant 0 : i32
    %c0_i32_0 = arith.constant 0 : i32
    return %arg0, %arg1, %c0_i32 : i32, i32, i32
  }
  func.func @transform_1(%arg0: i32, %arg1: i32) -> (i32, i32, i32) {
    %c0_i32 = arith.constant 0 : i32
    %c0_i32_0 = arith.constant 0 : i32
    %c0_i32_1 = arith.constant 0 : i32
    return %arg0, %c0_i32, %c0_i32_0 : i32, i32, i32
  }
  func.func @transform_2(%arg0: i32, %arg1: i32) -> (i32, i32, i32) {
    %c0_i32 = arith.constant 0 : i32
    %c0_i32_0 = arith.constant 0 : i32
    %c0_i32_1 = arith.constant 0 : i32
    return %arg0, %c0_i32, %c0_i32_0 : i32, i32, i32
  }
  func.func @transform_3(%arg0: i32, %arg1: i32) -> (i32, i32) {
    %c0_i32 = arith.constant 0 : i32
    %c0_i32_0 = arith.constant 0 : i32
    %c0_i32_1 = arith.constant 0 : i32
    return %c0_i32, %c0_i32_0 : i32, i32
  }
  func.func @transform_4(%arg0: i32, %arg1: i32) -> (i32, i32) {
    %c0_i32 = arith.constant 0 : i32
    %c0_i32_0 = arith.constant 0 : i32
    %c0_i32_1 = arith.constant 0 : i32
    return %c0_i32, %c0_i32_0 : i32, i32
  }
  func.func @transform_5(%arg0: i32, %arg1: i32) -> (i32, i32) {
    %c0_i32 = arith.constant 0 : i32
    %c0_i32_0 = arith.constant 0 : i32
    %c0_i32_1 = arith.constant 0 : i32
    return %c0_i32, %c0_i32_0 : i32, i32
  }
  func.func @transform_6(%arg0: i32, %arg1: i32) -> (i32, i32) {
    %c0_i32 = arith.constant 0 : i32
    %c0_i32_0 = arith.constant 0 : i32
    %c0_i32_1 = arith.constant 0 : i32
    return %c0_i32, %c0_i32_0 : i32, i32
  }
  func.func @transform_7(%arg0: i32, %arg1: i32) -> (i32, i32) {
    %c0_i32 = arith.constant 0 : i32
    %c0_i32_0 = arith.constant 0 : i32
    %c0_i32_1 = arith.constant 0 : i32
    return %c0_i32, %c0_i32_0 : i32, i32
  }
  func.func @transform_8(%arg0: i32, %arg1: i32) -> (i32, i32) {
    %c0_i32 = arith.constant 0 : i32
    %c0_i32_0 = arith.constant 0 : i32
    %c0_i32_1 = arith.constant 0 : i32
    return %c0_i32, %c0_i32_0 : i32, i32
  }
  func.func @transform_9(%arg0: i32, %arg1: i32) -> (i32, i32) {
    %c0_i32 = arith.constant 0 : i32
    %c0_i32_0 = arith.constant 0 : i32
    %c0_i32_1 = arith.constant 0 : i32
    return %c0_i32, %c0_i32_0 : i32, i32
  }
  func.func @transform_10(%arg0: i32, %arg1: i32) -> (i32, i32) {
    %c0_i32 = arith.constant 0 : i32
    %c0_i32_0 = arith.constant 0 : i32
    %c0_i32_1 = arith.constant 0 : i32
    return %c0_i32, %c0_i32_0 : i32, i32
  }
  func.func @transform_11(%arg0: i32, %arg1: i32) -> (i32, i32) {
    %c0_i32 = arith.constant 0 : i32
    %c0_i32_0 = arith.constant 0 : i32
    %c0_i32_1 = arith.constant 0 : i32
    return %c0_i32, %c0_i32_0 : i32, i32
  }
  func.func @transform_12(%arg0: i32, %arg1: i32) -> (i32, i32, i32) {
    %c0_i32 = arith.constant 0 : i32
    %c0_i32_0 = arith.constant 0 : i32
    return %arg0, %arg1, %c0_i32 : i32, i32, i32
  }
  func.func @transform_13(%arg0: i32, %arg1: i32) -> (i32, i32, i32) {
    %c0_i32 = arith.constant 0 : i32
    %c0_i32_0 = arith.constant 0 : i32
    return %arg0, %arg1, %c0_i32 : i32, i32, i32
  }
  func.func @transform_14(%arg0: i32, %arg1: i32) -> (i32, i32, i32) {
    %c0_i32 = arith.constant 0 : i32
    %c0_i32_0 = arith.constant 0 : i32
    return %arg0, %arg1, %c0_i32 : i32, i32, i32
  }
  func.func @transform_15(%arg0: i32, %arg1: i32) -> (i32, i32, i32) {
    %c0_i32 = arith.constant 0 : i32
    %c0_i32_0 = arith.constant 0 : i32
    return %arg0, %arg1, %c0_i32 : i32, i32, i32
  }
}

module attributes {stable_mosaic.version = 11 : i64} {
  func.func @_proj_kv_kernel(%arg0: i32, %arg1: i32, %arg2: memref<1x32x64xf32, #tpu.memory_space<vmem>>, %arg3: memref<1x1x64xf32, #tpu.memory_space<vmem>>, %arg4: memref<1x1x64xf32, #tpu.memory_space<vmem>>, %arg5: memref<1x64xf32, #tpu.memory_space<vmem>>, %arg6: memref<1x64xf32, #tpu.memory_space<vmem>>, %arg7: memref<64x64xbf16, #tpu.memory_space<vmem>>, %arg8: memref<1x64xf32, #tpu.memory_space<vmem>>, %arg9: memref<1x64xf32, #tpu.memory_space<vmem>>, %arg10: memref<1x64xf32, #tpu.memory_space<vmem>>, %arg11: memref<64x64xbf16, #tpu.memory_space<vmem>>, %arg12: memref<64x64xbf16, #tpu.memory_space<vmem>>, %arg13: memref<64x64xbf16, #tpu.memory_space<vmem>>, %arg14: memref<1x32x64xf32, #tpu.memory_space<vmem>>, %arg15: memref<1x32x64xbf16, #tpu.memory_space<vmem>>, %arg16: memref<1x32x64xbf16, #tpu.memory_space<vmem>>, %arg17: memref<1x32x64xbf16, #tpu.memory_space<vmem>>) attributes {dimension_semantics = [#tpu.dimension_semantics<parallel>, #tpu.dimension_semantics<parallel>], iteration_bounds = array<i64: 2, 2>, scalar_prefetch = 0 : i64, scratch_operands = 0 : i64, tpu.core_type = #tpu.core_type<tc>, window_params = [{transform_indices = @transform_0, window_bounds = array<i64: 1, 32, 64>}, {transform_indices = @transform_1, window_bounds = array<i64: 1, 1, 64>}, {transform_indices = @transform_2, window_bounds = array<i64: 1, 1, 64>}, {pipeline_mode = #tpu.pipeline_mode<synchronous>, transform_indices = @transform_3, window_bounds = array<i64: 1, 64>}, {pipeline_mode = #tpu.pipeline_mode<synchronous>, transform_indices = @transform_4, window_bounds = array<i64: 1, 64>}, {pipeline_mode = #tpu.pipeline_mode<synchronous>, transform_indices = @transform_5, window_bounds = array<i64: 64, 64>}, {pipeline_mode = #tpu.pipeline_mode<synchronous>, transform_indices = @transform_6, window_bounds = array<i64: 1, 64>}, {pipeline_mode = #tpu.pipeline_mode<synchronous>, transform_indices = @transform_7, window_bounds = array<i64: 1, 64>}, {pipeline_mode = #tpu.pipeline_mode<synchronous>, transform_indices = @transform_8, window_bounds = array<i64: 1, 64>}, {pipeline_mode = #tpu.pipeline_mode<synchronous>, transform_indices = @transform_9, window_bounds = array<i64: 64, 64>}, {pipeline_mode = #tpu.pipeline_mode<synchronous>, transform_indices = @transform_10, window_bounds = array<i64: 64, 64>}, {pipeline_mode = #tpu.pipeline_mode<synchronous>, transform_indices = @transform_11, window_bounds = array<i64: 64, 64>}, {transform_indices = @transform_12, window_bounds = array<i64: 1, 32, 64>}, {transform_indices = @transform_13, window_bounds = array<i64: 1, 32, 64>}, {transform_indices = @transform_14, window_bounds = array<i64: 1, 32, 64>}, {transform_indices = @transform_15, window_bounds = array<i64: 1, 32, 64>}]} {
    %c0 = arith.constant 0 : index
    %c0_0 = arith.constant 0 : index
    %c0_1 = arith.constant 0 : index
    %0 = vector.load %arg2[%c0, %c0_0, %c0_1] : memref<1x32x64xf32, #tpu.memory_space<vmem>>, vector<1x32x64xf32>
    %1 = vector.shape_cast %0 : vector<1x32x64xf32> to vector<32x64xf32>
    %c0_2 = arith.constant 0 : index
    %c0_3 = arith.constant 0 : index
    %c0_4 = arith.constant 0 : index
    %2 = vector.load %arg3[%c0_2, %c0_3, %c0_4] : memref<1x1x64xf32, #tpu.memory_space<vmem>>, vector<1x1x64xf32>
    %3 = vector.shape_cast %2 : vector<1x1x64xf32> to vector<1x64xf32>
    %4 = vector.broadcast %3 : vector<1x64xf32> to vector<32x64xf32>
    %5 = arith.subf %1, %4 : vector<32x64xf32>
    %c0_5 = arith.constant 0 : index
    %c0_6 = arith.constant 0 : index
    %c0_7 = arith.constant 0 : index
    %6 = vector.load %arg4[%c0_5, %c0_6, %c0_7] : memref<1x1x64xf32, #tpu.memory_space<vmem>>, vector<1x1x64xf32>
    %7 = vector.shape_cast %6 : vector<1x1x64xf32> to vector<1x64xf32>
    %8 = vector.broadcast %7 : vector<1x64xf32> to vector<32x64xf32>
    %9 = arith.mulf %5, %8 : vector<32x64xf32>
    %c0_8 = arith.constant 0 : index
    %c0_9 = arith.constant 0 : index
    %10 = vector.load %arg5[%c0_8, %c0_9] : memref<1x64xf32, #tpu.memory_space<vmem>>, vector<1x64xf32>
    %11 = vector.broadcast %10 : vector<1x64xf32> to vector<32x64xf32>
    %12 = arith.mulf %9, %11 : vector<32x64xf32>
    %c0_10 = arith.constant 0 : index
    %c0_11 = arith.constant 0 : index
    %13 = vector.load %arg6[%c0_10, %c0_11] : memref<1x64xf32, #tpu.memory_space<vmem>>, vector<1x64xf32>
    %14 = vector.broadcast %13 : vector<1x64xf32> to vector<32x64xf32>
    %15 = arith.addf %12, %14 : vector<32x64xf32>
    %c0_12 = arith.constant 0 : index
    %c0_13 = arith.constant 0 : index
    %16 = vector.load %arg7[%c0_12, %c0_13] : memref<64x64xbf16, #tpu.memory_space<vmem>>, vector<64x64xbf16>
    %17 = arith.truncf %15 : vector<32x64xf32> to vector<32x64xbf16>
    %cst = arith.constant dense<0.000000e+00> : vector<32x64xf32>
    %18 = tpu.matmul %17, %16, %cst {dimension_numbers = #tpu.dot_dimension_numbers<[1], [0], [0], [1], [0, 0, 1, 1], [], []>} : vector<32x64xbf16>, vector<64x64xbf16>, vector<32x64xf32> -> vector<32x64xf32>
    %c0_14 = arith.constant 0 : index
    %c0_15 = arith.constant 0 : index
    %19 = vector.load %arg8[%c0_14, %c0_15] : memref<1x64xf32, #tpu.memory_space<vmem>>, vector<1x64xf32>
    %20 = vector.broadcast %19 : vector<1x64xf32> to vector<32x64xf32>
    %21 = arith.addf %18, %20 : vector<32x64xf32>
    %c0_16 = arith.constant 0 : index
    %c0_17 = arith.constant 0 : index
    %c0_18 = arith.constant 0 : index
    %22 = vector.load %arg14[%c0_16, %c0_17, %c0_18] : memref<1x32x64xf32, #tpu.memory_space<vmem>>, vector<1x32x64xf32>
    %23 = vector.shape_cast %22 : vector<1x32x64xf32> to vector<32x64xf32>
    %24 = vector.shape_cast %21 : vector<32x64xf32> to vector<1x32x64xf32>
    tpu.vector_store %arg14[%c0_16, %c0_17, %c0_18], %24 {strides = array<i32>} : memref<1x32x64xf32, #tpu.memory_space<vmem>>, vector<1x32x64xf32>,
    %c0_19 = arith.constant 0 : index
    %c0_20 = arith.constant 0 : index
    %25 = vector.load %arg9[%c0_19, %c0_20] : memref<1x64xf32, #tpu.memory_space<vmem>>, vector<1x64xf32>
    %c0_21 = arith.constant 0 : index
    %c0_22 = arith.constant 0 : index
    %26 = vector.load %arg10[%c0_21, %c0_22] : memref<1x64xf32, #tpu.memory_space<vmem>>, vector<1x64xf32>
    %cst_23 = arith.constant dense<0.000000e+00> : vector<32xf32>
    %27 = vector.multi_reduction <add>, %21, %cst_23 [1] : vector<32x64xf32> to vector<32xf32>
    %28 = vector.shape_cast %27 : vector<32xf32> to vector<32x1xf32>
    %cst_24 = arith.constant 6.400000e+01 : f32
    %29 = vector.broadcast %cst_24 : f32 to vector<32x1xf32>
    %30 = arith.divf %28, %29 : vector<32x1xf32>
    %31 = vector.broadcast %30 : vector<32x1xf32> to vector<32x64xf32>
    %32 = arith.subf %21, %31 : vector<32x64xf32>
    %33 = arith.mulf %32, %32 : vector<32x64xf32>
    %cst_25 = arith.constant dense<0.000000e+00> : vector<32xf32>
    %34 = vector.multi_reduction <add>, %33, %cst_25 [1] : vector<32x64xf32> to vector<32xf32>
    %35 = vector.shape_cast %34 : vector<32xf32> to vector<32x1xf32>
    %cst_26 = arith.constant 6.400000e+01 : f32
    %36 = vector.broadcast %cst_26 : f32 to vector<32x1xf32>
    %37 = arith.divf %35, %36 : vector<32x1xf32>
    %38 = vector.broadcast %30 : vector<32x1xf32> to vector<32x64xf32>
    %39 = arith.subf %21, %38 : vector<32x64xf32>
    %cst_27 = arith.constant 9.99999974E-6 : f32
    %40 = vector.broadcast %cst_27 : f32 to vector<32x1xf32>
    %41 = arith.addf %37, %40 : vector<32x1xf32>
    %42 = math.rsqrt %41 : vector<32x1xf32>
    %43 = vector.broadcast %42 : vector<32x1xf32> to vector<32x64xf32>
    %44 = arith.mulf %39, %43 : vector<32x64xf32>
    %45 = vector.broadcast %25 : vector<1x64xf32> to vector<32x64xf32>
    %46 = arith.mulf %44, %45 : vector<32x64xf32>
    %47 = vector.broadcast %26 : vector<1x64xf32> to vector<32x64xf32>
    %48 = arith.addf %46, %47 : vector<32x64xf32>
    %49 = arith.truncf %48 : vector<32x64xf32> to vector<32x64xbf16>
    %c0_28 = arith.constant 0 : index
    %c0_29 = arith.constant 0 : index
    %50 = vector.load %arg11[%c0_28, %c0_29] : memref<64x64xbf16, #tpu.memory_space<vmem>>, vector<64x64xbf16>
    %cst_30 = arith.constant dense<0.000000e+00> : vector<32x64xf32>
    %51 = tpu.matmul %49, %50, %cst_30 {dimension_numbers = #tpu.dot_dimension_numbers<[1], [0], [0], [1], [0, 0, 1, 1], [], []>} : vector<32x64xbf16>, vector<64x64xbf16>, vector<32x64xf32> -> vector<32x64xf32>
    %cst_31 = arith.constant 2.500000e-01 : f32
    %52 = vector.broadcast %cst_31 : f32 to vector<32x64xf32>
    %53 = arith.mulf %51, %52 : vector<32x64xf32>
    %54 = arith.truncf %53 : vector<32x64xf32> to vector<32x64xbf16>
    %c0_32 = arith.constant 0 : index
    %c0_33 = arith.constant 0 : index
    %c0_34 = arith.constant 0 : index
    %55 = vector.load %arg15[%c0_32, %c0_33, %c0_34] : memref<1x32x64xbf16, #tpu.memory_space<vmem>>, vector<1x32x64xbf16>
    %56 = vector.shape_cast %55 : vector<1x32x64xbf16> to vector<32x64xbf16>
    %57 = vector.shape_cast %54 : vector<32x64xbf16> to vector<1x32x64xbf16>
    tpu.vector_store %arg15[%c0_32, %c0_33, %c0_34], %57 {strides = array<i32>} : memref<1x32x64xbf16, #tpu.memory_space<vmem>>, vector<1x32x64xbf16>,
    %c0_35 = arith.constant 0 : index
    %c0_36 = arith.constant 0 : index
    %58 = vector.load %arg12[%c0_35, %c0_36] : memref<64x64xbf16, #tpu.memory_space<vmem>>, vector<64x64xbf16>
    %cst_37 = arith.constant dense<0.000000e+00> : vector<32x64xf32>
    %59 = tpu.matmul %49, %58, %cst_37 {dimension_numbers = #tpu.dot_dimension_numbers<[1], [0], [0], [1], [0, 0, 1, 1], [], []>} : vector<32x64xbf16>, vector<64x64xbf16>, vector<32x64xf32> -> vector<32x64xf32>
    %60 = arith.truncf %59 : vector<32x64xf32> to vector<32x64xbf16>
    %c0_38 = arith.constant 0 : index
    %c0_39 = arith.constant 0 : index
    %c0_40 = arith.constant 0 : index
    %61 = vector.load %arg16[%c0_38, %c0_39, %c0_40] : memref<1x32x64xbf16, #tpu.memory_space<vmem>>, vector<1x32x64xbf16>
    %62 = vector.shape_cast %61 : vector<1x32x64xbf16> to vector<32x64xbf16>
    %63 = vector.shape_cast %60 : vector<32x64xbf16> to vector<1x32x64xbf16>
    tpu.vector_store %arg16[%c0_38, %c0_39, %c0_40], %63 {strides = array<i32>} : memref<1x32x64xbf16, #tpu.memory_space<vmem>>, vector<1x32x64xbf16>,
    %c0_41 = arith.constant 0 : index
    %c0_42 = arith.constant 0 : index
    %64 = vector.load %arg13[%c0_41, %c0_42] : memref<64x64xbf16, #tpu.memory_space<vmem>>, vector<64x64xbf16>
    %cst_43 = arith.constant dense<0.000000e+00> : vector<32x64xf32>
    %65 = tpu.matmul %49, %64, %cst_43 {dimension_numbers = #tpu.dot_dimension_numbers<[1], [0], [0], [1], [0, 0, 1, 1], [], []>} : vector<32x64xbf16>, vector<64x64xbf16>, vector<32x64xf32> -> vector<32x64xf32>
    %66 = arith.truncf %65 : vector<32x64xf32> to vector<32x64xbf16>
    %c0_44 = arith.constant 0 : index
    %c0_45 = arith.constant 0 : index
    %c0_46 = arith.constant 0 : index
    %67 = vector.load %arg17[%c0_44, %c0_45, %c0_46] : memref<1x32x64xbf16, #tpu.memory_space<vmem>>, vector<1x32x64xbf16>
    %68 = vector.shape_cast %67 : vector<1x32x64xbf16> to vector<32x64xbf16>
    %69 = vector.shape_cast %66 : vector<32x64xbf16> to vector<1x32x64xbf16>
    tpu.vector_store %arg17[%c0_44, %c0_45, %c0_46], %69 {strides = array<i32>} : memref<1x32x64xbf16, #tpu.memory_space<vmem>>, vector<1x32x64xbf16>,
    return
  }
  func.func @transform_0(%arg0: i32, %arg1: i32) -> (i32, i32, i32) {
    %c0_i32 = arith.constant 0 : i32
    %c0_i32_0 = arith.constant 0 : i32
    return %arg0, %arg1, %c0_i32 : i32, i32, i32
  }
  func.func @transform_1(%arg0: i32, %arg1: i32) -> (i32, i32, i32) {
    %c0_i32 = arith.constant 0 : i32
    %c0_i32_0 = arith.constant 0 : i32
    %c0_i32_1 = arith.constant 0 : i32
    return %arg0, %c0_i32, %c0_i32_0 : i32, i32, i32
  }
  func.func @transform_2(%arg0: i32, %arg1: i32) -> (i32, i32, i32) {
    %c0_i32 = arith.constant 0 : i32
    %c0_i32_0 = arith.constant 0 : i32
    %c0_i32_1 = arith.constant 0 : i32
    return %arg0, %c0_i32, %c0_i32_0 : i32, i32, i32
  }
  func.func @transform_3(%arg0: i32, %arg1: i32) -> (i32, i32) {
    %c0_i32 = arith.constant 0 : i32
    %c0_i32_0 = arith.constant 0 : i32
    %c0_i32_1 = arith.constant 0 : i32
    return %c0_i32, %c0_i32_0 : i32, i32
  }
  func.func @transform_4(%arg0: i32, %arg1: i32) -> (i32, i32) {
    %c0_i32 = arith.constant 0 : i32
    %c0_i32_0 = arith.constant 0 : i32
    %c0_i32_1 = arith.constant 0 : i32
    return %c0_i32, %c0_i32_0 : i32, i32
  }
  func.func @transform_5(%arg0: i32, %arg1: i32) -> (i32, i32) {
    %c0_i32 = arith.constant 0 : i32
    %c0_i32_0 = arith.constant 0 : i32
    %c0_i32_1 = arith.constant 0 : i32
    return %c0_i32, %c0_i32_0 : i32, i32
  }
  func.func @transform_6(%arg0: i32, %arg1: i32) -> (i32, i32) {
    %c0_i32 = arith.constant 0 : i32
    %c0_i32_0 = arith.constant 0 : i32
    %c0_i32_1 = arith.constant 0 : i32
    return %c0_i32, %c0_i32_0 : i32, i32
  }
  func.func @transform_7(%arg0: i32, %arg1: i32) -> (i32, i32) {
    %c0_i32 = arith.constant 0 : i32
    %c0_i32_0 = arith.constant 0 : i32
    %c0_i32_1 = arith.constant 0 : i32
    return %c0_i32, %c0_i32_0 : i32, i32
  }
  func.func @transform_8(%arg0: i32, %arg1: i32) -> (i32, i32) {
    %c0_i32 = arith.constant 0 : i32
    %c0_i32_0 = arith.constant 0 : i32
    %c0_i32_1 = arith.constant 0 : i32
    return %c0_i32, %c0_i32_0 : i32, i32
  }
  func.func @transform_9(%arg0: i32, %arg1: i32) -> (i32, i32) {
    %c0_i32 = arith.constant 0 : i32
    %c0_i32_0 = arith.constant 0 : i32
    %c0_i32_1 = arith.constant 0 : i32
    return %c0_i32, %c0_i32_0 : i32, i32
  }
  func.func @transform_10(%arg0: i32, %arg1: i32) -> (i32, i32) {
    %c0_i32 = arith.constant 0 : i32
    %c0_i32_0 = arith.constant 0 : i32
    %c0_i32_1 = arith.constant 0 : i32
    return %c0_i32, %c0_i32_0 : i32, i32
  }
  func.func @transform_11(%arg0: i32, %arg1: i32) -> (i32, i32) {
    %c0_i32 = arith.constant 0 : i32
    %c0_i32_0 = arith.constant 0 : i32
    %c0_i32_1 = arith.constant 0 : i32
    return %c0_i32, %c0_i32_0 : i32, i32
  }
  func.func @transform_12(%arg0: i32, %arg1: i32) -> (i32, i32, i32) {
    %c0_i32 = arith.constant 0 : i32
    %c0_i32_0 = arith.constant 0 : i32
    return %arg0, %arg1, %c0_i32 : i32, i32, i32
  }
  func.func @transform_13(%arg0: i32, %arg1: i32) -> (i32, i32, i32) {
    %c0_i32 = arith.constant 0 : i32
    %c0_i32_0 = arith.constant 0 : i32
    return %arg0, %arg1, %c0_i32 : i32, i32, i32
  }
  func.func @transform_14(%arg0: i32, %arg1: i32) -> (i32, i32, i32) {
    %c0_i32 = arith.constant 0 : i32
    %c0_i32_0 = arith.constant 0 : i32
    return %arg0, %arg1, %c0_i32 : i32, i32, i32
  }
  func.func @transform_15(%arg0: i32, %arg1: i32) -> (i32, i32, i32) {
    %c0_i32 = arith.constant 0 : i32
    %c0_i32_0 = arith.constant 0 : i32
    return %arg0, %arg1, %c0_i32 : i32, i32, i32
  }
}

</mosaic_0001>

<bundles_post_ra>
// kernel: tpu_custom_call.1
= control target key start
LH: loop header
LB: loop body
LE: loop exit
PB: predicated region body
PF: predicated region fallthrough
CT: control target
= control target key end

     0   :  { %s3545_s0 = inlined_call_operand.hbm [shape: f32[2,64,64], index: 0, kind: input, shape index: {}]   ;;  %s3546_s1 = inlined_call_operand.hbm [shape: f32[2,1,64], index: 1, kind: input, shape index: {}]   ;;  %s3547_s2 = inlined_call_operand.hbm [shape: f32[2,1,64], index: 2, kind: input, shape index: {}]   ;;  %s3548_s3 = inlined_call_operand.hbm [shape: f32[1,64], index: 3, kind: input, shape index: {}]   ;;  %s3549_s4 = inlined_call_operand.hbm [shape: f32[1,64], index: 4, kind: input, shape index: {}]   ;;  %s3550_s5 = inlined_call_operand.hbm [shape: bf16[64,64], index: 5, kind: input, shape index: {}]   ;;  %s3551_s6 = inlined_call_operand.hbm [shape: f32[1,64], index: 6, kind: input, shape index: {}]   ;;  %s3552_s7 = inlined_call_operand.hbm [shape: f32[1,64], index: 7, kind: input, shape index: {}]   ;;  %s3553_s8 = inlined_call_operand.hbm [shape: f32[1,64], index: 8, kind: input, shape index: {}]   ;;  %s3554_s9 = inlined_call_operand.hbm [shape: bf16[64,64], index: 9, kind: input, shape index: {}]   ;;  %s3555_s10 = inlined_call_operand.hbm [shape: bf16[64,64], index: 10, kind: input, shape index: {}]   ;;  %s3556_s11 = inlined_call_operand.hbm [shape: bf16[64,64], index: 11, kind: input, shape index: {}]   ;;  %s3557_s12 = inlined_call_operand.hbm [shape: f32[2,64,64], index: 12, kind: output, shape index: {0}]   ;;  %s3558_s13 = inlined_call_operand.hbm [shape: bf16[2,64,64], index: 13, kind: output, shape index: {1}]   ;;  %s3559_s14 = inlined_call_operand.hbm [shape: bf16[2,64,64], index: 14, kind: output, shape index: {2}]   ;;  %s3560_s15 = inlined_call_operand.hbm [shape: bf16[2,64,64], index: 15, kind: output, shape index: {3}]  }
   0x1   :  { %3602 = sst [smem:[#allocation47_spill]] %s3545_s0 }
   0x2   :  { %3603 = sst [smem:[#allocation48_spill]] %s3546_s1 }
   0x3   :  { %3604 = sst [smem:[#allocation49_spill]] %s3547_s2 }
   0x4   :  { %3605 = sst [smem:[#allocation50_spill]] %s3548_s3 }
   0x5   :  { %3606 = sst [smem:[#allocation51_spill]] %s3549_s4 }
   0x6   :  { %3607 = sst [smem:[#allocation52_spill]] %s3550_s5 }
   0x7   :  { %3608 = sst [smem:[#allocation53_spill]] %s3551_s6 }
   0x8   :  { %3609 = sst [smem:[#allocation54_spill]] %s3552_s7 }
   0x9   :  { %3610 = sst [smem:[#allocation55_spill]] %s3553_s8 }
   0xa   :  { %3611 = sst [smem:[#allocation56_spill]] %s3554_s9 }
   0xb   :  { %3612 = sst [smem:[#allocation57_spill]] %s3555_s10 }
   0xc   :  { %3613 = sst [smem:[#allocation58_spill]] %s3556_s11 }
   0xd   :  { %3614 = sst [smem:[#allocation59_spill]] %s3557_s12 }
   0xe   :  { %3615 = sst [smem:[#allocation60_spill]] %s3558_s13 }
   0xf   :  { %3616 = sst [smem:[#allocation61_spill]] %s3559_s14 }
  0x10   :  { %3617 = sst [smem:[#allocation62_spill]] %s3560_s15 }
  0x11   :  { %21 = vsyncpa [#allocation3], 0 }
  0x12   :  { %23 = vsyncpa [#allocation3 + $0x1], 0 }
  0x13   :  { %24 = vsyncpa [#allocation6], 0 }
  0x14   :  { %26 = vsyncpa [#allocation6 + $0x1], 0 }
  0x15   :  { %27 = vsyncpa [#allocation9], 0 }
  0x16   :  { %28 = vsyncpa [#allocation12], 0 }
  0x17   :  { %29 = vsyncpa [#allocation15], 0 }
  0x18   :  { %30 = vsyncpa [#allocation18], 0 }
  0x19   :  { %31 = vsyncpa [#allocation21], 0 }
  0x1a   :  { %32 = vsyncpa [#allocation4], 0 }
  0x1b   :  { %34 = vsyncpa [#allocation4 + $0x1], 0 }
  0x1c   :  { %35 = vsyncpa [#allocation24], 0 }
  0x1d   :  { %37 = vsyncpa [#allocation24 + $0x1], 0 }
  0x1e   :  { %38 = vsyncpa [#allocation27], 0 }
  0x1f   :  { %40 = vsyncpa [#allocation27 + $0x1], 0  ;;  %s2812_s18 = smov 0   ;;  %s2814_s19 = smov 0  }
  0x20   :  { %s2816_s20 = smov 0   ;;  %s2818_s21 = smov 0  }
  0x21   :  { %s2820_s22 = smov 0   ;;  %s2822_s23 = smov 0  }
  0x22   :  { %s2824_s24 = smov 0   ;;  %s2826_s25 = smov 0  }
  0x23   :  { %s2828_s26 = smov 0   ;;  %s2830_s27 = smov 0  }
  0x24   :  { %s2832_s28 = smov 0  }
  0x25 LB: > { %3618 = sst [smem:[#allocation38_spill]] %s2678_s21  ;;  %s2868_s29 = sadd.s32 4294967295, %s2706_s28   ;;  %s2706_s28 = sphi %s2832_s28, %s3704_s28   ;;  %s2702_s27 = sphi %s2830_s27, %s3703_s27   ;;  %s2698_s26 = sphi %s2828_s26, %s3702_s26   ;;  %s2694_s25 = sphi %s2826_s25, %s3701_s25   ;;  %s2690_s24 = sphi %s2824_s24, %s3694_s24   ;;  %s2686_s23 = sphi %s2822_s23, %s3700_s23   ;;  %s2682_s22 = sphi %s2820_s22, %s3699_s22   ;;  %s2678_s21 = sphi %s2818_s21, %s3698_s21   ;;  %s2674_s20 = sphi %s2816_s20, %s3697_s20   ;;  %s2670_s19 = sphi %s2814_s19, %s3696_s19   ;;  %s2666_s18 = sphi %s2812_s18, %s3695_s18  }
  0x26   : > { %3619 = sst [smem:[#allocation39_spill]] %s2690_s24  ;;  %p1699_p0 = scmp.ge.s32.totalorder %s2706_s28, 1 }
  0x27   : > { %3620 = sst [smem:[#allocation40_spill]] %s2694_s25  ;;  %p3569_p1 = scmp.eq.s32.totalorder %s2868_s29, 0 }
  0x28   : > { %3621 = sst [smem:[#allocation41_spill]] %s2698_s26  ;;  %p444_p2 = scmp.lt.s32.totalorder %s2706_s28, 5 }
  0x29   : > { %3622 = sst [smem:[#allocation42_spill]] %s2706_s28  ;;  %s2708_s16 = smov [#allocation8]  }
  0x2a   : > { %p2873_p3 = pnand %p1699_p0, %p444_p2  ;;  %s457_s17 = sshll.u32 %s2708_s16, 4  ;;  %s458_s17 = int_to_ptr.vmem [resolvable:$true] %s457_s17 }
  0x2b   : > { %s2709_s15 = smov [#allocation11]   ;;  %s2710_s12 = smov [#allocation14]  }
  0x2c   : > { %s3623_s30 = scalar_select %p2873_p3, 1, 0 }
  0x2d   : > { %p1926_p4 = pneg %p2873_p3  ;;  %s478_s14 = sshll.u32 %s2709_s15, 4  ;;  %s2885_s14 = int_to_ptr.vmem [resolvable:$true] %s478_s14 }
  0x2e   : > { %3624 = sst [smem:[#allocation43_spill]] %s3623_s30  ;;  %s2887_s25 = sshll.u32 %s2710_s12, 4  ;;  %s504_s25 = int_to_ptr.vmem [resolvable:$true] %s2887_s25 }
  0x2f   : > { %p2881_p5 = pnand %p1926_p4, %p3569_p1  ;;  %s3626_s3 = sld [smem:[#allocation50_spill]] }
  0x31   : > { %s3625_s13 = scalar_select %p2881_p5, 1, 0 }
  0x32   : > { %p2897_p7 = pneg %p2881_p5 }
  0x34   : > { %s3627_s15 = scalar_select %p2897_p7, 1, 0 }
  0x35   : > { %s2126_s16 = scalar_lea.hbm %s3626_s3, 16 }
  0x36   : > { %p2127_p6 = scmp.ne.s32.totalorder %s3626_s3, %s2126_s16  ;;  %p2133_p10 = scmp.lt.u32.totalorder %s2126_s16, %s3626_s3 }
  0x38   : > { %p2129_p8 = pnand %p2897_p7, %p2127_p6 }
  0x3a   : > { %p2130_p9 = pneg %p2129_p8 }
  0x3c   : > { %p2135_p11 = pnand %p2133_p10, %p2130_p9 }
  0x3e   : > { %2138 = shalt.err (!%p2135_p11)
}
  0x3f   : > { %s2139_s0 = scalar_lea.vmem %s458_s17, 16  ;;  %s2146_s24 = scalar_lea.vmem %s458_s17, 32 }
  0x40   : > { %p2140_p12 = scmp.ne.s32.totalorder %s458_s17, %s2139_s0  ;;  %p2147_p2 = scmp.lt.s32.totalorder %s458_s17, %s458_s17 }
  0x41   : > { %p2148_p4 = scmp.lt.s32.totalorder %s2146_s24, %s2139_s0 }
  0x42   : > { %p2142_p13 = pnand %p2140_p12, %p2897_p7 }
  0x43   : > { %p2149_p1 = por %p2148_p4, %p2147_p2 }
  0x44   : > { %p2143_p0 = pneg %p2142_p13 }
  0x46   : > { %p2150_p3 = pnand %p2149_p1, %p2143_p0 }
  0x48   : > { %2153 = shalt.err (!%p2150_p3)
}
  0x49   : > { %1929 = dma.hbm_to_vmem [thread:$0]  (!%p2881_p5), %s3626_s3, 16, %s458_s17, [#allocation9]  }
  0x4a   : > { %s3628_s5 = sld [smem:[#allocation52_spill]] }
  0x50   : > { %s2154_s12 = scalar_lea.hbm %s3628_s5, 512 }
  0x51   : > { %p2155_p6 = scmp.ne.s32.totalorder %s3628_s5, %s2154_s12  ;;  %p2161_p1 = scmp.lt.u32.totalorder %s2154_s12, %s3628_s5 }
  0x53   : > { %p2157_p8 = pnand %p2155_p6, %p2897_p7 }
  0x55   : > { %p2158_p9 = pneg %p2157_p8 }
  0x57   : > { %p2163_p3 = pnand %p2161_p1, %p2158_p9 }
  0x59   : > { %2166 = shalt.err (!%p2163_p3)
}
  0x5a   : > { %s2167_s17 = scalar_lea.vmem %s2885_s14, 512  ;;  %p2175_p13 = scmp.lt.s32.totalorder %s2885_s14, %s2885_s14 }
  0x5b   : > { %p2168_p10 = scmp.ne.s32.totalorder %s2885_s14, %s2167_s17  ;;  %p2176_p0 = scmp.lt.s32.totalorder %s2167_s17, %s2167_s17 }
  0x5d   : > { %p2170_p11 = pnand %p2168_p10, %p2897_p7  ;;  %p2177_p2 = por %p2176_p0, %p2175_p13 }
  0x5f   : > { %p2171_p12 = pneg %p2170_p11 }
  0x61   : > { %p2178_p4 = pnand %p2177_p2, %p2171_p12 }
  0x63   : > { %2181 = shalt.err (!%p2178_p4)
}
  0x64   : > { %s3573_s8 = smov 64   ;;  %s3581_s10 = smov 4  }
  0x65   : > { %1935 = dma.hbm_to_vmem [thread:$0]  (!%p2881_p5), %s3628_s5, 512, %s2885_s14, [#allocation12], %s3573_s8, %s3573_s8, %s3581_s10  }
  0x66   : > { %s3629_s7 = sld [smem:[#allocation54_spill]] }
  0x6c   : > { %s2182_s12 = scalar_lea.hbm %s3629_s7, 16 }
  0x6d   : > { %p2183_p6 = scmp.ne.s32.totalorder %s3629_s7, %s2182_s12  ;;  %p2189_p1 = scmp.lt.u32.totalorder %s2182_s12, %s3629_s7 }
  0x6f   : > { %p2185_p8 = pnand %p2183_p6, %p2897_p7 }
  0x71   : > { %p2186_p9 = pneg %p2185_p8 }
  0x73   : > { %p2191_p3 = pnand %p2189_p1, %p2186_p9 }
  0x75   : > { %2194 = shalt.err (!%p2191_p3)
}
  0x76   : > { %s2195_s26 = scalar_lea.vmem %s504_s25, 16  ;;  %s2202_s14 = scalar_lea.vmem %s504_s25, 32 }
  0x77   : > { %p2196_p10 = scmp.ne.s32.totalorder %s504_s25, %s2195_s26  ;;  %p2203_p13 = scmp.lt.s32.totalorder %s504_s25, %s504_s25 }
  0x78   : > { %p2204_p0 = scmp.lt.s32.totalorder %s2202_s14, %s2195_s26 }
  0x79   : > { %p2198_p11 = pnand %p2196_p10, %p2897_p7 }
  0x7a   : > { %p2205_p2 = por %p2204_p0, %p2203_p13 }
  0x7b   : > { %p2199_p12 = pneg %p2198_p11 }
  0x7d   : > { %p2206_p4 = pnand %p2205_p2, %p2199_p12 }
  0x7f   : > { %2209 = shalt.err (!%p2206_p4)
}
  0x80   : > { %1941 = dma.hbm_to_vmem [thread:$0]  (!%p2881_p5), %s3629_s7, 16, %s504_s25, [#allocation15]  }
  0x81   : > { %s2713_s3 = smov [#allocation17]   ;;  %s3630_s9 = sld [smem:[#allocation56_spill]] }
  0x82   : > { %s524_s16 = sshll.u32 %s2713_s3, 4  ;;  %s525_s16 = int_to_ptr.vmem [resolvable:$true] %s524_s16 }
  0x87   : > { %s2210_s24 = scalar_lea.hbm %s3630_s9, 512 }
  0x88   : > { %p2211_p6 = scmp.ne.s32.totalorder %s3630_s9, %s2210_s24  ;;  %p2217_p1 = scmp.lt.u32.totalorder %s2210_s24, %s3630_s9 }
  0x8a   : > { %p2213_p8 = pnand %p2211_p6, %p2897_p7 }
  0x8c   : > { %p2214_p9 = pneg %p2213_p8 }
  0x8e   : > { %p2219_p3 = pnand %p2217_p1, %p2214_p9 }
  0x90   : > { %2222 = shalt.err (!%p2219_p3)
}
  0x91   : > { %s2223_s25 = scalar_lea.vmem %s525_s16, 512  ;;  %p2231_p13 = scmp.lt.s32.totalorder %s525_s16, %s525_s16 }
  0x92   : > { %p2224_p10 = scmp.ne.s32.totalorder %s525_s16, %s2223_s25  ;;  %p2232_p0 = scmp.lt.s32.totalorder %s2223_s25, %s2223_s25 }
  0x94   : > { %p2226_p11 = pnand %p2224_p10, %p2897_p7  ;;  %p2233_p2 = por %p2232_p0, %p2231_p13 }
  0x96   : > { %p2227_p12 = pneg %p2226_p11 }
  0x98   : > { %p2234_p4 = pnand %p2233_p2, %p2227_p12 }
  0x9a   : > { %2237 = shalt.err (!%p2234_p4)
}
  0x9b   : > { %s3631_s8 = smov 64   ;;  %s3580_s3 = sadd.s32 4294967294, %s2706_s28  }
  0x9c   : > { %1947 = dma.hbm_to_vmem [thread:$0]  (!%p2881_p5), %s3630_s9, 512, %s525_s16, [#allocation18], %s3631_s8, %s3631_s8, %s3581_s10  }
  0x9d   : > { %p74_p6 = scmp.ne.s32.totalorder %s2686_s23, %s2682_s22  ;;  %p75_p8 = scmp.eq.s32.totalorder %s2706_s28, 0 }
  0x9e   : > { %p80_p9 = scmp.ne.s32.totalorder %s2682_s22, %s2678_s21  ;;  %p100_p3 = scmp.ne.s32.totalorder %s2674_s20, %s2670_s19 }
  0x9f   : > { %p76_p1 = por %p75_p8, %p74_p6  ;;  %p3632_p10 = scmp.eq.s32.totalorder %s2868_s29, 0 }
  0xa0   : > { %p106_p12 = scmp.ne.s32.totalorder %s2670_s19, %s2666_s18  ;;  %p2997_p13 = por %p100_p3, %p75_p8 }
  0xa1   : > { %p2991_p11 = por %p3632_p10, %p80_p9  ;;  %p347_p0 = scmp.eq.s32.totalorder %s2868_s29, 3 }
  0xa2   : > { %p3635_p2 = pmov %p3632_p10  ;;  %p353_p5 = scmp.eq.s32.totalorder %s3580_s3, 3 }
  0xa3   : > { %s3633_s24 = scalar_select %p2991_p11, 1, 0 }
  0xa4   : > { %p3004_p4 = por %p106_p12, %p3635_p2  ;;  %p3010_p7 = por %p347_p0, %p74_p6 }
  0xa5   : > { %p1986_p10 = scmp.lt.s32.totalorder %s2706_s28, 4  ;;  %p3015_p11 = por %p353_p5, %p80_p9 }
  0xa6   : > { %s3636_s17 = scalar_select %p3004_p4, 1, 0 }
  0xa7   : > { %s3638_s26 = scalar_select %p3010_p7, 1, 0 }
  0xa8   : > { %3637 = sst [smem:[#allocation44_spill]] %s3636_s17  ;;  %s587_s14 = sand.u32 1, %s2706_s28  }
  0xa9   : > { %3639 = sst [smem:[#allocation45_spill]] %s3638_s26  ;;  %p3020_p8 = pnand %p1986_p10, %p76_p1 }
  0xaa   : > { %s3640_s18 = scalar_select %p3015_p11, 1, 0 }
  0xab   : > { %s3642_s25 = scalar_select %p3020_p8, 1, 0 }
  0xac   : > { %3641 = sst [smem:[#allocation46_spill]] %s3640_s18  ;;  %s3585_s30 = sand.u32 1, %s2674_s20  }
  0xad   : > { %s1714_s11 = sshll.u32 %s2702_s27, 4  ;;  %s3643_s1 = sld [smem:[#allocation48_spill]] }
  0xae   : > { %s590_s10 = scalar_lea.vmem [#allocation5], %s3585_s30  ;;  %p3037_p5 = pnand %p1986_p10, %p2997_p13 }
  0xaf   : > { %s597_s5 = sshll.u32 %s590_s10, 4  ;;  %s3645_s2 = sld [smem:[#allocation49_spill]]  ;;  %s3033_s5 = int_to_ptr.vmem [resolvable:$true] %s597_s5 }
  0xb0   : > { %s3644_s7 = scalar_select %p3037_p5, 1, 0 }
  0xb1   : > { %s3046_s0 = scalar_lea.sflag [#allocation6], %s587_s14  ;;  %p3592_p9 = pneg %p3037_p5 }
  0xb3   : > { %s3029_s3 = scalar_lea.hbm %s3643_s1, %s1714_s11  ;;  %s2243_s30 = scalar_lea.hbm %s3643_s1, 32 }
  0xb4   : > { %s2238_s21 = scalar_lea.hbm %s3029_s3, 16  ;;  %p2244_p12 = scmp.lt.u32.totalorder %s3029_s3, %s3643_s1 }
  0xb5   : > { %s3044_s12 = scalar_lea.hbm %s3645_s2, %s1714_s11  ;;  %p2239_p6 = scmp.ne.s32.totalorder %s3029_s3, %s2238_s21 }
  0xb6   : > { %p2245_p13 = scmp.lt.u32.totalorder %s2243_s30, %s2238_s21  ;;  %p2247_p2 = scmp.lt.u32.totalorder %s2238_s21, %s3029_s3 }
  0xb7   : > { %p2241_p1 = pnand %p3592_p9, %p2239_p6 }
  0xb8   : > { %p2246_p0 = por %p2245_p13, %p2244_p12 }
  0xb9   : > { %p2242_p3 = pneg %p2241_p1 }
  0xba   : > { %p2248_p10 = por %p2247_p2, %p2246_p0 }
  0xbc   : > { %p2249_p11 = pnand %p2248_p10, %p2242_p3 }
  0xbe   : > { %2252 = shalt.err (!%p2249_p11)
}
  0xbf   : > { %s2253_s18 = scalar_lea.vmem %s3033_s5, 16  ;;  %s2714_s14 = smov [#allocation5]  }
  0xc0   : > { %p2254_p6 = scmp.ne.s32.totalorder %s3033_s5, %s2253_s18  ;;  %s2258_s11 = sshll.u32 %s2714_s14, 4  ;;  %s2259_s11 = int_to_ptr.vmem [resolvable:$false] %s2258_s11 }
  0xc1   : > { %s2260_s28 = scalar_lea.vmem %s2259_s11, 32  ;;  %p2261_p4 = scmp.lt.s32.totalorder %s3033_s5, %s2259_s11 }
  0xc2   : > { %p2256_p1 = pnand %p2254_p6, %p3592_p9  ;;  %p2262_p12 = scmp.lt.s32.totalorder %s2260_s28, %s2253_s18 }
  0xc4   : > { %p2257_p7 = pneg %p2256_p1  ;;  %p2263_p13 = por %p2262_p12, %p2261_p4 }
  0xc6   : > { %p2264_p0 = pnand %p2263_p13, %p2257_p7 }
  0xc8   : > { %2267 = shalt.err (!%p2264_p0)
}
  0xc9   : > { %1960 = dma.hbm_to_vmem [thread:$0]  (!%p3037_p5), %s3029_s3, 16, %s3033_s5, %s3046_s0  }
  0xca   : > { %s2715_s21 = smov [#allocation10]   ;;  %s2716_s10 = smov [#allocation13]  }
  0xcb   : > { %s468_s30 = sshll.u32 %s2715_s21, 4  ;;  %s492_s16 = sshll.u32 %s2716_s10, 4  ;;  %s469_s30 = int_to_ptr.vmem [resolvable:$true] %s468_s30  ;;  %s493_s16 = int_to_ptr.vmem [resolvable:$true] %s492_s16 }
  0xcc   : > { %s3646_s4 = sld [smem:[#allocation51_spill]]  ;;  %p3647_p11 = scmp.ne.s32.totalorder %s3627_s15, 0 }
  0xd2   : > { %s2268_s11 = scalar_lea.hbm %s3646_s4, 16 }
  0xd3   : > { %p2269_p7 = scmp.ne.s32.totalorder %s3646_s4, %s2268_s11  ;;  %p2275_p2 = scmp.lt.u32.totalorder %s2268_s11, %s3646_s4 }
  0xd5   : > { %p2271_p4 = pnand %p2269_p7, %p3647_p11 }
  0xd7   : > { %p2272_p3 = pneg %p2271_p4 }
  0xd9   : > { %p2277_p10 = pnand %p2275_p2, %p2272_p3 }
  0xdb   : > { %2280 = shalt.err (!%p2277_p10)
}
  0xdc   : > { %s2281_s5 = scalar_lea.vmem %s469_s30, 16  ;;  %s2288_s3 = scalar_lea.vmem %s469_s30, 32 }
  0xdd   : > { %p2282_p6 = scmp.ne.s32.totalorder %s469_s30, %s2281_s5  ;;  %p2289_p13 = scmp.lt.s32.totalorder %s469_s30, %s469_s30 }
  0xde   : > { %p2290_p0 = scmp.lt.s32.totalorder %s2288_s3, %s2281_s5 }
  0xdf   : > { %p2284_p1 = pnand %p2282_p6, %p3647_p11 }
  0xe0   : > { %p2291_p9 = por %p2290_p0, %p2289_p13 }
  0xe1   : > { %p2285_p12 = pneg %p2284_p1 }
  0xe3   : > { %p2292_p5 = pnand %p2291_p9, %p2285_p12 }
  0xe5   : > { %2295 = shalt.err (!%p2292_p5)
}
  0xe6   : > { %p3648_p7 = scmp.ne.s32.totalorder %s3625_s13, 0  ;;  %s3649_s6 = sld [smem:[#allocation53_spill]] }
  0xe8   : > { %1932 = dma.hbm_to_vmem [thread:$0]  (!%p3648_p7), %s3646_s4, 16, %s469_s30, [#allocation9]  }
  0xec   : > { %s2296_s9 = scalar_lea.hbm %s3649_s6, 16 }
  0xed   : > { %p2297_p4 = scmp.ne.s32.totalorder %s3649_s6, %s2296_s9  ;;  %p2303_p5 = scmp.lt.u32.totalorder %s2296_s9, %s3649_s6 }
  0xef   : > { %p2299_p3 = pnand %p2297_p4, %p3647_p11 }
  0xf1   : > { %p2300_p9 = pneg %p2299_p3 }
  0xf3   : > { %p2305_p2 = pnand %p2303_p5, %p2300_p9 }
  0xf5   : > { %2308 = shalt.err (!%p2305_p2)
}
  0xf6   : > { %s2309_s5 = scalar_lea.vmem %s493_s16, 16  ;;  %s2316_s30 = scalar_lea.vmem %s493_s16, 32 }
  0xf7   : > { %p2310_p10 = scmp.ne.s32.totalorder %s493_s16, %s2309_s5  ;;  %p2317_p12 = scmp.lt.s32.totalorder %s493_s16, %s493_s16 }
  0xf8   : > { %p2318_p13 = scmp.lt.s32.totalorder %s2316_s30, %s2309_s5 }
  0xf9   : > { %p2312_p6 = pnand %p2310_p10, %p3647_p11 }
  0xfa   : > { %p2319_p0 = por %p2318_p13, %p2317_p12 }
  0xfb   : > { %p2313_p1 = pneg %p2312_p6 }
  0xfd   : > { %p2320_p8 = pnand %p2319_p0, %p2313_p1 }
  0xff   : > { %2323 = shalt.err (!%p2320_p8)
}
 0x100   : > { %1938 = dma.hbm_to_vmem [thread:$0]  (!%p3648_p7), %s3649_s6, 16, %s493_s16, [#allocation12]  }
 0x101   : > { %s2717_s10 = smov [#allocation16]   ;;  %s2718_s26 = smov [#allocation19]  }
 0x102   : > { %s514_s1 = sshll.u32 %s2717_s10, 4  ;;  %s537_s9 = sshll.u32 %s2718_s26, 4  ;;  %s515_s1 = int_to_ptr.vmem [resolvable:$true] %s514_s1  ;;  %s538_s9 = int_to_ptr.vmem [resolvable:$true] %s537_s9 }
 0x103   : > { %s3650_s18 = sld [smem:[#allocation55_spill]] }
 0x109   : > { %s3651_s4 = smov %s3650_s18  ;;  %s2324_s28 = scalar_lea.hbm %s3650_s18, 16 }
 0x10a   : > { %p2325_p8 = scmp.ne.s32.totalorder %s3651_s4, %s2324_s28  ;;  %p2331_p9 = scmp.lt.u32.totalorder %s2324_s28, %s3651_s4 }
 0x10c   : > { %p2327_p4 = pnand %p2325_p8, %p3647_p11 }
 0x10e   : > { %p2328_p3 = pneg %p2327_p4 }
 0x110   : > { %p2333_p5 = pnand %p2331_p9, %p2328_p3 }
 0x112   : > { %2336 = shalt.err (!%p2333_p5)
}
 0x113   : > { %s2337_s16 = scalar_lea.vmem %s515_s1, 16  ;;  %s2344_s21 = scalar_lea.vmem %s515_s1, 32 }
 0x114   : > { %p2338_p2 = scmp.ne.s32.totalorder %s515_s1, %s2337_s16  ;;  %p2345_p1 = scmp.lt.s32.totalorder %s515_s1, %s515_s1 }
 0x115   : > { %p2346_p12 = scmp.lt.s32.totalorder %s2344_s21, %s2337_s16 }
 0x116   : > { %p2340_p10 = pnand %p2338_p2, %p3647_p11 }
 0x117   : > { %p2347_p13 = por %p2346_p12, %p2345_p1 }
 0x118   : > { %p2341_p6 = pneg %p2340_p10 }
 0x11a   : > { %p2348_p0 = pnand %p2347_p13, %p2341_p6 }
 0x11c   : > { %2351 = shalt.err (!%p2348_p0)
}
 0x11d   : > { %1944 = dma.hbm_to_vmem [thread:$0]  (!%p3648_p7), %s3651_s4, 16, %s515_s1, [#allocation15]  }
 0x11e   : > { %s3652_s11 = sld [smem:[#allocation57_spill]] }
 0x124   : > { %s2352_s18 = scalar_lea.hbm %s3652_s11, 512 }
 0x125   : > { %p2353_p8 = scmp.ne.s32.totalorder %s3652_s11, %s2352_s18  ;;  %p2359_p9 = scmp.lt.u32.totalorder %s2352_s18, %s3652_s11 }
 0x127   : > { %p2355_p4 = pnand %p2353_p8, %p3647_p11 }
 0x129   : > { %p2356_p3 = pneg %p2355_p4 }
 0x12b   : > { %p2361_p5 = pnand %p2359_p9, %p2356_p3 }
 0x12d   : > { %2364 = shalt.err (!%p2361_p5)
}
 0x12e   : > { %s2365_s16 = scalar_lea.vmem %s538_s9, 512  ;;  %p2373_p1 = scmp.lt.s32.totalorder %s538_s9, %s538_s9 }
 0x12f   : > { %p2366_p2 = scmp.ne.s32.totalorder %s538_s9, %s2365_s16  ;;  %p2374_p12 = scmp.lt.s32.totalorder %s2365_s16, %s2365_s16 }
 0x131   : > { %p2368_p10 = pnand %p2366_p2, %p3647_p11  ;;  %p2375_p13 = por %p2374_p12, %p2373_p1 }
 0x133   : > { %p2369_p6 = pneg %p2368_p10 }
 0x135   : > { %p2376_p0 = pnand %p2375_p13, %p2369_p6 }
 0x137   : > { %2379 = shalt.err (!%p2376_p0)
}
 0x138   : > { %s3653_s1 = smov 4   ;;  %s2719_s26 = smov [#allocation20]  }
 0x139   : > { %1950 = dma.hbm_to_vmem [thread:$0]  (!%p3648_p7), %s3652_s11, 512, %s538_s9, [#allocation18], %s3631_s8, %s3631_s8, %s3653_s1  }
 0x13a   : > { %s550_s17 = sshll.u32 %s2719_s26, 4  ;;  %s3654_s28 = sld [smem:[#allocation58_spill]]  ;;  %s551_s17 = int_to_ptr.vmem [resolvable:$true] %s550_s17 }
 0x140   : > { %s3655_s5 = smov %s3654_s28  ;;  %s2380_s30 = scalar_lea.hbm %s3654_s28, 512 }
 0x141   : > { %p2381_p8 = scmp.ne.s32.totalorder %s3655_s5, %s2380_s30  ;;  %p2387_p9 = scmp.lt.u32.totalorder %s2380_s30, %s3655_s5 }
 0x143   : > { %p2383_p4 = pnand %p2381_p8, %p3647_p11 }
 0x145   : > { %p2384_p3 = pneg %p2383_p4 }
 0x147   : > { %p2389_p5 = pnand %p2387_p9, %p2384_p3 }
 0x149   : > { %2392 = shalt.err (!%p2389_p5)
}
 0x14a   : > { %s2393_s9 = scalar_lea.vmem %s551_s17, 512  ;;  %p2401_p1 = scmp.lt.s32.totalorder %s551_s17, %s551_s17 }
 0x14b   : > { %p2394_p2 = scmp.ne.s32.totalorder %s551_s17, %s2393_s9  ;;  %p2402_p12 = scmp.lt.s32.totalorder %s2393_s9, %s2393_s9 }
 0x14d   : > { %p2396_p10 = pnand %p2394_p2, %p3647_p11  ;;  %p2403_p13 = por %p2402_p12, %p2401_p1 }
 0x14f   : > { %p2397_p6 = pneg %p2396_p10 }
 0x151   : > { %p2404_p0 = pnand %p2403_p13, %p2397_p6 }
 0x153   : > { %2407 = shalt.err (!%p2404_p0)
}
 0x154   : > { %s3656_s21 = sld [smem:[#allocation41_spill]]  ;;  %s67_s10 = sadd.s32 1, %s2686_s23 }
 0x155   : > { %1953 = dma.hbm_to_vmem [thread:$0]  (!%p3648_p7), %s3655_s5, 512, %s551_s17, [#allocation21], %s3631_s8, %s3631_s8, %s3653_s1  }
 0x156   : > { %s564_s13 = sand.u32 1, %s2686_s23   ;;  %s3657_s14 = sadd.s32 1, %s2702_s27 }
 0x157   : > { %s1710_s26 = sshll.u32 %s564_s13, 5  ;;  %s1712_s30 = sshll.u32 %s2702_s27, 3 }
 0x158   : > { %s568_s3 = scalar_lea.vmem [#allocation2], %s1710_s26  ;;  %s3658_s5 = sld [smem:[#allocation47_spill]] }
 0x159   : > { %s577_s8 = sshll.u32 %s568_s3, 4  ;;  %s3659_s26 = sadd.s32 1, %s2674_s20  ;;  %s3184_s8 = int_to_ptr.vmem [resolvable:$true] %s577_s8 }
 0x15a   : > { %s55_s15 = sadd.s32 1, %s3656_s21  ;;  %s1711_s28 = sshll.u32 %s3656_s21, 2 }
 0x15b   : > { %p56_p11 = scmp.ge.s32.totalorder %s55_s15, 2  ;;  %s574_s1 = sadd.s32 %s1712_s30, %s1711_s28 }
 0x15c   : > { %s1713_s16 = sshll.u32 %s574_s1, 7  ;;  %s3201_s30 = scalar_lea.sflag [#allocation3], %s564_s13 }
 0x15d   : > { %s3706_s15 = smov (%p56_p11, %s55_s15), 0  ;;  %s3708_s14 = smov (!%p56_p11, %s3657_s14), %s2702_s27 }
 0x15e   : > { %s63_s18 = ssub.s32 %s3656_s21, %s3706_s15  ;;  %p60_p8 = scmp.ge.s32.totalorder %s3708_s14, 2 }
 0x15f   : > { %s3191_s21 = scalar_lea.hbm %s3658_s5, %s1713_s16  ;;  %p3660_p9 = scmp.ne.s32.totalorder %s3642_s25, 0 }
 0x160   : > { %s3710_s14 = smov (%p60_p8, %s3708_s14), 0  ;;  %s2408_s1 = scalar_lea.hbm %s3191_s21, 512 }
 0x161   : > { %s62_s17 = ssub.s32 %s2702_s27, %s3710_s14  ;;  %p2409_p3 = scmp.ne.s32.totalorder %s3191_s21, %s2408_s1 }
 0x162   : > { %s64_s9 = sor.u32 %s63_s18, %s62_s17  ;;  %p91_p7 = scmp.eq.s32.totalorder %s62_s17, 0 }
 0x163   : > { %p65_p4 = scmp.eq.s32.totalorder %s64_s9, 0  ;;  %p2410_p5 = pneg %p3660_p9 }
 0x164   : > { %s3196_s3 = scalar_select %p91_p7, %s2674_s20, %s3659_s26  }
 0x165   : > { %s3199_s28 = scalar_select %p65_p4, %s2686_s23, %s67_s10  }
 0x166   : > { %p2411_p2 = pnand %p2410_p5, %p2409_p3  ;;  %s2413_s16 = scalar_lea.hbm %s3658_s5, 2048 }
 0x167   : > { %p2414_p6 = scmp.lt.u32.totalorder %s3191_s21, %s3658_s5  ;;  %p2415_p1 = scmp.lt.u32.totalorder %s2413_s16, %s2408_s1 }
 0x168   : > { %p2412_p10 = pneg %p2411_p2  ;;  %p2417_p13 = scmp.lt.u32.totalorder %s2408_s1, %s3191_s21 }
 0x169   : > { %p2416_p12 = por %p2415_p1, %p2414_p6 }
 0x16b   : > { %p2418_p0 = por %p2417_p13, %p2416_p12 }
 0x16d   : > { %p2419_p11 = pnand %p2418_p0, %p2412_p10 }
 0x16f   : > { %2422 = shalt.err (!%p2419_p11)
}
 0x170   : > { %s2423_s10 = scalar_lea.vmem %s3184_s8, 512  ;;  %s2720_s13 = smov [#allocation2]  }
 0x171   : > { %p2424_p8 = scmp.ne.s32.totalorder %s3184_s8, %s2423_s10  ;;  %s2428_s6 = sshll.u32 %s2720_s13, 4  ;;  %s2429_s6 = int_to_ptr.vmem [resolvable:$false] %s2428_s6 }
 0x172   : > { %s2430_s26 = scalar_lea.vmem %s2429_s6, 1024  ;;  %p2431_p3 = scmp.lt.s32.totalorder %s3184_s8, %s2429_s6 }
 0x173   : > { %p2426_p7 = pnand %p2424_p8, %p2410_p5  ;;  %p2432_p2 = scmp.lt.s32.totalorder %s2430_s26, %s2423_s10 }
 0x175   : > { %p2427_p4 = pneg %p2426_p7  ;;  %p2433_p6 = por %p2432_p2, %p2431_p3 }
 0x177   : > { %p2434_p1 = pnand %p2433_p6, %p2427_p4 }
 0x179   : > { %2437 = shalt.err (!%p2434_p1)
}
 0x17a   : > { %s2721_s1 = smov 128   ;;  %s2722_s18 = smov 8  }
 0x17b   : > { %1957 = dma.hbm_to_vmem [thread:$0]  (!%p3660_p9), %s3191_s21, 512, %s3184_s8, %s3201_s30, %s2721_s1, %s2721_s1, %s2722_s18  }
 0x17c   : > { %s3661_s17 = sand.u32 1, %s2674_s20   ;;  %s2438_s4 = scalar_lea.hbm %s3044_s12, 16 }
 0x17d   : > { %s607_s16 = scalar_lea.vmem [#allocation7], %s3661_s17  ;;  %p2439_p5 = scmp.ne.s32.totalorder %s3044_s12, %s2438_s4 }
 0x17e   : > { %s614_s9 = sshll.u32 %s607_s16, 4  ;;  %p3662_p10 = scmp.ne.s32.totalorder %s3644_s7, 0  ;;  %s615_s9 = int_to_ptr.vmem [resolvable:$true] %s614_s9 }
 0x17f   : > { %s2443_s6 = scalar_lea.hbm %s3645_s2, 32  ;;  %p2444_p11 = scmp.lt.u32.totalorder %s3044_s12, %s3645_s2 }
 0x180   : > { %p3663_p12 = pneg %p3662_p10  ;;  %p2445_p8 = scmp.lt.u32.totalorder %s2443_s6, %s2438_s4 }
 0x181   : > { %p2447_p7 = scmp.lt.u32.totalorder %s2438_s4, %s3044_s12 }
 0x182   : > { %p2441_p13 = pnand %p2439_p5, %p3663_p12  ;;  %p2446_p9 = por %p2445_p8, %p2444_p11 }
 0x184   : > { %p2442_p0 = pneg %p2441_p13  ;;  %p2448_p4 = por %p2447_p7, %p2446_p9 }
 0x186   : > { %p2449_p3 = pnand %p2448_p4, %p2442_p0 }
 0x188   : > { %2452 = shalt.err (!%p2449_p3)
}
 0x189   : > { %s2453_s25 = scalar_lea.vmem %s615_s9, 16  ;;  %p3664_p6 = pmov %p3663_p12 }
 0x18a   : > { %p2454_p2 = scmp.ne.s32.totalorder %s615_s9, %s2453_s25  ;;  %s2723_s8 = smov [#allocation7]  }
 0x18b   : > { %s2458_s21 = sshll.u32 %s2723_s8, 4  ;;  %s2459_s21 = int_to_ptr.vmem [resolvable:$false] %s2458_s21 }
 0x18c   : > { %p2456_p1 = pnand %p2454_p2, %p3664_p6  ;;  %s2460_s30 = scalar_lea.vmem %s2459_s21, 32 }
 0x18d   : > { %p2461_p12 = scmp.lt.s32.totalorder %s615_s9, %s2459_s21  ;;  %p2462_p13 = scmp.lt.s32.totalorder %s2460_s30, %s2453_s25 }
 0x18e   : > { %p2457_p5 = pneg %p2456_p1 }
 0x18f   : > { %p2463_p8 = por %p2462_p13, %p2461_p12 }
 0x191   : > { %p2464_p11 = pnand %p2463_p8, %p2457_p5 }
 0x193   : > { %2467 = shalt.err (!%p2464_p11)
}
 0x194   : > { %1963 = dma.hbm_to_vmem [thread:$0]  (!%p3662_p10), %s3044_s12, 16, %s615_s9, %s3046_s0  }
 0x195   : > { %s3665_s5 = sld [smem:[#allocation43_spill]] }
 0x19b   : > { %p3666_p0 = scmp.ne.s32.totalorder %s3665_s5, 0 }
 0x19c   : > { %s3254_s1 = sand.u32 (!%p3666_p0), 1, %s2682_s22   ;;  %p3667_p9 = scmp.ne.s32.totalorder (!%p3666_p0), %s3633_s24, 0 }
 0x19d   : > { %623 = sbr.rel (%p3666_p0) target bundleno = 1288 (0x508), region = 68  ;;  %s1717_s18 = sshll.u32 (!%p3666_p0), %s3254_s1, 5 }
 0x19e   : > { %s626_s17 = scalar_lea.sflag (!%p3666_p0), [#allocation3], %s3254_s1  ;;  %s3260_s16 = scalar_lea.vmem (!%p3666_p0), [#allocation2], %s1717_s18 }
 0x1a4   : > { %2625 = dma.done.wait (%p3667_p9), %s626_s17, 512  }
 0x1a5   : > { %2627 = vsyncadd (%p3667_p9), %s626_s17, 4294966784  ;;  %s3668_s7 = sld [smem:[#allocation44_spill]]  ;;  %s634_s12 = sand.u32 1, %s2868_s29  }
 0x1a6   : > { %s636_s0 = sand.u32 1, %s2670_s19   ;;  %s635_s9 = scalar_lea.sflag [#allocation6], %s634_s12 }
 0x1a7   : > { %s637_s4 = scalar_lea.vmem [#allocation5], %s636_s0 }
 0x1ab   : > { %p3669_p10 = scmp.ne.s32.totalorder %s3668_s7, 0 }
 0x1ad   : > { %2629 = dma.done.wait (%p3669_p10), %s635_s9, 32  }
 0x1ae   : > { %2631 = vsyncadd (%p3669_p10), %s635_s9, 4294967264  ;;  %s645_s10 = scalar_lea.vmem [#allocation7], %s636_s0  ;;  %p3670_p7 = scmp.eq.s32.totalorder %s2868_s29, 0 }
 0x1b0   : > { %2633 = dma.done.wait (%p3670_p7), [#allocation9], 32   ;;  %p3671_p4 = pmov %p3670_p7 }
 0x1b2   : > { %2635 = vsyncadd (%p3671_p4), [#allocation9], 4294967264  ;;  %p3672_p3 = pmov %p3671_p4 }
 0x1b4   : > { %2637 = dma.done.wait (%p3672_p3), [#allocation12], 528   ;;  %p3673_p2 = pmov %p3672_p3 }
 0x1b6   : > { %2639 = vsyncadd (%p3673_p2), [#allocation12], 4294966768  ;;  %p3674_p6 = pmov %p3673_p2 }
 0x1b7   : > { %p3675_p1 = pmov %p3673_p2 }
 0x1b8   : > { %2641 = dma.done.wait (%p3674_p6), [#allocation15], 32  }
 0x1b9   : > { %2643 = vsyncadd (%p3675_p1), [#allocation15], 4294967264  ;;  %p3676_p5 = pmov %p3675_p1 }
 0x1ba   : > { %p3677_p12 = pmov %p3675_p1 }
 0x1bb   : > { %2645 = dma.done.wait (%p3676_p5), [#allocation18], 1024  }
 0x1bc   : > { %2647 = vsyncadd (%p3677_p12), [#allocation18], 4294966272  ;;  %p3678_p13 = pmov %p3675_p1 }
 0x1bd   : > { %p3679_p8 = pmov %p3675_p1 }
 0x1be   : > { %2649 = dma.done.wait (%p3678_p13), [#allocation21], 512  }
 0x1bf   : > { %2651 = vsyncadd (%p3679_p8), [#allocation21], 4294966784  ;;  %v2102_v0 = vld [vmem:[#allocation11] sm:$0xff]   ;;  %v2103_v1 = vld [vmem:[#allocation11 + $0x8] sm:$0xff]   ;;  %vm846_vm0 = vcmask 523264   ;;  %s3302_s24 = scalar_lea.vmem [#allocation22], %s1717_s18 }
 0x1c0   : > { %1828 = vmatprep.subr.bf16.mxu0 %v2102_v0  ;;  %v2104_v2 = vld [vmem:[#allocation11 + $0x10] sm:$0xff]   ;;  %v757_v3 = vld [vmem:[%s3260_s16] sm:$0xff]  ;;  %v758_v4 = vld [vmem:[%s3260_s16 + $0x8] sm:$0xff]  ;;  %s3680_s13 = sld [smem:[#allocation39_spill]]  ;;  %s3681_s6 = sld [smem:[#allocation40_spill]] }
 0x1c1   : > { %1829 = vmatpush3.bf16.msra.mxu0 %v2102_v0  ;;  %v1731_v5 = vld [vmem:[%s637_s4] ss:$0 sm:$0xff]  ;;  %v1733_v9 = vld [vmem:[#allocation8] ss:$0 sm:$0xff]  ;;  %v1734_v11 = vld [vmem:[#allocation10] ss:$0 sm:$0xff] }
 0x1c2   : > { %1830 = vmatprep.subr.bf16.mxu0 %v2103_v1  ;;  %v768_v6 = vsub.f32 %v757_v3, %v1731_v5  ;;  %v769_v7 = vsub.f32 %v758_v4, %v1731_v5  ;;  %v1732_v8 = vld [vmem:[%s645_s10] ss:$0 sm:$0xff]  ;;  %v759_v12 = vld [vmem:[%s3260_s16 + $0x10] sm:$0xff]  ;;  %v760_v13 = vld [vmem:[%s3260_s16 + $0x18] sm:$0xff]  ;;  %s3682_s26 = sld [smem:[#allocation45_spill]]  ;;  %s1328_s21 = sshll.u32 %s3302_s24, 4  ;;  %s3341_s21 = int_to_ptr.vmem [resolvable:$true] %s1328_s21 }
 0x1c3   : > { %v2105_v10 = vld [vmem:[#allocation11 + $0x18] sm:$0xff]   ;;  %v770_v16 = vsub.f32 %v759_v12, %v1731_v5  ;;  %v771_v17 = vsub.f32 %v760_v13, %v1731_v5  ;;  %v1735_v30 = vld [vmem:[#allocation13] ss:$0 sm:$0xff]  ;;  %v2106_v63 = vld [vmem:[#allocation17] sm:$0xff]   ;;  %s3683_s16 = sld [smem:[#allocation59_spill]]  ;;  %s1298_s0 = scalar_lea.sflag [#allocation4], %s3254_s1 }
 0x1c4   : > { %v779_v14 = vmul.f32 %v1732_v8, %v768_v6  ;;  %v780_v15 = vmul.f32 %v1732_v8, %v769_v7  ;;  %v2107_v0 = vld [vmem:[#allocation19] sm:$0xff]   ;;  %1840 = vmatprep.subr.bf16.mxu1 %v2106_v63  ;;  %v2110_v3 = vld [vmem:[#allocation17 + $0x10] sm:$0xff]   ;;  %v2112_v5 = vld [vmem:[#allocation17 + $0x18] sm:$0xff]   ;;  %s2468_s9 = scalar_lea.vmem %s3341_s21, 512  ;;  %s2724_s4 = smov [#allocation22]  }
 0x1c5   : > { %1831 = vmatpush3.bf16.msra.mxu0 %v2103_v1  ;;  %v781_v20 = vmul.f32 %v1732_v8, %v770_v16  ;;  %v782_v21 = vmul.f32 %v1732_v8, %v771_v17  ;;  %1841 = vmatpush3.bf16.msra.mxu1 %v2106_v63  ;;  %v2108_v1 = vld [vmem:[#allocation17 + $0x8] sm:$0xff]   ;;  %v2111_v4 = vld [vmem:[#allocation19 + $0x10] sm:$0xff]   ;;  %v2113_v6 = vld [vmem:[#allocation19 + $0x18] sm:$0xff]   ;;  %p2469_p11 = scmp.ne.s32.totalorder %s3341_s21, %s2468_s9  ;;  %s2472_s10 = sshll.u32 %s2724_s4, 4  ;;  %s2473_s10 = int_to_ptr.vmem [resolvable:$false] %s2472_s10 }
 0x1c6   : > { %1832 = vmatprep.subr.bf16.mxu0 %v2104_v2  ;;  %v790_v18 = vmul.f32 %v1733_v9, %v779_v14  ;;  %v791_v19 = vmul.f32 %v1733_v9, %v780_v15  ;;  %1842 = vmatprep.subr.bf16.mxu1 %v2108_v1  ;;  %v2114_v7 = vld [vmem:[#allocation20] sm:$0xff]   ;;  %s1778_s25 = sshll.u32 %s3680_s13, 2  ;;  %s1779_s8 = sshll.u32 %s3681_s6, 3 }
 0x1c7   : > { %v792_v24 = vmul.f32 %v1733_v9, %v781_v20  ;;  %v793_v25 = vmul.f32 %v1733_v9, %v782_v21  ;;  %s3339_s30 = sadd.s32 %s1779_s8, %s1778_s25  ;;  %p2475_p7 = scmp.lt.s32.totalorder %s3341_s21, %s2473_s10 }
 0x1c8   : > { %v801_v22 = vadd.f32 %v1734_v11, %v790_v18  ;;  %v802_v23 = vadd.f32 %v1734_v11, %v791_v19  ;;  %s1780_s5 = sshll.u32 %s3339_s30, 7  ;;  %p3684_p0 = scmp.ne.s32.totalorder %s3682_s26, 0 }
 0x1c9   : > { %1833 = vmatpush3.bf16.msra.mxu0 %v2104_v2  ;;  %v803_v27 = vadd.f32 %v1734_v11, %v792_v24  ;;  %v804_v28 = vadd.f32 %v1734_v11, %v793_v25  ;;  %v2109_v2 = vld [vmem:[#allocation19 + $0x8] sm:$0xff]   ;;  %1843 = vmatpush3.bf16.msra.mxu1 %v2108_v1  ;;  %s3347_s7 = scalar_lea.hbm %s3683_s16, %s1780_s5 }
 0x1ca   : > { %1834 = vmatprep.subr.bf16.mxu0 %v2105_v10  ;;  %v813_v26 = vpack.c.bf16 %v802_v23, %v801_v22  ;;  %1844 = vmatprep.subr.bf16.mxu1 %v2110_v3  ;;  %v1742_v22 = vld [vmem:[#allocation14] ss:$0 sm:$0xff]  ;;  %p2470_p9 = pnand %p2469_p11, %p3684_p0 }
 0x1cb   : > { %v814_v29 = vpack.c.bf16 %v804_v28, %v803_v27  ;;  %v1743_v28 = vld [vmem:[#allocation16] ss:$0 sm:$0xff] }
 0x1cc   : > { %1836 = vmatprep.mubr.msk.bf16.mxu0 %vm846_vm0, %v813_v26  ;;  %p2471_p10 = pneg %p2470_p9 }
 0x1cd   : > { %1835 = vmatpush3.bf16.msra.mxu0 %v2105_v10  ;;  %1845 = vmatpush3.bf16.msra.mxu1 %v2110_v3 }
 0x1ce   : > { %1852 = vmatprep.subr.bf16.mxu0 %v2107_v0  ;;  %1846 = vmatprep.subr.bf16.mxu1 %v2112_v5 }
 0x1d0   : > { %1837 = vmatmul.mubr.msk.bf16.vlgmr.msra.gmra.mrb[0].mxu0 %vm846_vm0, %v814_v29 }
 0x1d1   : > { %1853 = vmatpush3.bf16.msra.mxu0 %v2107_v0  ;;  %1847 = vmatpush3.bf16.msra.mxu1 %v2112_v5 }
 0x1d2   : > { %1854 = vmatprep.subr.bf16.mxu0 %v2109_v2  ;;  %1864 = vmatprep.subr.bf16.mxu1 %v2114_v7 }
 0x1d5   : > { %1855 = vmatpush3.bf16.msra.mxu0 %v2109_v2 }
 0x1d6   : > { %1856 = vmatprep.subr.bf16.mxu0 %v2111_v4 }
 0x1d9   : > { %1857 = vmatpush3.bf16.msra.mxu0 %v2111_v4 }
 0x1da   : > { %1858 = vmatprep.subr.bf16.mxu0 %v2113_v6 }
 0x1dd   : > { %1859 = vmatpush3.bf16.msra.mxu0 %v2113_v6 }
 0x2a3   : > { %v1838_v31 = vpop.f32.mrb[0].mxu0 }
 0x2a4   : > { %v896_v32 = vadd.f32 %v1838_v31, %v1735_v30  ;;  %v887_v33 = vpop.f32.mrb[1].mxu0 }
 0x2a5   : > { %v888_v34 = vadd.f32 %v1735_v30, %v887_v33  ;;  %v1839_v35 = vpop.f32.mrb[2].mxu0 }
 0x2a6   : > { %904 = vst.msk [vmem:[%s3302_s24 + $0x10] sm:$0xff] %vm846_vm0, %v896_v32  ;;  %v899_v36 = vadd.f32 %v1839_v35, %v1735_v30  ;;  %v890_v37 = vpop.f32.mrb[3].mxu0  ;;  %v914_v38 = vsel %vm846_vm0, %v896_v32, 0.0 }
 0x2a7   : > { %902 = vst.msk [vmem:[%s3302_s24] sm:$0xff] %vm846_vm0, %v888_v34  ;;  %v891_v39 = vadd.f32 %v1735_v30, %v890_v37  ;;  %915 = vadd.xlane.f32.xlu1 %v914_v38  ;;  %v908_v40 = vsel %vm846_vm0, %v888_v34, 0.0 }
 0x2a8   : > { %905 = vst.msk [vmem:[%s3302_s24 + $0x18] sm:$0xff] %vm846_vm0, %v899_v36  ;;  %909 = vadd.xlane.f32.xlu0 %v908_v40  ;;  %v917_v41 = vsel %vm846_vm0, %v899_v36, 0.0  ;;  %v2115_v40 = vld [vmem:[#allocation20 + $0x8] sm:$0xff]  }
 0x2a9   : > { %903 = vst.msk [vmem:[%s3302_s24 + $0x8] sm:$0xff] %vm846_vm0, %v891_v39  ;;  %v911_v42 = vsel %vm846_vm0, %v891_v39, 0.0  ;;  %s2474_s24 = scalar_lea.vmem %s2473_s10, 1024 }
 0x2aa   : > { %p2476_p4 = scmp.lt.s32.totalorder %s2474_s24, %s2468_s9 }
 0x2ab   : > { %918 = vadd.xlane.f32.xlu1 %v917_v41  ;;  %v2116_v41 = vld [vmem:[#allocation20 + $0x10] sm:$0xff]  }
 0x2ac   : > { %912 = vadd.xlane.f32.xlu0 %v911_v42  ;;  %v2117_v42 = vld [vmem:[#allocation20 + $0x18] sm:$0xff]   ;;  %p2477_p3 = por %p2476_p4, %p2475_p7 }
 0x2ae   : > { %p2478_p2 = pnand %p2477_p3, %p2471_p10 }
 0x334   : > { %v916_v43 = vpop.xlane.xlu1 %915 }
 0x335   : > { %v923_v44 = vmul.f32 0.015625, %v916_v43  ;;  %v910_v45 = vpop.xlane.xlu0 %909 }
 0x336   : > { %v921_v46 = vmul.f32 0.015625, %v910_v45 }
 0x337   : > { %v3316_v47 = vsub.f32 %v896_v32, %v923_v44 }
 0x338   : > { %v925_v48 = vsub.f32 %v888_v34, %v921_v46  ;;  %v919_v49 = vpop.xlane.xlu1 %918 }
 0x339   : > { %v924_v50 = vmul.f32 0.015625, %v919_v49  ;;  %v913_v51 = vpop.xlane.xlu0 %912  ;;  %v931_v57 = vmul.f32 %v3316_v47, %v3316_v47 }
 0x33a   : > { %v922_v52 = vmul.f32 0.015625, %v913_v51  ;;  %v929_v53 = vmul.f32 %v925_v48, %v925_v48 }
 0x33b   : > { %v3318_v54 = vsub.f32 %v899_v36, %v924_v50  ;;  %v939_v59 = vsel %vm846_vm0, %v931_v57, 0.0 }
 0x33c   : > { %v926_v55 = vsub.f32 %v891_v39, %v922_v52  ;;  %v933_v56 = vsel %vm846_vm0, %v929_v53, 0.0 }
 0x33d   : > { %934 = vadd.xlane.f32.xlu0 %v933_v56  ;;  %v932_v61 = vmul.f32 %v3318_v54, %v3318_v54 }
 0x33e   : > { %v930_v58 = vmul.f32 %v926_v55, %v926_v55 }
 0x33f   : > { %v942_v62 = vsel %vm846_vm0, %v932_v61, 0.0 }
 0x340   : > { %v936_v60 = vsel %vm846_vm0, %v930_v58, 0.0 }
 0x341   : > { %940 = vadd.xlane.f32.xlu0 %v939_v59  ;;  %937 = vadd.xlane.f32.xlu1 %v936_v60 }
 0x345   : > { %943 = vadd.xlane.f32.xlu1 %v942_v62 }
 0x3ca   : > { %v935_v8 = vpop.xlane.xlu0 %934 }
 0x3cb   : > { %v945_v9 = vmul.f32 0.015625, %v935_v8 }
 0x3cd   : > { %v949_v10 = vadd.f32 1e-05, %v945_v9 }
 0x3ce   : > { %v938_v11 = vpop.xlane.xlu1 %937  ;;  %v941_v12 = vpop.xlane.xlu0 %940 }
 0x3cf   : > { %2118 = vrsqrt.f32 %v949_v10  ;;  %v946_v13 = vmul.f32 0.015625, %v938_v11  ;;  %v947_v14 = vmul.f32 0.015625, %v941_v12 }
 0x3d1   : > { %v950_v15 = vadd.f32 1e-05, %v946_v13  ;;  %v951_v16 = vadd.f32 1e-05, %v947_v14 }
 0x3d2   : > { %v944_v17 = vpop.xlane.xlu1 %943 }
 0x3d3   : > { %2120 = vrsqrt.f32 %v950_v15  ;;  %v948_v18 = vmul.f32 0.015625, %v944_v17 }
 0x3d4   : > { %2122 = vrsqrt.f32 %v951_v16 }
 0x3d5   : > { %v952_v19 = vadd.f32 1e-05, %v948_v18 }
 0x3d7   : > { %2124 = vrsqrt.f32 %v952_v19 }
 0x3d9   : > { %v2119_v20 = vpop.eup %2118 }
 0x3da   : > { %v957_v21 = vmul.f32 %v2119_v20, %v925_v48 }
 0x3dc   : > { %v967_v26 = vmul.f32 %v1742_v22, %v957_v21 }
 0x3dd   : > { %v2121_v23 = vpop.eup %2120 }
 0x3de   : > { %v2123_v24 = vpop.eup %2122  ;;  %v958_v25 = vmul.f32 %v2121_v23, %v926_v55  ;;  %v977_v32 = vadd.f32 %v1743_v28, %v967_v26 }
 0x3df   : > { %v959_v27 = vmul.f32 %v2123_v24, %v3316_v47 }
 0x3e0   : > { %v968_v29 = vmul.f32 %v1742_v22, %v958_v25 }
 0x3e1   : > { %v2125_v30 = vpop.eup %2124  ;;  %v969_v34 = vmul.f32 %v1742_v22, %v959_v27 }
 0x3e2   : > { %v960_v31 = vmul.f32 %v2125_v30, %v3318_v54  ;;  %v978_v33 = vadd.f32 %v1743_v28, %v968_v29 }
 0x3e3   : > { %v979_v37 = vadd.f32 %v1743_v28, %v969_v34 }
 0x3e4   : > { %v981_v35 = vpack.c.bf16 %v978_v33, %v977_v32  ;;  %v970_v36 = vmul.f32 %v1742_v22, %v960_v31 }
 0x3e6   : > { %1848 = vmatprep.mubr.msk.bf16.mxu1 %vm846_vm0, %v981_v35  ;;  %1860 = vmatprep.mubr.msk.bf16.mxu0 %vm846_vm0, %v981_v35  ;;  %v980_v38 = vadd.f32 %v1743_v28, %v970_v36 }
 0x3e8   : > { %v982_v39 = vpack.c.bf16 %v980_v38, %v979_v37 }
 0x3ea   : > { %1849 = vmatmul.mubr.msk.bf16.vlgmr.msra.gmra.mrb[0].mxu1 %vm846_vm0, %v982_v39  ;;  %1861 = vmatmul.mubr.msk.bf16.vlgmr.msra.gmra.mrb[4].mxu0 %vm846_vm0, %v982_v39 }
 0x3eb   : > { %1865 = vmatpush3.bf16.msra.mxu1 %v2114_v7  ;;  %1872 = vmatprep.mubr.msk.bf16.mxu1 %vm846_vm0, %v981_v35 }
 0x3ec   : > { %1866 = vmatprep.subr.bf16.mxu1 %v2115_v40 }
 0x3ef   : > { %1867 = vmatpush3.bf16.msra.mxu1 %v2115_v40 }
 0x3f0   : > { %1868 = vmatprep.subr.bf16.mxu1 %v2116_v41 }
 0x3f3   : > { %1869 = vmatpush3.bf16.msra.mxu1 %v2116_v41 }
 0x3f4   : > { %1870 = vmatprep.subr.bf16.mxu1 %v2117_v42 }
 0x3f7   : > { %1871 = vmatpush3.bf16.msra.mxu1 %v2117_v42 }
 0x3fa   : > { %1873 = vmatmul.mubr.msk.bf16.vlgmr.msra.gmra.mrb[4].mxu1 %vm846_vm0, %v982_v39 }
 0x3fb   : > { %2481 = shalt.err (!%p2478_p2)
}
 0x3fc   : > { %s2482_s13 = scalar_lea.hbm %s3347_s7, 512  ;;  %s2486_s8 = scalar_lea.hbm %s3683_s16, 2048 }
 0x3fd   : > { %p2483_p6 = scmp.ne.s32.totalorder %s3347_s7, %s2482_s13  ;;  %p2487_p12 = scmp.lt.u32.totalorder %s3347_s7, %s3683_s16 }
 0x3fe   : > { %p2488_p13 = scmp.lt.u32.totalorder %s2486_s8, %s2482_s13  ;;  %p2490_p11 = scmp.lt.u32.totalorder %s2482_s13, %s3347_s7 }
 0x3ff   : > { %p2484_p1 = pnand %p2483_p6, %p3684_p0 }
 0x400   : > { %p2489_p8 = por %p2488_p13, %p2487_p12 }
 0x401   : > { %p2485_p5 = pneg %p2484_p1 }
 0x402   : > { %p2491_p9 = por %p2490_p11, %p2489_p8 }
 0x404   : > { %p2492_p10 = pnand %p2491_p9, %p2485_p5 }
 0x406   : > { %2495 = shalt.err (!%p2492_p10)
}
 0x407   : > { %s2725_s17 = smov 128   ;;  %s2726_s9 = smov 8   ;;  %vm1090_vm1 = vcmask 519168  }
 0x408   : > { %1918 = dma.vmem_to_hbm [thread:$0]  (%p3684_p0), %s3341_s21, 512, %s3347_s7, %s1298_s0, %s2725_s17, %s2725_s17, %s2726_s9  }
 0x409   : > { %s3374_s4 = sshll.u32 %s3254_s1, 4  ;;  %s3381_s21 = sshll.u32 %s3339_s30, 6 }
 0x40a   : > { %s3377_s10 = scalar_lea.vmem [#allocation23], %s3374_s4  ;;  %s743_s7 = scalar_lea.vmem [#allocation25], %s3374_s4 }
 0x40b   : > { %s1346_s24 = sshll.u32 %s3377_s10, 4  ;;  %s1364_s0 = sshll.u32 %s743_s7, 4  ;;  %s3385_s24 = int_to_ptr.vmem [resolvable:$true] %s1346_s24  ;;  %s3400_s0 = int_to_ptr.vmem [resolvable:$true] %s1364_s0 }
 0x40c   : > { %s3685_s6 = sld [smem:[#allocation60_spill]]  ;;  %s3686_s18 = sld [smem:[#allocation61_spill]] }
 0x40d   : > { %s3414_s30 = scalar_lea.sflag [#allocation24], %s634_s12  ;;  %s2496_s13 = scalar_lea.vmem %s3385_s24, 256 }
 0x40e   : > { %p2497_p7 = scmp.ne.s32.totalorder %s3385_s24, %s2496_s13 }
 0x410   : > { %p2498_p4 = pnand %p2497_p7, %p3684_p0 }
 0x412   : > { %s3395_s25 = scalar_lea.hbm %s3685_s6, %s3381_s21  ;;  %s3687_s17 = smov %s3686_s18 }
 0x413   : > { %s3408_s9 = scalar_lea.hbm %s3686_s18, %s3381_s21  ;;  %p2499_p3 = pneg %p2498_p4 }
 0x4bd   : > { %v1850_v43 = vpop.f32.mrb[0].mxu1  ;;  %v1862_v44 = vpop.f32.mrb[4].mxu0 }
 0x4be   : > { %v1072_v45 = vmul.f32 0.25, %v1850_v43  ;;  %v1798_v46 = vpack.c.bf16 %v1862_v44, %v1862_v44  ;;  %v1055_v47 = vpop.f32.mrb[1].mxu1  ;;  %v1161_v48 = vpop.f32.mrb[5].mxu0 }
 0x4bf   : > { %v1070_v49 = vmul.f32 0.25, %v1055_v47  ;;  %v1796_v50 = vpack.c.bf16 %v1161_v48, %v1161_v48  ;;  %v1851_v51 = vpop.f32.mrb[2].mxu1  ;;  %v1863_v52 = vpop.f32.mrb[6].mxu0 }
 0x4c0   : > { %v1794_v53 = vpack.c.bf16 %v1072_v45, %v1072_v45  ;;  %1194 = vst.msk [vmem:[%s743_s7 + $0x8] sm:$0xf] %vm1090_vm1, %v1798_v46  ;;  %v1073_v54 = vmul.f32 0.25, %v1851_v51  ;;  %v1799_v55 = vpack.c.bf16 %v1863_v52, %v1863_v52  ;;  %v1058_v56 = vpop.f32.mrb[3].mxu1  ;;  %v1164_v57 = vpop.f32.mrb[7].mxu0 }
 0x4c1   : > { %v1792_v58 = vpack.c.bf16 %v1070_v49, %v1070_v49  ;;  %1192 = vst.msk [vmem:[%s743_s7] sm:$0xf] %vm1090_vm1, %v1796_v50  ;;  %v1071_v59 = vmul.f32 0.25, %v1058_v56  ;;  %v1797_v60 = vpack.c.bf16 %v1164_v57, %v1164_v57 }
 0x4c2   : > { %1093 = vst.msk [vmem:[%s3377_s10 + $0x8] sm:$0xf] %vm1090_vm1, %v1794_v53  ;;  %v1795_v61 = vpack.c.bf16 %v1073_v54, %v1073_v54  ;;  %1195 = vst.msk [vmem:[%s743_s7 + $0xc] sm:$0xf] %vm1090_vm1, %v1799_v55 }
 0x4c3   : > { %1091 = vst.msk [vmem:[%s3377_s10] sm:$0xf] %vm1090_vm1, %v1792_v58  ;;  %v1793_v62 = vpack.c.bf16 %v1071_v59, %v1071_v59  ;;  %1193 = vst.msk [vmem:[%s743_s7 + $0x4] sm:$0xf] %vm1090_vm1, %v1797_v60  ;;  %s2727_s7 = smov [#allocation23]  }
 0x4c4   : > { %1094 = vst.msk [vmem:[%s3377_s10 + $0xc] sm:$0xf] %vm1090_vm1, %v1795_v61  ;;  %s2500_s2 = sshll.u32 %s2727_s7, 4  ;;  %s2501_s2 = int_to_ptr.vmem [resolvable:$false] %s2500_s2 }
 0x4c5   : > { %1092 = vst.msk [vmem:[%s3377_s10 + $0x4] sm:$0xf] %vm1090_vm1, %v1793_v62  ;;  %s2502_s11 = scalar_lea.vmem %s2501_s2, 512  ;;  %p2503_p2 = scmp.lt.s32.totalorder %s3385_s24, %s2501_s2 }
 0x4c6   : > { %p2504_p6 = scmp.lt.s32.totalorder %s2502_s11, %s2496_s13 }
 0x4c8   : > { %p2505_p1 = por %p2504_p6, %p2503_p2 }
 0x4ca   : > { %p2506_p5 = pnand %p2505_p1, %p2499_p3 }
 0x4cc   : > { %2509 = shalt.err (!%p2506_p5)
}
 0x4cd   : > { %s2510_s29 = scalar_lea.hbm %s3395_s25, 256  ;;  %s2514_s8 = scalar_lea.hbm %s3685_s6, 1024 }
 0x4ce   : > { %p2511_p12 = scmp.ne.s32.totalorder %s3395_s25, %s2510_s29  ;;  %p2515_p11 = scmp.lt.u32.totalorder %s3395_s25, %s3685_s6 }
 0x4cf   : > { %p2516_p9 = scmp.lt.u32.totalorder %s2514_s8, %s2510_s29  ;;  %p2518_p7 = scmp.lt.u32.totalorder %s2510_s29, %s3395_s25 }
 0x4d0   : > { %p2512_p13 = pnand %p2511_p12, %p3684_p0 }
 0x4d1   : > { %p2517_p10 = por %p2516_p9, %p2515_p11 }
 0x4d2   : > { %p2513_p8 = pneg %p2512_p13 }
 0x4d3   : > { %p2519_p4 = por %p2518_p7, %p2517_p10 }
 0x4d5   : > { %p2520_p3 = pnand %p2519_p4, %p2513_p8 }
 0x4d7   : > { %2523 = shalt.err (!%p2520_p3)
}
 0x4d8   : > { %s2728_s11 = smov 64   ;;  %s2729_s18 = smov 4  }
 0x4d9   : > { %1919 = dma.vmem_to_hbm [thread:$0]  (%p3684_p0), %s3385_s24, 256, %s3395_s25, %s3414_s30, %s2728_s11, %s2728_s11, %s2729_s18  }
 0x4da   : > { %s2524_s13 = scalar_lea.vmem %s3400_s0, 256  ;;  %s2730_s7 = smov [#allocation25]  }
 0x4db   : > { %p2525_p2 = scmp.ne.s32.totalorder %s3400_s0, %s2524_s13  ;;  %s2528_s29 = sshll.u32 %s2730_s7, 4  ;;  %s2529_s29 = int_to_ptr.vmem [resolvable:$false] %s2528_s29 }
 0x4dc   : > { %s2530_s12 = scalar_lea.vmem %s2529_s29, 512  ;;  %p2531_p5 = scmp.lt.s32.totalorder %s3400_s0, %s2529_s29 }
 0x4dd   : > { %p2526_p6 = pnand %p2525_p2, %p3684_p0  ;;  %p2532_p12 = scmp.lt.s32.totalorder %s2530_s12, %s2524_s13 }
 0x4df   : > { %p2527_p1 = pneg %p2526_p6  ;;  %p2533_p13 = por %p2532_p12, %p2531_p5 }
 0x4e1   : > { %p2534_p8 = pnand %p2533_p13, %p2527_p1 }
 0x4e3   : > { %2537 = shalt.err (!%p2534_p8)
}
 0x4e4   : > { %s2538_s24 = scalar_lea.hbm %s3408_s9, 256  ;;  %s2542_s8 = scalar_lea.hbm %s3687_s17, 1024 }
 0x4e5   : > { %p2539_p11 = scmp.ne.s32.totalorder %s3408_s9, %s2538_s24  ;;  %p2543_p7 = scmp.lt.u32.totalorder %s3408_s9, %s3687_s17 }
 0x4e6   : > { %p2544_p4 = scmp.lt.u32.totalorder %s2542_s8, %s2538_s24  ;;  %p2546_p2 = scmp.lt.u32.totalorder %s2538_s24, %s3408_s9 }
 0x4e7   : > { %p2540_p9 = pnand %p2539_p11, %p3684_p0 }
 0x4e8   : > { %p2545_p3 = por %p2544_p4, %p2543_p7 }
 0x4e9   : > { %p2541_p10 = pneg %p2540_p9 }
 0x4ea   : > { %p2547_p6 = por %p2546_p2, %p2545_p3 }
 0x4ec   : > { %p2548_p1 = pnand %p2547_p6, %p2541_p10 }
 0x4ee   : > { %2551 = shalt.err (!%p2548_p1)
}
 0x4ef   : > { %1920 = dma.vmem_to_hbm [thread:$0]  (%p3684_p0), %s3400_s0, 256, %s3408_s9, %s3414_s30, %s2728_s11, %s2728_s11, %s2729_s18   ;;  %v1874_v63 = vpop.f32.mrb[4].mxu1 }
 0x4f0   : > { %s750_s13 = scalar_lea.vmem [#allocation26], %s3374_s4  ;;  %v1802_v0 = vpack.c.bf16 %v1874_v63, %v1874_v63  ;;  %v1262_v1 = vpop.f32.mrb[5].mxu1  ;;  %s3688_s9 = sld [smem:[#allocation62_spill]] }
 0x4f1   : > { %s1382_s7 = sshll.u32 %s750_s13, 4  ;;  %v1800_v2 = vpack.c.bf16 %v1262_v1, %v1262_v1  ;;  %v1875_v3 = vpop.f32.mrb[6].mxu1  ;;  %s1313_s29 = scalar_lea.sflag [#allocation27], %s3254_s1  ;;  %s3468_s7 = int_to_ptr.vmem [resolvable:$true] %s1382_s7 }
 0x4f2   : > { %1295 = vst.msk [vmem:[%s750_s13 + $0x8] sm:$0xf] %vm1090_vm1, %v1802_v0  ;;  %v1803_v4 = vpack.c.bf16 %v1875_v3, %v1875_v3  ;;  %v1265_v5 = vpop.f32.mrb[7].mxu1  ;;  %s2552_s12 = scalar_lea.vmem %s3468_s7, 256  ;;  %s2731_s24 = smov [#allocation26]  }
 0x4f3   : > { %1293 = vst.msk [vmem:[%s750_s13] sm:$0xf] %vm1090_vm1, %v1800_v2  ;;  %v1801_v6 = vpack.c.bf16 %v1265_v5, %v1265_v5  ;;  %p2553_p5 = scmp.ne.s32.totalorder %s3468_s7, %s2552_s12  ;;  %s2556_s25 = sshll.u32 %s2731_s24, 4  ;;  %s2557_s25 = int_to_ptr.vmem [resolvable:$false] %s2556_s25 }
 0x4f4   : > { %1296 = vst.msk [vmem:[%s750_s13 + $0xc] sm:$0xf] %vm1090_vm1, %v1803_v4  ;;  %s2558_s10 = scalar_lea.vmem %s2557_s25, 512  ;;  %p2559_p8 = scmp.lt.s32.totalorder %s3468_s7, %s2557_s25 }
 0x4f5   : > { %1294 = vst.msk [vmem:[%s750_s13 + $0x4] sm:$0xf] %vm1090_vm1, %v1801_v6  ;;  %p2554_p12 = pnand %p2553_p5, %p3684_p0  ;;  %p2560_p11 = scmp.lt.s32.totalorder %s2558_s10, %s2552_s12 }
 0x4f6   : > { %s3475_s30 = scalar_lea.hbm %s3688_s9, %s3381_s21 }
 0x4f7   : > { %p2555_p13 = pneg %p2554_p12  ;;  %p2561_p9 = por %p2560_p11, %p2559_p8 }
 0x4f9   : > { %p2562_p10 = pnand %p2561_p9, %p2555_p13 }
 0x4fb   : > { %2565 = shalt.err (!%p2562_p10)
}
 0x4fc   : > { %s2566_s21 = scalar_lea.hbm %s3475_s30, 256  ;;  %s2570_s2 = scalar_lea.hbm %s3688_s9, 1024 }
 0x4fd   : > { %p2567_p7 = scmp.ne.s32.totalorder %s3475_s30, %s2566_s21  ;;  %p2571_p2 = scmp.lt.u32.totalorder %s3475_s30, %s3688_s9 }
 0x4fe   : > { %p2572_p6 = scmp.lt.u32.totalorder %s2570_s2, %s2566_s21  ;;  %p2574_p5 = scmp.lt.u32.totalorder %s2566_s21, %s3475_s30 }
 0x4ff   : > { %p2568_p4 = pnand %p2567_p7, %p3684_p0 }
 0x500   : > { %p2573_p1 = por %p2572_p6, %p2571_p2 }
 0x501   : > { %p2569_p3 = pneg %p2568_p4 }
 0x502   : > { %p2575_p12 = por %p2574_p5, %p2573_p1 }
 0x504   : > { %p2576_p13 = pnand %p2575_p12, %p2569_p3 }
 0x506   : > { %2579 = shalt.err (!%p2576_p13)
}
 0x507   : > { %1921 = dma.vmem_to_hbm [thread:$0]  (%p3684_p0), %s3468_s7, 256, %s3475_s30, %s1313_s29, %s2728_s11, %s2728_s11, %s2729_s18  }
 0x508 PF: > { %s3689_s4 = sld [smem:[#allocation42_spill]]  ;;  %s3690_s12 = sld [smem:[#allocation38_spill]] }
 0x509   : > { %s3691_s24 = sld [smem:[#allocation46_spill]] }
 0x50e   : > { %p1996_p8 = scmp.ge.s32.totalorder %s3689_s4, 2  ;;  %s1397_s25 = sand.u32 1, %s3690_s12  }
 0x50f   : > { %p3692_p11 = scmp.ne.s32.totalorder %s3691_s24, 0  ;;  %s1398_s10 = scalar_lea.sflag [#allocation4], %s1397_s25 }
 0x511   : > { %p1965_p9 = pnand %p1996_p8, %p3692_p11 }
 0x513   : > { %2653 = dma.done.wait (!%p1965_p9), %s1398_s10, 512  }
 0x514   : > { %2655 = vsyncadd (!%p1965_p9), %s1398_s10, 4294966784  ;;  %s3693_s26 = sadd.s32 4294967294, %s3689_s4  }
 0x515   : > { %s1406_s21 = sand.u32 1, %s3693_s26  }
 0x516   : > { %s1407_s8 = scalar_lea.sflag [#allocation24], %s1406_s21 }
 0x517   : > { %2657 = dma.done.wait (!%p1965_p9), %s1407_s8, 512  }
 0x518   : > { %2659 = vsyncadd (!%p1965_p9), %s1407_s8, 4294966784  ;;  %s1425_s1 = scalar_lea.sflag [#allocation27], %s1397_s25 }
 0x519   : > { %2661 = dma.done.wait (!%p1965_p9), %s1425_s1, 256  }
 0x51a   : > { %2663 = vsyncadd (!%p1965_p9), %s1425_s1, 4294967040  ;;  %s46_s11 = sadd.s32 1, %s3689_s4   ;;  %s3694_s24 = sld [smem:[#allocation41_spill]] }
 0x51b   : > { %p43_p0 = scmp.ge.s32.totalorder %s46_s11, 6   ;;  %s3695_s18 = smov %s2670_s19 }
 0x51c   : > { %s3696_s19 = smov %s2674_s20  ;;  %s3697_s20 = smov %s3196_s3 }
 0x51d   : > { %s3698_s21 = smov %s2682_s22  ;;  %s3699_s22 = smov %s2686_s23 }
 0x51e   : > { %s3700_s23 = smov %s3199_s28  ;;  %s3701_s25 = smov %s2702_s27 }
 0x51f   : > { %s3702_s26 = smov %s3706_s15  ;;  %s3703_s27 = smov %s3710_s14 }
 0x520   : > { %s3704_s28 = smov %s46_s11  ;;  %45 = sbr.rel (!%p43_p0) target bundleno = 37 (0x25), region = 222 }
 0x527   :  { %1430 = vsyncpa [#allocation3], 1 }
 0x528   :  { %1432 = vsyncpa [#allocation3 + $0x1], 1 }
 0x529   :  { %1433 = vsyncpa [#allocation6], 1 }
 0x52a   :  { %1435 = vsyncpa [#allocation6 + $0x1], 1 }
 0x52b   :  { %1436 = vsyncpa [#allocation9], 1 }
 0x52c   :  { %1437 = vsyncpa [#allocation12], 1 }
 0x52d   :  { %1438 = vsyncpa [#allocation15], 1 }
 0x52e   :  { %1439 = vsyncpa [#allocation18], 1 }
 0x52f   :  { %1440 = vsyncpa [#allocation21], 1 }
 0x530   :  { %1441 = vsyncpa [#allocation4], 1 }
 0x531   :  { %1443 = vsyncpa [#allocation4 + $0x1], 1 }
 0x532   :  { %1444 = vsyncpa [#allocation24], 1 }
 0x533   :  { %1446 = vsyncpa [#allocation24 + $0x1], 1 }
 0x534   :  { %1447 = vsyncpa [#allocation27], 1 }
 0x535   :  { %1449 = vsyncpa [#allocation27 + $0x1], 1 }

// kernel: tpu_custom_call.1
= control target key start
LH: loop header
LB: loop body
LE: loop exit
PB: predicated region body
PF: predicated region fallthrough
CT: control target
= control target key end

     0   :  { %s3545_s0 = inlined_call_operand.hbm [shape: f32[2,64,64], index: 0, kind: input, shape index: {}]   ;;  %s3546_s1 = inlined_call_operand.hbm [shape: f32[2,1,64], index: 1, kind: input, shape index: {}]   ;;  %s3547_s2 = inlined_call_operand.hbm [shape: f32[2,1,64], index: 2, kind: input, shape index: {}]   ;;  %s3548_s3 = inlined_call_operand.hbm [shape: f32[1,64], index: 3, kind: input, shape index: {}]   ;;  %s3549_s4 = inlined_call_operand.hbm [shape: f32[1,64], index: 4, kind: input, shape index: {}]   ;;  %s3550_s5 = inlined_call_operand.hbm [shape: bf16[64,64], index: 5, kind: input, shape index: {}]   ;;  %s3551_s6 = inlined_call_operand.hbm [shape: f32[1,64], index: 6, kind: input, shape index: {}]   ;;  %s3552_s7 = inlined_call_operand.hbm [shape: f32[1,64], index: 7, kind: input, shape index: {}]   ;;  %s3553_s8 = inlined_call_operand.hbm [shape: f32[1,64], index: 8, kind: input, shape index: {}]   ;;  %s3554_s9 = inlined_call_operand.hbm [shape: bf16[64,64], index: 9, kind: input, shape index: {}]   ;;  %s3555_s10 = inlined_call_operand.hbm [shape: bf16[64,64], index: 10, kind: input, shape index: {}]   ;;  %s3556_s11 = inlined_call_operand.hbm [shape: bf16[64,64], index: 11, kind: input, shape index: {}]   ;;  %s3557_s12 = inlined_call_operand.hbm [shape: f32[2,64,64], index: 12, kind: output, shape index: {0}]   ;;  %s3558_s13 = inlined_call_operand.hbm [shape: bf16[2,64,64], index: 13, kind: output, shape index: {1}]   ;;  %s3559_s14 = inlined_call_operand.hbm [shape: bf16[2,64,64], index: 14, kind: output, shape index: {2}]   ;;  %s3560_s15 = inlined_call_operand.hbm [shape: bf16[2,64,64], index: 15, kind: output, shape index: {3}]  }
   0x1   :  { %3602 = sst [smem:[#allocation47_spill]] %s3545_s0 }
   0x2   :  { %3603 = sst [smem:[#allocation48_spill]] %s3546_s1 }
   0x3   :  { %3604 = sst [smem:[#allocation49_spill]] %s3547_s2 }
   0x4   :  { %3605 = sst [smem:[#allocation50_spill]] %s3548_s3 }
   0x5   :  { %3606 = sst [smem:[#allocation51_spill]] %s3549_s4 }
   0x6   :  { %3607 = sst [smem:[#allocation52_spill]] %s3550_s5 }
   0x7   :  { %3608 = sst [smem:[#allocation53_spill]] %s3551_s6 }
   0x8   :  { %3609 = sst [smem:[#allocation54_spill]] %s3552_s7 }
   0x9   :  { %3610 = sst [smem:[#allocation55_spill]] %s3553_s8 }
   0xa   :  { %3611 = sst [smem:[#allocation56_spill]] %s3554_s9 }
   0xb   :  { %3612 = sst [smem:[#allocation57_spill]] %s3555_s10 }
   0xc   :  { %3613 = sst [smem:[#allocation58_spill]] %s3556_s11 }
   0xd   :  { %3614 = sst [smem:[#allocation59_spill]] %s3557_s12 }
   0xe   :  { %3615 = sst [smem:[#allocation60_spill]] %s3558_s13 }
   0xf   :  { %3616 = sst [smem:[#allocation61_spill]] %s3559_s14 }
  0x10   :  { %3617 = sst [smem:[#allocation62_spill]] %s3560_s15 }
  0x11   :  { %21 = vsyncpa [#allocation3], 0 }
  0x12   :  { %23 = vsyncpa [#allocation3 + $0x1], 0 }
  0x13   :  { %24 = vsyncpa [#allocation6], 0 }
  0x14   :  { %26 = vsyncpa [#allocation6 + $0x1], 0 }
  0x15   :  { %27 = vsyncpa [#allocation9], 0 }
  0x16   :  { %28 = vsyncpa [#allocation12], 0 }
  0x17   :  { %29 = vsyncpa [#allocation15], 0 }
  0x18   :  { %30 = vsyncpa [#allocation18], 0 }
  0x19   :  { %31 = vsyncpa [#allocation21], 0 }
  0x1a   :  { %32 = vsyncpa [#allocation4], 0 }
  0x1b   :  { %34 = vsyncpa [#allocation4 + $0x1], 0 }
  0x1c   :  { %35 = vsyncpa [#allocation24], 0 }
  0x1d   :  { %37 = vsyncpa [#allocation24 + $0x1], 0 }
  0x1e   :  { %38 = vsyncpa [#allocation27], 0 }
  0x1f   :  { %40 = vsyncpa [#allocation27 + $0x1], 0  ;;  %s2812_s18 = smov 0   ;;  %s2814_s19 = smov 0  }
  0x20   :  { %s2816_s20 = smov 0   ;;  %s2818_s21 = smov 0  }
  0x21   :  { %s2820_s22 = smov 0   ;;  %s2822_s23 = smov 0  }
  0x22   :  { %s2824_s24 = smov 0   ;;  %s2826_s25 = smov 0  }
  0x23   :  { %s2828_s26 = smov 0   ;;  %s2830_s27 = smov 0  }
  0x24   :  { %s2832_s28 = smov 0  }
  0x25 LB: > { %3618 = sst [smem:[#allocation38_spill]] %s2678_s21  ;;  %s2868_s29 = sadd.s32 4294967295, %s2706_s28   ;;  %s2706_s28 = sphi %s2832_s28, %s3704_s28   ;;  %s2702_s27 = sphi %s2830_s27, %s3703_s27   ;;  %s2698_s26 = sphi %s2828_s26, %s3702_s26   ;;  %s2694_s25 = sphi %s2826_s25, %s3701_s25   ;;  %s2690_s24 = sphi %s2824_s24, %s3694_s24   ;;  %s2686_s23 = sphi %s2822_s23, %s3700_s23   ;;  %s2682_s22 = sphi %s2820_s22, %s3699_s22   ;;  %s2678_s21 = sphi %s2818_s21, %s3698_s21   ;;  %s2674_s20 = sphi %s2816_s20, %s3697_s20   ;;  %s2670_s19 = sphi %s2814_s19, %s3696_s19   ;;  %s2666_s18 = sphi %s2812_s18, %s3695_s18  }
  0x26   : > { %3619 = sst [smem:[#allocation39_spill]] %s2690_s24  ;;  %p1699_p0 = scmp.ge.s32.totalorder %s2706_s28, 1 }
  0x27   : > { %3620 = sst [smem:[#allocation40_spill]] %s2694_s25  ;;  %p3569_p1 = scmp.eq.s32.totalorder %s2868_s29, 0 }
  0x28   : > { %3621 = sst [smem:[#allocation41_spill]] %s2698_s26  ;;  %p444_p2 = scmp.lt.s32.totalorder %s2706_s28, 5 }
  0x29   : > { %3622 = sst [smem:[#allocation42_spill]] %s2706_s28  ;;  %s2708_s16 = smov [#allocation8]  }
  0x2a   : > { %p2873_p3 = pnand %p1699_p0, %p444_p2  ;;  %s457_s17 = sshll.u32 %s2708_s16, 4  ;;  %s458_s17 = int_to_ptr.vmem [resolvable:$true] %s457_s17 }
  0x2b   : > { %s2709_s15 = smov [#allocation11]   ;;  %s2710_s12 = smov [#allocation14]  }
  0x2c   : > { %s3623_s30 = scalar_select %p2873_p3, 1, 0 }
  0x2d   : > { %p1926_p4 = pneg %p2873_p3  ;;  %s478_s14 = sshll.u32 %s2709_s15, 4  ;;  %s2885_s14 = int_to_ptr.vmem [resolvable:$true] %s478_s14 }
  0x2e   : > { %3624 = sst [smem:[#allocation43_spill]] %s3623_s30  ;;  %s2887_s25 = sshll.u32 %s2710_s12, 4  ;;  %s504_s25 = int_to_ptr.vmem [resolvable:$true] %s2887_s25 }
  0x2f   : > { %p2881_p5 = pnand %p1926_p4, %p3569_p1  ;;  %s3626_s3 = sld [smem:[#allocation50_spill]] }
  0x31   : > { %s3625_s13 = scalar_select %p2881_p5, 1, 0 }
  0x32   : > { %p2897_p7 = pneg %p2881_p5 }
  0x34   : > { %s3627_s15 = scalar_select %p2897_p7, 1, 0 }
  0x35   : > { %s2126_s16 = scalar_lea.hbm %s3626_s3, 16 }
  0x36   : > { %p2127_p6 = scmp.ne.s32.totalorder %s3626_s3, %s2126_s16  ;;  %p2133_p10 = scmp.lt.u32.totalorder %s2126_s16, %s3626_s3 }
  0x38   : > { %p2129_p8 = pnand %p2897_p7, %p2127_p6 }
  0x3a   : > { %p2130_p9 = pneg %p2129_p8 }
  0x3c   : > { %p2135_p11 = pnand %p2133_p10, %p2130_p9 }
  0x3e   : > { %2138 = shalt.err (!%p2135_p11)
}
  0x3f   : > { %s2139_s0 = scalar_lea.vmem %s458_s17, 16  ;;  %s2146_s24 = scalar_lea.vmem %s458_s17, 32 }
  0x40   : > { %p2140_p12 = scmp.ne.s32.totalorder %s458_s17, %s2139_s0  ;;  %p2147_p2 = scmp.lt.s32.totalorder %s458_s17, %s458_s17 }
  0x41   : > { %p2148_p4 = scmp.lt.s32.totalorder %s2146_s24, %s2139_s0 }
  0x42   : > { %p2142_p13 = pnand %p2140_p12, %p2897_p7 }
  0x43   : > { %p2149_p1 = por %p2148_p4, %p2147_p2 }
  0x44   : > { %p2143_p0 = pneg %p2142_p13 }
  0x46   : > { %p2150_p3 = pnand %p2149_p1, %p2143_p0 }
  0x48   : > { %2153 = shalt.err (!%p2150_p3)
}
  0x49   : > { %1929 = dma.hbm_to_vmem [thread:$0]  (!%p2881_p5), %s3626_s3, 16, %s458_s17, [#allocation9]  }
  0x4a   : > { %s3628_s5 = sld [smem:[#allocation52_spill]] }
  0x50   : > { %s2154_s12 = scalar_lea.hbm %s3628_s5, 512 }
  0x51   : > { %p2155_p6 = scmp.ne.s32.totalorder %s3628_s5, %s2154_s12  ;;  %p2161_p1 = scmp.lt.u32.totalorder %s2154_s12, %s3628_s5 }
  0x53   : > { %p2157_p8 = pnand %p2155_p6, %p2897_p7 }
  0x55   : > { %p2158_p9 = pneg %p2157_p8 }
  0x57   : > { %p2163_p3 = pnand %p2161_p1, %p2158_p9 }
  0x59   : > { %2166 = shalt.err (!%p2163_p3)
}
  0x5a   : > { %s2167_s17 = scalar_lea.vmem %s2885_s14, 512  ;;  %p2175_p13 = scmp.lt.s32.totalorder %s2885_s14, %s2885_s14 }
  0x5b   : > { %p2168_p10 = scmp.ne.s32.totalorder %s2885_s14, %s2167_s17  ;;  %p2176_p0 = scmp.lt.s32.totalorder %s2167_s17, %s2167_s17 }
  0x5d   : > { %p2170_p11 = pnand %p2168_p10, %p2897_p7  ;;  %p2177_p2 = por %p2176_p0, %p2175_p13 }
  0x5f   : > { %p2171_p12 = pneg %p2170_p11 }
  0x61   : > { %p2178_p4 = pnand %p2177_p2, %p2171_p12 }
  0x63   : > { %2181 = shalt.err (!%p2178_p4)
}
  0x64   : > { %s3573_s8 = smov 64   ;;  %s3581_s10 = smov 4  }
  0x65   : > { %1935 = dma.hbm_to_vmem [thread:$0]  (!%p2881_p5), %s3628_s5, 512, %s2885_s14, [#allocation12], %s3573_s8, %s3573_s8, %s3581_s10  }
  0x66   : > { %s3629_s7 = sld [smem:[#allocation54_spill]] }
  0x6c   : > { %s2182_s12 = scalar_lea.hbm %s3629_s7, 16 }
  0x6d   : > { %p2183_p6 = scmp.ne.s32.totalorder %s3629_s7, %s2182_s12  ;;  %p2189_p1 = scmp.lt.u32.totalorder %s2182_s12, %s3629_s7 }
  0x6f   : > { %p2185_p8 = pnand %p2183_p6, %p2897_p7 }
  0x71   : > { %p2186_p9 = pneg %p2185_p8 }
  0x73   : > { %p2191_p3 = pnand %p2189_p1, %p2186_p9 }
  0x75   : > { %2194 = shalt.err (!%p2191_p3)
}
  0x76   : > { %s2195_s26 = scalar_lea.vmem %s504_s25, 16  ;;  %s2202_s14 = scalar_lea.vmem %s504_s25, 32 }
  0x77   : > { %p2196_p10 = scmp.ne.s32.totalorder %s504_s25, %s2195_s26  ;;  %p2203_p13 = scmp.lt.s32.totalorder %s504_s25, %s504_s25 }
  0x78   : > { %p2204_p0 = scmp.lt.s32.totalorder %s2202_s14, %s2195_s26 }
  0x79   : > { %p2198_p11 = pnand %p2196_p10, %p2897_p7 }
  0x7a   : > { %p2205_p2 = por %p2204_p0, %p2203_p13 }
  0x7b   : > { %p2199_p12 = pneg %p2198_p11 }
  0x7d   : > { %p2206_p4 = pnand %p2205_p2, %p2199_p12 }
  0x7f   : > { %2209 = shalt.err (!%p2206_p4)
}
  0x80   : > { %1941 = dma.hbm_to_vmem [thread:$0]  (!%p2881_p5), %s3629_s7, 16, %s504_s25, [#allocation15]  }
  0x81   : > { %s2713_s3 = smov [#allocation17]   ;;  %s3630_s9 = sld [smem:[#allocation56_spill]] }
  0x82   : > { %s524_s16 = sshll.u32 %s2713_s3, 4  ;;  %s525_s16 = int_to_ptr.vmem [resolvable:$true] %s524_s16 }
  0x87   : > { %s2210_s24 = scalar_lea.hbm %s3630_s9, 512 }
  0x88   : > { %p2211_p6 = scmp.ne.s32.totalorder %s3630_s9, %s2210_s24  ;;  %p2217_p1 = scmp.lt.u32.totalorder %s2210_s24, %s3630_s9 }
  0x8a   : > { %p2213_p8 = pnand %p2211_p6, %p2897_p7 }
  0x8c   : > { %p2214_p9 = pneg %p2213_p8 }
  0x8e   : > { %p2219_p3 = pnand %p2217_p1, %p2214_p9 }
  0x90   : > { %2222 = shalt.err (!%p2219_p3)
}
  0x91   : > { %s2223_s25 = scalar_lea.vmem %s525_s16, 512  ;;  %p2231_p13 = scmp.lt.s32.totalorder %s525_s16, %s525_s16 }
  0x92   : > { %p2224_p10 = scmp.ne.s32.totalorder %s525_s16, %s2223_s25  ;;  %p2232_p0 = scmp.lt.s32.totalorder %s2223_s25, %s2223_s25 }
  0x94   : > { %p2226_p11 = pnand %p2224_p10, %p2897_p7  ;;  %p2233_p2 = por %p2232_p0, %p2231_p13 }
  0x96   : > { %p2227_p12 = pneg %p2226_p11 }
  0x98   : > { %p2234_p4 = pnand %p2233_p2, %p2227_p12 }
  0x9a   : > { %2237 = shalt.err (!%p2234_p4)
}
  0x9b   : > { %s3631_s8 = smov 64   ;;  %s3580_s3 = sadd.s32 4294967294, %s2706_s28  }
  0x9c   : > { %1947 = dma.hbm_to_vmem [thread:$0]  (!%p2881_p5), %s3630_s9, 512, %s525_s16, [#allocation18], %s3631_s8, %s3631_s8, %s3581_s10  }
  0x9d   : > { %p74_p6 = scmp.ne.s32.totalorder %s2686_s23, %s2682_s22  ;;  %p75_p8 = scmp.eq.s32.totalorder %s2706_s28, 0 }
  0x9e   : > { %p80_p9 = scmp.ne.s32.totalorder %s2682_s22, %s2678_s21  ;;  %p100_p3 = scmp.ne.s32.totalorder %s2674_s20, %s2670_s19 }
  0x9f   : > { %p76_p1 = por %p75_p8, %p74_p6  ;;  %p3632_p10 = scmp.eq.s32.totalorder %s2868_s29, 0 }
  0xa0   : > { %p106_p12 = scmp.ne.s32.totalorder %s2670_s19, %s2666_s18  ;;  %p2997_p13 = por %p100_p3, %p75_p8 }
  0xa1   : > { %p2991_p11 = por %p3632_p10, %p80_p9  ;;  %p347_p0 = scmp.eq.s32.totalorder %s2868_s29, 3 }
  0xa2   : > { %p3635_p2 = pmov %p3632_p10  ;;  %p353_p5 = scmp.eq.s32.totalorder %s3580_s3, 3 }
  0xa3   : > { %s3633_s24 = scalar_select %p2991_p11, 1, 0 }
  0xa4   : > { %p3004_p4 = por %p106_p12, %p3635_p2  ;;  %p3010_p7 = por %p347_p0, %p74_p6 }
  0xa5   : > { %p1986_p10 = scmp.lt.s32.totalorder %s2706_s28, 4  ;;  %p3015_p11 = por %p353_p5, %p80_p9 }
  0xa6   : > { %s3636_s17 = scalar_select %p3004_p4, 1, 0 }
  0xa7   : > { %s3638_s26 = scalar_select %p3010_p7, 1, 0 }
  0xa8   : > { %3637 = sst [smem:[#allocation44_spill]] %s3636_s17  ;;  %s587_s14 = sand.u32 1, %s2706_s28  }
  0xa9   : > { %3639 = sst [smem:[#allocation45_spill]] %s3638_s26  ;;  %p3020_p8 = pnand %p1986_p10, %p76_p1 }
  0xaa   : > { %s3640_s18 = scalar_select %p3015_p11, 1, 0 }
  0xab   : > { %s3642_s25 = scalar_select %p3020_p8, 1, 0 }
  0xac   : > { %3641 = sst [smem:[#allocation46_spill]] %s3640_s18  ;;  %s3585_s30 = sand.u32 1, %s2674_s20  }
  0xad   : > { %s1714_s11 = sshll.u32 %s2702_s27, 4  ;;  %s3643_s1 = sld [smem:[#allocation48_spill]] }
  0xae   : > { %s590_s10 = scalar_lea.vmem [#allocation5], %s3585_s30  ;;  %p3037_p5 = pnand %p1986_p10, %p2997_p13 }
  0xaf   : > { %s597_s5 = sshll.u32 %s590_s10, 4  ;;  %s3645_s2 = sld [smem:[#allocation49_spill]]  ;;  %s3033_s5 = int_to_ptr.vmem [resolvable:$true] %s597_s5 }
  0xb0   : > { %s3644_s7 = scalar_select %p3037_p5, 1, 0 }
  0xb1   : > { %s3046_s0 = scalar_lea.sflag [#allocation6], %s587_s14  ;;  %p3592_p9 = pneg %p3037_p5 }
  0xb3   : > { %s3029_s3 = scalar_lea.hbm %s3643_s1, %s1714_s11  ;;  %s2243_s30 = scalar_lea.hbm %s3643_s1, 32 }
  0xb4   : > { %s2238_s21 = scalar_lea.hbm %s3029_s3, 16  ;;  %p2244_p12 = scmp.lt.u32.totalorder %s3029_s3, %s3643_s1 }
  0xb5   : > { %s3044_s12 = scalar_lea.hbm %s3645_s2, %s1714_s11  ;;  %p2239_p6 = scmp.ne.s32.totalorder %s3029_s3, %s2238_s21 }
  0xb6   : > { %p2245_p13 = scmp.lt.u32.totalorder %s2243_s30, %s2238_s21  ;;  %p2247_p2 = scmp.lt.u32.totalorder %s2238_s21, %s3029_s3 }
  0xb7   : > { %p2241_p1 = pnand %p3592_p9, %p2239_p6 }
  0xb8   : > { %p2246_p0 = por %p2245_p13, %p2244_p12 }
  0xb9   : > { %p2242_p3 = pneg %p2241_p1 }
  0xba   : > { %p2248_p10 = por %p2247_p2, %p2246_p0 }
  0xbc   : > { %p2249_p11 = pnand %p2248_p10, %p2242_p3 }
  0xbe   : > { %2252 = shalt.err (!%p2249_p11)
}
  0xbf   : > { %s2253_s18 = scalar_lea.vmem %s3033_s5, 16  ;;  %s2714_s14 = smov [#allocation5]  }
  0xc0   : > { %p2254_p6 = scmp.ne.s32.totalorder %s3033_s5, %s2253_s18  ;;  %s2258_s11 = sshll.u32 %s2714_s14, 4  ;;  %s2259_s11 = int_to_ptr.vmem [resolvable:$false] %s2258_s11 }
  0xc1   : > { %s2260_s28 = scalar_lea.vmem %s2259_s11, 32  ;;  %p2261_p4 = scmp.lt.s32.totalorder %s3033_s5, %s2259_s11 }
  0xc2   : > { %p2256_p1 = pnand %p2254_p6, %p3592_p9  ;;  %p2262_p12 = scmp.lt.s32.totalorder %s2260_s28, %s2253_s18 }
  0xc4   : > { %p2257_p7 = pneg %p2256_p1  ;;  %p2263_p13 = por %p2262_p12, %p2261_p4 }
  0xc6   : > { %p2264_p0 = pnand %p2263_p13, %p2257_p7 }
  0xc8   : > { %2267 = shalt.err (!%p2264_p0)
}
  0xc9   : > { %1960 = dma.hbm_to_vmem [thread:$0]  (!%p3037_p5), %s3029_s3, 16, %s3033_s5, %s3046_s0  }
  0xca   : > { %s2715_s21 = smov [#allocation10]   ;;  %s2716_s10 = smov [#allocation13]  }
  0xcb   : > { %s468_s30 = sshll.u32 %s2715_s21, 4  ;;  %s492_s16 = sshll.u32 %s2716_s10, 4  ;;  %s469_s30 = int_to_ptr.vmem [resolvable:$true] %s468_s30  ;;  %s493_s16 = int_to_ptr.vmem [resolvable:$true] %s492_s16 }
  0xcc   : > { %s3646_s4 = sld [smem:[#allocation51_spill]]  ;;  %p3647_p11 = scmp.ne.s32.totalorder %s3627_s15, 0 }
  0xd2   : > { %s2268_s11 = scalar_lea.hbm %s3646_s4, 16 }
  0xd3   : > { %p2269_p7 = scmp.ne.s32.totalorder %s3646_s4, %s2268_s11  ;;  %p2275_p2 = scmp.lt.u32.totalorder %s2268_s11, %s3646_s4 }
  0xd5   : > { %p2271_p4 = pnand %p2269_p7, %p3647_p11 }
  0xd7   : > { %p2272_p3 = pneg %p2271_p4 }
  0xd9   : > { %p2277_p10 = pnand %p2275_p2, %p2272_p3 }
  0xdb   : > { %2280 = shalt.err (!%p2277_p10)
}
  0xdc   : > { %s2281_s5 = scalar_lea.vmem %s469_s30, 16  ;;  %s2288_s3 = scalar_lea.vmem %s469_s30, 32 }
  0xdd   : > { %p2282_p6 = scmp.ne.s32.totalorder %s469_s30, %s2281_s5  ;;  %p2289_p13 = scmp.lt.s32.totalorder %s469_s30, %s469_s30 }
  0xde   : > { %p2290_p0 = scmp.lt.s32.totalorder %s2288_s3, %s2281_s5 }
  0xdf   : > { %p2284_p1 = pnand %p2282_p6, %p3647_p11 }
  0xe0   : > { %p2291_p9 = por %p2290_p0, %p2289_p13 }
  0xe1   : > { %p2285_p12 = pneg %p2284_p1 }
  0xe3   : > { %p2292_p5 = pnand %p2291_p9, %p2285_p12 }
  0xe5   : > { %2295 = shalt.err (!%p2292_p5)
}
  0xe6   : > { %p3648_p7 = scmp.ne.s32.totalorder %s3625_s13, 0  ;;  %s3649_s6 = sld [smem:[#allocation53_spill]] }
  0xe8   : > { %1932 = dma.hbm_to_vmem [thread:$0]  (!%p3648_p7), %s3646_s4, 16, %s469_s30, [#allocation9]  }
  0xec   : > { %s2296_s9 = scalar_lea.hbm %s3649_s6, 16 }
  0xed   : > { %p2297_p4 = scmp.ne.s32.totalorder %s3649_s6, %s2296_s9  ;;  %p2303_p5 = scmp.lt.u32.totalorder %s2296_s9, %s3649_s6 }
  0xef   : > { %p2299_p3 = pnand %p2297_p4, %p3647_p11 }
  0xf1   : > { %p2300_p9 = pneg %p2299_p3 }
  0xf3   : > { %p2305_p2 = pnand %p2303_p5, %p2300_p9 }
  0xf5   : > { %2308 = shalt.err (!%p2305_p2)
}
  0xf6   : > { %s2309_s5 = scalar_lea.vmem %s493_s16, 16  ;;  %s2316_s30 = scalar_lea.vmem %s493_s16, 32 }
  0xf7   : > { %p2310_p10 = scmp.ne.s32.totalorder %s493_s16, %s2309_s5  ;;  %p2317_p12 = scmp.lt.s32.totalorder %s493_s16, %s493_s16 }
  0xf8   : > { %p2318_p13 = scmp.lt.s32.totalorder %s2316_s30, %s2309_s5 }
  0xf9   : > { %p2312_p6 = pnand %p2310_p10, %p3647_p11 }
  0xfa   : > { %p2319_p0 = por %p2318_p13, %p2317_p12 }
  0xfb   : > { %p2313_p1 = pneg %p2312_p6 }
  0xfd   : > { %p2320_p8 = pnand %p2319_p0, %p2313_p1 }
  0xff   : > { %2323 = shalt.err (!%p2320_p8)
}
 0x100   : > { %1938 = dma.hbm_to_vmem [thread:$0]  (!%p3648_p7), %s3649_s6, 16, %s493_s16, [#allocation12]  }
 0x101   : > { %s2717_s10 = smov [#allocation16]   ;;  %s2718_s26 = smov [#allocation19]  }
 0x102   : > { %s514_s1 = sshll.u32 %s2717_s10, 4  ;;  %s537_s9 = sshll.u32 %s2718_s26, 4  ;;  %s515_s1 = int_to_ptr.vmem [resolvable:$true] %s514_s1  ;;  %s538_s9 = int_to_ptr.vmem [resolvable:$true] %s537_s9 }
 0x103   : > { %s3650_s18 = sld [smem:[#allocation55_spill]] }
 0x109   : > { %s3651_s4 = smov %s3650_s18  ;;  %s2324_s28 = scalar_lea.hbm %s3650_s18, 16 }
 0x10a   : > { %p2325_p8 = scmp.ne.s32.totalorder %s3651_s4, %s2324_s28  ;;  %p2331_p9 = scmp.lt.u32.totalorder %s2324_s28, %s3651_s4 }
 0x10c   : > { %p2327_p4 = pnand %p2325_p8, %p3647_p11 }
 0x10e   : > { %p2328_p3 = pneg %p2327_p4 }
 0x110   : > { %p2333_p5 = pnand %p2331_p9, %p2328_p3 }
 0x112   : > { %2336 = shalt.err (!%p2333_p5)
}
 0x113   : > { %s2337_s16 = scalar_lea.vmem %s515_s1, 16  ;;  %s2344_s21 = scalar_lea.vmem %s515_s1, 32 }
 0x114   : > { %p2338_p2 = scmp.ne.s32.totalorder %s515_s1, %s2337_s16  ;;  %p2345_p1 = scmp.lt.s32.totalorder %s515_s1, %s515_s1 }
 0x115   : > { %p2346_p12 = scmp.lt.s32.totalorder %s2344_s21, %s2337_s16 }
 0x116   : > { %p2340_p10 = pnand %p2338_p2, %p3647_p11 }
 0x117   : > { %p2347_p13 = por %p2346_p12, %p2345_p1 }
 0x118   : > { %p2341_p6 = pneg %p2340_p10 }
 0x11a   : > { %p2348_p0 = pnand %p2347_p13, %p2341_p6 }
 0x11c   : > { %2351 = shalt.err (!%p2348_p0)
}
 0x11d   : > { %1944 = dma.hbm_to_vmem [thread:$0]  (!%p3648_p7), %s3651_s4, 16, %s515_s1, [#allocation15]  }
 0x11e   : > { %s3652_s11 = sld [smem:[#allocation57_spill]] }
 0x124   : > { %s2352_s18 = scalar_lea.hbm %s3652_s11, 512 }
 0x125   : > { %p2353_p8 = scmp.ne.s32.totalorder %s3652_s11, %s2352_s18  ;;  %p2359_p9 = scmp.lt.u32.totalorder %s2352_s18, %s3652_s11 }
 0x127   : > { %p2355_p4 = pnand %p2353_p8, %p3647_p11 }
 0x129   : > { %p2356_p3 = pneg %p2355_p4 }
 0x12b   : > { %p2361_p5 = pnand %p2359_p9, %p2356_p3 }
 0x12d   : > { %2364 = shalt.err (!%p2361_p5)
}
 0x12e   : > { %s2365_s16 = scalar_lea.vmem %s538_s9, 512  ;;  %p2373_p1 = scmp.lt.s32.totalorder %s538_s9, %s538_s9 }
 0x12f   : > { %p2366_p2 = scmp.ne.s32.totalorder %s538_s9, %s2365_s16  ;;  %p2374_p12 = scmp.lt.s32.totalorder %s2365_s16, %s2365_s16 }
 0x131   : > { %p2368_p10 = pnand %p2366_p2, %p3647_p11  ;;  %p2375_p13 = por %p2374_p12, %p2373_p1 }
 0x133   : > { %p2369_p6 = pneg %p2368_p10 }
 0x135   : > { %p2376_p0 = pnand %p2375_p13, %p2369_p6 }
 0x137   : > { %2379 = shalt.err (!%p2376_p0)
}
 0x138   : > { %s3653_s1 = smov 4   ;;  %s2719_s26 = smov [#allocation20]  }
 0x139   : > { %1950 = dma.hbm_to_vmem [thread:$0]  (!%p3648_p7), %s3652_s11, 512, %s538_s9, [#allocation18], %s3631_s8, %s3631_s8, %s3653_s1  }
 0x13a   : > { %s550_s17 = sshll.u32 %s2719_s26, 4  ;;  %s3654_s28 = sld [smem:[#allocation58_spill]]  ;;  %s551_s17 = int_to_ptr.vmem [resolvable:$true] %s550_s17 }
 0x140   : > { %s3655_s5 = smov %s3654_s28  ;;  %s2380_s30 = scalar_lea.hbm %s3654_s28, 512 }
 0x141   : > { %p2381_p8 = scmp.ne.s32.totalorder %s3655_s5, %s2380_s30  ;;  %p2387_p9 = scmp.lt.u32.totalorder %s2380_s30, %s3655_s5 }
 0x143   : > { %p2383_p4 = pnand %p2381_p8, %p3647_p11 }
 0x145   : > { %p2384_p3 = pneg %p2383_p4 }
 0x147   : > { %p2389_p5 = pnand %p2387_p9, %p2384_p3 }
 0x149   : > { %2392 = shalt.err (!%p2389_p5)
}
 0x14a   : > { %s2393_s9 = scalar_lea.vmem %s551_s17, 512  ;;  %p2401_p1 = scmp.lt.s32.totalorder %s551_s17, %s551_s17 }
 0x14b   : > { %p2394_p2 = scmp.ne.s32.totalorder %s551_s17, %s2393_s9  ;;  %p2402_p12 = scmp.lt.s32.totalorder %s2393_s9, %s2393_s9 }
 0x14d   : > { %p2396_p10 = pnand %p2394_p2, %p3647_p11  ;;  %p2403_p13 = por %p2402_p12, %p2401_p1 }
 0x14f   : > { %p2397_p6 = pneg %p2396_p10 }
 0x151   : > { %p2404_p0 = pnand %p2403_p13, %p2397_p6 }
 0x153   : > { %2407 = shalt.err (!%p2404_p0)
}
 0x154   : > { %s3656_s21 = sld [smem:[#allocation41_spill]]  ;;  %s67_s10 = sadd.s32 1, %s2686_s23 }
 0x155   : > { %1953 = dma.hbm_to_vmem [thread:$0]  (!%p3648_p7), %s3655_s5, 512, %s551_s17, [#allocation21], %s3631_s8, %s3631_s8, %s3653_s1  }
 0x156   : > { %s564_s13 = sand.u32 1, %s2686_s23   ;;  %s3657_s14 = sadd.s32 1, %s2702_s27 }
 0x157   : > { %s1710_s26 = sshll.u32 %s564_s13, 5  ;;  %s1712_s30 = sshll.u32 %s2702_s27, 3 }
 0x158   : > { %s568_s3 = scalar_lea.vmem [#allocation2], %s1710_s26  ;;  %s3658_s5 = sld [smem:[#allocation47_spill]] }
 0x159   : > { %s577_s8 = sshll.u32 %s568_s3, 4  ;;  %s3659_s26 = sadd.s32 1, %s2674_s20  ;;  %s3184_s8 = int_to_ptr.vmem [resolvable:$true] %s577_s8 }
 0x15a   : > { %s55_s15 = sadd.s32 1, %s3656_s21  ;;  %s1711_s28 = sshll.u32 %s3656_s21, 2 }
 0x15b   : > { %p56_p11 = scmp.ge.s32.totalorder %s55_s15, 2  ;;  %s574_s1 = sadd.s32 %s1712_s30, %s1711_s28 }
 0x15c   : > { %s1713_s16 = sshll.u32 %s574_s1, 7  ;;  %s3201_s30 = scalar_lea.sflag [#allocation3], %s564_s13 }
 0x15d   : > { %s3706_s15 = smov (%p56_p11, %s55_s15), 0  ;;  %s3708_s14 = smov (!%p56_p11, %s3657_s14), %s2702_s27 }
 0x15e   : > { %s63_s18 = ssub.s32 %s3656_s21, %s3706_s15  ;;  %p60_p8 = scmp.ge.s32.totalorder %s3708_s14, 2 }
 0x15f   : > { %s3191_s21 = scalar_lea.hbm %s3658_s5, %s1713_s16  ;;  %p3660_p9 = scmp.ne.s32.totalorder %s3642_s25, 0 }
 0x160   : > { %s3710_s14 = smov (%p60_p8, %s3708_s14), 0  ;;  %s2408_s1 = scalar_lea.hbm %s3191_s21, 512 }
 0x161   : > { %s62_s17 = ssub.s32 %s2702_s27, %s3710_s14  ;;  %p2409_p3 = scmp.ne.s32.totalorder %s3191_s21, %s2408_s1 }
 0x162   : > { %s64_s9 = sor.u32 %s63_s18, %s62_s17  ;;  %p91_p7 = scmp.eq.s32.totalorder %s62_s17, 0 }
 0x163   : > { %p65_p4 = scmp.eq.s32.totalorder %s64_s9, 0  ;;  %p2410_p5 = pneg %p3660_p9 }
 0x164   : > { %s3196_s3 = scalar_select %p91_p7, %s2674_s20, %s3659_s26  }
 0x165   : > { %s3199_s28 = scalar_select %p65_p4, %s2686_s23, %s67_s10  }
 0x166   : > { %p2411_p2 = pnand %p2410_p5, %p2409_p3  ;;  %s2413_s16 = scalar_lea.hbm %s3658_s5, 2048 }
 0x167   : > { %p2414_p6 = scmp.lt.u32.totalorder %s3191_s21, %s3658_s5  ;;  %p2415_p1 = scmp.lt.u32.totalorder %s2413_s16, %s2408_s1 }
 0x168   : > { %p2412_p10 = pneg %p2411_p2  ;;  %p2417_p13 = scmp.lt.u32.totalorder %s2408_s1, %s3191_s21 }
 0x169   : > { %p2416_p12 = por %p2415_p1, %p2414_p6 }
 0x16b   : > { %p2418_p0 = por %p2417_p13, %p2416_p12 }
 0x16d   : > { %p2419_p11 = pnand %p2418_p0, %p2412_p10 }
 0x16f   : > { %2422 = shalt.err (!%p2419_p11)
}
 0x170   : > { %s2423_s10 = scalar_lea.vmem %s3184_s8, 512  ;;  %s2720_s13 = smov [#allocation2]  }
 0x171   : > { %p2424_p8 = scmp.ne.s32.totalorder %s3184_s8, %s2423_s10  ;;  %s2428_s6 = sshll.u32 %s2720_s13, 4  ;;  %s2429_s6 = int_to_ptr.vmem [resolvable:$false] %s2428_s6 }
 0x172   : > { %s2430_s26 = scalar_lea.vmem %s2429_s6, 1024  ;;  %p2431_p3 = scmp.lt.s32.totalorder %s3184_s8, %s2429_s6 }
 0x173   : > { %p2426_p7 = pnand %p2424_p8, %p2410_p5  ;;  %p2432_p2 = scmp.lt.s32.totalorder %s2430_s26, %s2423_s10 }
 0x175   : > { %p2427_p4 = pneg %p2426_p7  ;;  %p2433_p6 = por %p2432_p2, %p2431_p3 }
 0x177   : > { %p2434_p1 = pnand %p2433_p6, %p2427_p4 }
 0x179   : > { %2437 = shalt.err (!%p2434_p1)
}
 0x17a   : > { %s2721_s1 = smov 128   ;;  %s2722_s18 = smov 8  }
 0x17b   : > { %1957 = dma.hbm_to_vmem [thread:$0]  (!%p3660_p9), %s3191_s21, 512, %s3184_s8, %s3201_s30, %s2721_s1, %s2721_s1, %s2722_s18  }
 0x17c   : > { %s3661_s17 = sand.u32 1, %s2674_s20   ;;  %s2438_s4 = scalar_lea.hbm %s3044_s12, 16 }
 0x17d   : > { %s607_s16 = scalar_lea.vmem [#allocation7], %s3661_s17  ;;  %p2439_p5 = scmp.ne.s32.totalorder %s3044_s12, %s2438_s4 }
 0x17e   : > { %s614_s9 = sshll.u32 %s607_s16, 4  ;;  %p3662_p10 = scmp.ne.s32.totalorder %s3644_s7, 0  ;;  %s615_s9 = int_to_ptr.vmem [resolvable:$true] %s614_s9 }
 0x17f   : > { %s2443_s6 = scalar_lea.hbm %s3645_s2, 32  ;;  %p2444_p11 = scmp.lt.u32.totalorder %s3044_s12, %s3645_s2 }
 0x180   : > { %p3663_p12 = pneg %p3662_p10  ;;  %p2445_p8 = scmp.lt.u32.totalorder %s2443_s6, %s2438_s4 }
 0x181   : > { %p2447_p7 = scmp.lt.u32.totalorder %s2438_s4, %s3044_s12 }
 0x182   : > { %p2441_p13 = pnand %p2439_p5, %p3663_p12  ;;  %p2446_p9 = por %p2445_p8, %p2444_p11 }
 0x184   : > { %p2442_p0 = pneg %p2441_p13  ;;  %p2448_p4 = por %p2447_p7, %p2446_p9 }
 0x186   : > { %p2449_p3 = pnand %p2448_p4, %p2442_p0 }
 0x188   : > { %2452 = shalt.err (!%p2449_p3)
}
 0x189   : > { %s2453_s25 = scalar_lea.vmem %s615_s9, 16  ;;  %p3664_p6 = pmov %p3663_p12 }
 0x18a   : > { %p2454_p2 = scmp.ne.s32.totalorder %s615_s9, %s2453_s25  ;;  %s2723_s8 = smov [#allocation7]  }
 0x18b   : > { %s2458_s21 = sshll.u32 %s2723_s8, 4  ;;  %s2459_s21 = int_to_ptr.vmem [resolvable:$false] %s2458_s21 }
 0x18c   : > { %p2456_p1 = pnand %p2454_p2, %p3664_p6  ;;  %s2460_s30 = scalar_lea.vmem %s2459_s21, 32 }
 0x18d   : > { %p2461_p12 = scmp.lt.s32.totalorder %s615_s9, %s2459_s21  ;;  %p2462_p13 = scmp.lt.s32.totalorder %s2460_s30, %s2453_s25 }
 0x18e   : > { %p2457_p5 = pneg %p2456_p1 }
 0x18f   : > { %p2463_p8 = por %p2462_p13, %p2461_p12 }
 0x191   : > { %p2464_p11 = pnand %p2463_p8, %p2457_p5 }
 0x193   : > { %2467 = shalt.err (!%p2464_p11)
}
 0x194   : > { %1963 = dma.hbm_to_vmem [thread:$0]  (!%p3662_p10), %s3044_s12, 16, %s615_s9, %s3046_s0  }
 0x195   : > { %s3665_s5 = sld [smem:[#allocation43_spill]] }
 0x19b   : > { %p3666_p0 = scmp.ne.s32.totalorder %s3665_s5, 0 }
 0x19c   : > { %s3254_s1 = sand.u32 (!%p3666_p0), 1, %s2682_s22   ;;  %p3667_p9 = scmp.ne.s32.totalorder (!%p3666_p0), %s3633_s24, 0 }
 0x19d   : > { %623 = sbr.rel (%p3666_p0) target bundleno = 1288 (0x508), region = 68  ;;  %s1717_s18 = sshll.u32 (!%p3666_p0), %s3254_s1, 5 }
 0x19e   : > { %s626_s17 = scalar_lea.sflag (!%p3666_p0), [#allocation3], %s3254_s1  ;;  %s3260_s16 = scalar_lea.vmem (!%p3666_p0), [#allocation2], %s1717_s18 }
 0x1a4   : > { %2625 = dma.done.wait (%p3667_p9), %s626_s17, 512  }
 0x1a5   : > { %2627 = vsyncadd (%p3667_p9), %s626_s17, 4294966784  ;;  %s3668_s7 = sld [smem:[#allocation44_spill]]  ;;  %s634_s12 = sand.u32 1, %s2868_s29  }
 0x1a6   : > { %s636_s0 = sand.u32 1, %s2670_s19   ;;  %s635_s9 = scalar_lea.sflag [#allocation6], %s634_s12 }
 0x1a7   : > { %s637_s4 = scalar_lea.vmem [#allocation5], %s636_s0 }
 0x1ab   : > { %p3669_p10 = scmp.ne.s32.totalorder %s3668_s7, 0 }
 0x1ad   : > { %2629 = dma.done.wait (%p3669_p10), %s635_s9, 32  }
 0x1ae   : > { %2631 = vsyncadd (%p3669_p10), %s635_s9, 4294967264  ;;  %s645_s10 = scalar_lea.vmem [#allocation7], %s636_s0  ;;  %p3670_p7 = scmp.eq.s32.totalorder %s2868_s29, 0 }
 0x1b0   : > { %2633 = dma.done.wait (%p3670_p7), [#allocation9], 32   ;;  %p3671_p4 = pmov %p3670_p7 }
 0x1b2   : > { %2635 = vsyncadd (%p3671_p4), [#allocation9], 4294967264  ;;  %p3672_p3 = pmov %p3671_p4 }
 0x1b4   : > { %2637 = dma.done.wait (%p3672_p3), [#allocation12], 528   ;;  %p3673_p2 = pmov %p3672_p3 }
 0x1b6   : > { %2639 = vsyncadd (%p3673_p2), [#allocation12], 4294966768  ;;  %p3674_p6 = pmov %p3673_p2 }
 0x1b7   : > { %p3675_p1 = pmov %p3673_p2 }
 0x1b8   : > { %2641 = dma.done.wait (%p3674_p6), [#allocation15], 32  }
 0x1b9   : > { %2643 = vsyncadd (%p3675_p1), [#allocation15], 4294967264  ;;  %p3676_p5 = pmov %p3675_p1 }
 0x1ba   : > { %p3677_p12 = pmov %p3675_p1 }
 0x1bb   : > { %2645 = dma.done.wait (%p3676_p5), [#allocation18], 1024  }
 0x1bc   : > { %2647 = vsyncadd (%p3677_p12), [#allocation18], 4294966272  ;;  %p3678_p13 = pmov %p3675_p1 }
 0x1bd   : > { %p3679_p8 = pmov %p3675_p1 }
 0x1be   : > { %2649 = dma.done.wait (%p3678_p13), [#allocation21], 512  }
 0x1bf   : > { %2651 = vsyncadd (%p3679_p8), [#allocation21], 4294966784  ;;  %v2102_v0 = vld [vmem:[#allocation11] sm:$0xff]   ;;  %v2103_v1 = vld [vmem:[#allocation11 + $0x8] sm:$0xff]   ;;  %vm846_vm0 = vcmask 523264   ;;  %s3302_s24 = scalar_lea.vmem [#allocation22], %s1717_s18 }
 0x1c0   : > { %1828 = vmatprep.subr.bf16.mxu0 %v2102_v0  ;;  %v2104_v2 = vld [vmem:[#allocation11 + $0x10] sm:$0xff]   ;;  %v757_v3 = vld [vmem:[%s3260_s16] sm:$0xff]  ;;  %v758_v4 = vld [vmem:[%s3260_s16 + $0x8] sm:$0xff]  ;;  %s3680_s13 = sld [smem:[#allocation39_spill]]  ;;  %s3681_s6 = sld [smem:[#allocation40_spill]] }
 0x1c1   : > { %1829 = vmatpush3.bf16.msra.mxu0 %v2102_v0  ;;  %v1731_v5 = vld [vmem:[%s637_s4] ss:$0 sm:$0xff]  ;;  %v1733_v9 = vld [vmem:[#allocation8] ss:$0 sm:$0xff]  ;;  %v1734_v11 = vld [vmem:[#allocation10] ss:$0 sm:$0xff] }
 0x1c2   : > { %1830 = vmatprep.subr.bf16.mxu0 %v2103_v1  ;;  %v768_v6 = vsub.f32 %v757_v3, %v1731_v5  ;;  %v769_v7 = vsub.f32 %v758_v4, %v1731_v5  ;;  %v1732_v8 = vld [vmem:[%s645_s10] ss:$0 sm:$0xff]  ;;  %v759_v12 = vld [vmem:[%s3260_s16 + $0x10] sm:$0xff]  ;;  %v760_v13 = vld [vmem:[%s3260_s16 + $0x18] sm:$0xff]  ;;  %s3682_s26 = sld [smem:[#allocation45_spill]]  ;;  %s1328_s21 = sshll.u32 %s3302_s24, 4  ;;  %s3341_s21 = int_to_ptr.vmem [resolvable:$true] %s1328_s21 }
 0x1c3   : > { %v2105_v10 = vld [vmem:[#allocation11 + $0x18] sm:$0xff]   ;;  %v770_v16 = vsub.f32 %v759_v12, %v1731_v5  ;;  %v771_v17 = vsub.f32 %v760_v13, %v1731_v5  ;;  %v1735_v30 = vld [vmem:[#allocation13] ss:$0 sm:$0xff]  ;;  %v2106_v63 = vld [vmem:[#allocation17] sm:$0xff]   ;;  %s3683_s16 = sld [smem:[#allocation59_spill]]  ;;  %s1298_s0 = scalar_lea.sflag [#allocation4], %s3254_s1 }
 0x1c4   : > { %v779_v14 = vmul.f32 %v1732_v8, %v768_v6  ;;  %v780_v15 = vmul.f32 %v1732_v8, %v769_v7  ;;  %v2107_v0 = vld [vmem:[#allocation19] sm:$0xff]   ;;  %1840 = vmatprep.subr.bf16.mxu1 %v2106_v63  ;;  %v2110_v3 = vld [vmem:[#allocation17 + $0x10] sm:$0xff]   ;;  %v2112_v5 = vld [vmem:[#allocation17 + $0x18] sm:$0xff]   ;;  %s2468_s9 = scalar_lea.vmem %s3341_s21, 512  ;;  %s2724_s4 = smov [#allocation22]  }
 0x1c5   : > { %1831 = vmatpush3.bf16.msra.mxu0 %v2103_v1  ;;  %v781_v20 = vmul.f32 %v1732_v8, %v770_v16  ;;  %v782_v21 = vmul.f32 %v1732_v8, %v771_v17  ;;  %1841 = vmatpush3.bf16.msra.mxu1 %v2106_v63  ;;  %v2108_v1 = vld [vmem:[#allocation17 + $0x8] sm:$0xff]   ;;  %v2111_v4 = vld [vmem:[#allocation19 + $0x10] sm:$0xff]   ;;  %v2113_v6 = vld [vmem:[#allocation19 + $0x18] sm:$0xff]   ;;  %p2469_p11 = scmp.ne.s32.totalorder %s3341_s21, %s2468_s9  ;;  %s2472_s10 = sshll.u32 %s2724_s4, 4  ;;  %s2473_s10 = int_to_ptr.vmem [resolvable:$false] %s2472_s10 }
 0x1c6   : > { %1832 = vmatprep.subr.bf16.mxu0 %v2104_v2  ;;  %v790_v18 = vmul.f32 %v1733_v9, %v779_v14  ;;  %v791_v19 = vmul.f32 %v1733_v9, %v780_v15  ;;  %1842 = vmatprep.subr.bf16.mxu1 %v2108_v1  ;;  %v2114_v7 = vld [vmem:[#allocation20] sm:$0xff]   ;;  %s1778_s25 = sshll.u32 %s3680_s13, 2  ;;  %s1779_s8 = sshll.u32 %s3681_s6, 3 }
 0x1c7   : > { %v792_v24 = vmul.f32 %v1733_v9, %v781_v20  ;;  %v793_v25 = vmul.f32 %v1733_v9, %v782_v21  ;;  %s3339_s30 = sadd.s32 %s1779_s8, %s1778_s25  ;;  %p2475_p7 = scmp.lt.s32.totalorder %s3341_s21, %s2473_s10 }
 0x1c8   : > { %v801_v22 = vadd.f32 %v1734_v11, %v790_v18  ;;  %v802_v23 = vadd.f32 %v1734_v11, %v791_v19  ;;  %s1780_s5 = sshll.u32 %s3339_s30, 7  ;;  %p3684_p0 = scmp.ne.s32.totalorder %s3682_s26, 0 }
 0x1c9   : > { %1833 = vmatpush3.bf16.msra.mxu0 %v2104_v2  ;;  %v803_v27 = vadd.f32 %v1734_v11, %v792_v24  ;;  %v804_v28 = vadd.f32 %v1734_v11, %v793_v25  ;;  %v2109_v2 = vld [vmem:[#allocation19 + $0x8] sm:$0xff]   ;;  %1843 = vmatpush3.bf16.msra.mxu1 %v2108_v1  ;;  %s3347_s7 = scalar_lea.hbm %s3683_s16, %s1780_s5 }
 0x1ca   : > { %1834 = vmatprep.subr.bf16.mxu0 %v2105_v10  ;;  %v813_v26 = vpack.c.bf16 %v802_v23, %v801_v22  ;;  %1844 = vmatprep.subr.bf16.mxu1 %v2110_v3  ;;  %v1742_v22 = vld [vmem:[#allocation14] ss:$0 sm:$0xff]  ;;  %p2470_p9 = pnand %p2469_p11, %p3684_p0 }
 0x1cb   : > { %v814_v29 = vpack.c.bf16 %v804_v28, %v803_v27  ;;  %v1743_v28 = vld [vmem:[#allocation16] ss:$0 sm:$0xff] }
 0x1cc   : > { %1836 = vmatprep.mubr.msk.bf16.mxu0 %vm846_vm0, %v813_v26  ;;  %p2471_p10 = pneg %p2470_p9 }
 0x1cd   : > { %1835 = vmatpush3.bf16.msra.mxu0 %v2105_v10  ;;  %1845 = vmatpush3.bf16.msra.mxu1 %v2110_v3 }
 0x1ce   : > { %1852 = vmatprep.subr.bf16.mxu0 %v2107_v0  ;;  %1846 = vmatprep.subr.bf16.mxu1 %v2112_v5 }
 0x1d0   : > { %1837 = vmatmul.mubr.msk.bf16.vlgmr.msra.gmra.mrb[0].mxu0 %vm846_vm0, %v814_v29 }
 0x1d1   : > { %1853 = vmatpush3.bf16.msra.mxu0 %v2107_v0  ;;  %1847 = vmatpush3.bf16.msra.mxu1 %v2112_v5 }
 0x1d2   : > { %1854 = vmatprep.subr.bf16.mxu0 %v2109_v2  ;;  %1864 = vmatprep.subr.bf16.mxu1 %v2114_v7 }
 0x1d5   : > { %1855 = vmatpush3.bf16.msra.mxu0 %v2109_v2 }
 0x1d6   : > { %1856 = vmatprep.subr.bf16.mxu0 %v2111_v4 }
 0x1d9   : > { %1857 = vmatpush3.bf16.msra.mxu0 %v2111_v4 }
 0x1da   : > { %1858 = vmatprep.subr.bf16.mxu0 %v2113_v6 }
 0x1dd   : > { %1859 = vmatpush3.bf16.msra.mxu0 %v2113_v6 }
 0x2a3   : > { %v1838_v31 = vpop.f32.mrb[0].mxu0 }
 0x2a4   : > { %v896_v32 = vadd.f32 %v1838_v31, %v1735_v30  ;;  %v887_v33 = vpop.f32.mrb[1].mxu0 }
 0x2a5   : > { %v888_v34 = vadd.f32 %v1735_v30, %v887_v33  ;;  %v1839_v35 = vpop.f32.mrb[2].mxu0 }
 0x2a6   : > { %904 = vst.msk [vmem:[%s3302_s24 + $0x10] sm:$0xff] %vm846_vm0, %v896_v32  ;;  %v899_v36 = vadd.f32 %v1839_v35, %v1735_v30  ;;  %v890_v37 = vpop.f32.mrb[3].mxu0  ;;  %v914_v38 = vsel %vm846_vm0, %v896_v32, 0.0 }
 0x2a7   : > { %902 = vst.msk [vmem:[%s3302_s24] sm:$0xff] %vm846_vm0, %v888_v34  ;;  %v891_v39 = vadd.f32 %v1735_v30, %v890_v37  ;;  %915 = vadd.xlane.f32.xlu1 %v914_v38  ;;  %v908_v40 = vsel %vm846_vm0, %v888_v34, 0.0 }
 0x2a8   : > { %905 = vst.msk [vmem:[%s3302_s24 + $0x18] sm:$0xff] %vm846_vm0, %v899_v36  ;;  %909 = vadd.xlane.f32.xlu0 %v908_v40  ;;  %v917_v41 = vsel %vm846_vm0, %v899_v36, 0.0  ;;  %v2115_v40 = vld [vmem:[#allocation20 + $0x8] sm:$0xff]  }
 0x2a9   : > { %903 = vst.msk [vmem:[%s3302_s24 + $0x8] sm:$0xff] %vm846_vm0, %v891_v39  ;;  %v911_v42 = vsel %vm846_vm0, %v891_v39, 0.0  ;;  %s2474_s24 = scalar_lea.vmem %s2473_s10, 1024 }
 0x2aa   : > { %p2476_p4 = scmp.lt.s32.totalorder %s2474_s24, %s2468_s9 }
 0x2ab   : > { %918 = vadd.xlane.f32.xlu1 %v917_v41  ;;  %v2116_v41 = vld [vmem:[#allocation20 + $0x10] sm:$0xff]  }
 0x2ac   : > { %912 = vadd.xlane.f32.xlu0 %v911_v42  ;;  %v2117_v42 = vld [vmem:[#allocation20 + $0x18] sm:$0xff]   ;;  %p2477_p3 = por %p2476_p4, %p2475_p7 }
 0x2ae   : > { %p2478_p2 = pnand %p2477_p3, %p2471_p10 }
 0x334   : > { %v916_v43 = vpop.xlane.xlu1 %915 }
 0x335   : > { %v923_v44 = vmul.f32 0.015625, %v916_v43  ;;  %v910_v45 = vpop.xlane.xlu0 %909 }
 0x336   : > { %v921_v46 = vmul.f32 0.015625, %v910_v45 }
 0x337   : > { %v3316_v47 = vsub.f32 %v896_v32, %v923_v44 }
 0x338   : > { %v925_v48 = vsub.f32 %v888_v34, %v921_v46  ;;  %v919_v49 = vpop.xlane.xlu1 %918 }
 0x339   : > { %v924_v50 = vmul.f32 0.015625, %v919_v49  ;;  %v913_v51 = vpop.xlane.xlu0 %912  ;;  %v931_v57 = vmul.f32 %v3316_v47, %v3316_v47 }
 0x33a   : > { %v922_v52 = vmul.f32 0.015625, %v913_v51  ;;  %v929_v53 = vmul.f32 %v925_v48, %v925_v48 }
 0x33b   : > { %v3318_v54 = vsub.f32 %v899_v36, %v924_v50  ;;  %v939_v59 = vsel %vm846_vm0, %v931_v57, 0.0 }
 0x33c   : > { %v926_v55 = vsub.f32 %v891_v39, %v922_v52  ;;  %v933_v56 = vsel %vm846_vm0, %v929_v53, 0.0 }
 0x33d   : > { %934 = vadd.xlane.f32.xlu0 %v933_v56  ;;  %v932_v61 = vmul.f32 %v3318_v54, %v3318_v54 }
 0x33e   : > { %v930_v58 = vmul.f32 %v926_v55, %v926_v55 }
 0x33f   : > { %v942_v62 = vsel %vm846_vm0, %v932_v61, 0.0 }
 0x340   : > { %v936_v60 = vsel %vm846_vm0, %v930_v58, 0.0 }
 0x341   : > { %940 = vadd.xlane.f32.xlu0 %v939_v59  ;;  %937 = vadd.xlane.f32.xlu1 %v936_v60 }
 0x345   : > { %943 = vadd.xlane.f32.xlu1 %v942_v62 }
 0x3ca   : > { %v935_v8 = vpop.xlane.xlu0 %934 }
 0x3cb   : > { %v945_v9 = vmul.f32 0.015625, %v935_v8 }
 0x3cd   : > { %v949_v10 = vadd.f32 1e-05, %v945_v9 }
 0x3ce   : > { %v938_v11 = vpop.xlane.xlu1 %937  ;;  %v941_v12 = vpop.xlane.xlu0 %940 }
 0x3cf   : > { %2118 = vrsqrt.f32 %v949_v10  ;;  %v946_v13 = vmul.f32 0.015625, %v938_v11  ;;  %v947_v14 = vmul.f32 0.015625, %v941_v12 }
 0x3d1   : > { %v950_v15 = vadd.f32 1e-05, %v946_v13  ;;  %v951_v16 = vadd.f32 1e-05, %v947_v14 }
 0x3d2   : > { %v944_v17 = vpop.xlane.xlu1 %943 }
 0x3d3   : > { %2120 = vrsqrt.f32 %v950_v15  ;;  %v948_v18 = vmul.f32 0.015625, %v944_v17 }
 0x3d4   : > { %2122 = vrsqrt.f32 %v951_v16 }
 0x3d5   : > { %v952_v19 = vadd.f32 1e-05, %v948_v18 }
 0x3d7   : > { %2124 = vrsqrt.f32 %v952_v19 }
 0x3d9   : > { %v2119_v20 = vpop.eup %2118 }
 0x3da   : > { %v957_v21 = vmul.f32 %v2119_v20, %v925_v48 }
 0x3dc   : > { %v967_v26 = vmul.f32 %v1742_v22, %v957_v21 }
 0x3dd   : > { %v2121_v23 = vpop.eup %2120 }
 0x3de   : > { %v2123_v24 = vpop.eup %2122  ;;  %v958_v25 = vmul.f32 %v2121_v23, %v926_v55  ;;  %v977_v32 = vadd.f32 %v1743_v28, %v967_v26 }
 0x3df   : > { %v959_v27 = vmul.f32 %v2123_v24, %v3316_v47 }
 0x3e0   : > { %v968_v29 = vmul.f32 %v1742_v22, %v958_v25 }
 0x3e1   : > { %v2125_v30 = vpop.eup %2124  ;;  %v969_v34 = vmul.f32 %v1742_v22, %v959_v27 }
 0x3e2   : > { %v960_v31 = vmul.f32 %v2125_v30, %v3318_v54  ;;  %v978_v33 = vadd.f32 %v1743_v28, %v968_v29 }
 0x3e3   : > { %v979_v37 = vadd.f32 %v1743_v28, %v969_v34 }
 0x3e4   : > { %v981_v35 = vpack.c.bf16 %v978_v33, %v977_v32  ;;  %v970_v36 = vmul.f32 %v1742_v22, %v960_v31 }
 0x3e6   : > { %1848 = vmatprep.mubr.msk.bf16.mxu1 %vm846_vm0, %v981_v35  ;;  %1860 = vmatprep.mubr.msk.bf16.mxu0 %vm846_vm0, %v981_v35  ;;  %v980_v38 = vadd.f32 %v1743_v28, %v970_v36 }
 0x3e8   : > { %v982_v39 = vpack.c.bf16 %v980_v38, %v979_v37 }
 0x3ea   : > { %1849 = vmatmul.mubr.msk.bf16.vlgmr.msra.gmra.mrb[0].mxu1 %vm846_vm0, %v982_v39  ;;  %1861 = vmatmul.mubr.msk.bf16.vlgmr.msra.gmra.mrb[4].mxu0 %vm846_vm0, %v982_v39 }
 0x3eb   : > { %1865 = vmatpush3.bf16.msra.mxu1 %v2114_v7  ;;  %1872 = vmatprep.mubr.msk.bf16.mxu1 %vm846_vm0, %v981_v35 }
 0x3ec   : > { %1866 = vmatprep.subr.bf16.mxu1 %v2115_v40 }
 0x3ef   : > { %1867 = vmatpush3.bf16.msra.mxu1 %v2115_v40 }
 0x3f0   : > { %1868 = vmatprep.subr.bf16.mxu1 %v2116_v41 }
 0x3f3   : > { %1869 = vmatpush3.bf16.msra.mxu1 %v2116_v41 }
 0x3f4   : > { %1870 = vmatprep.subr.bf16.mxu1 %v2117_v42 }
 0x3f7   : > { %1871 = vmatpush3.bf16.msra.mxu1 %v2117_v42 }
 0x3fa   : > { %1873 = vmatmul.mubr.msk.bf16.vlgmr.msra.gmra.mrb[4].mxu1 %vm846_vm0, %v982_v39 }
 0x3fb   : > { %2481 = shalt.err (!%p2478_p2)
}
 0x3fc   : > { %s2482_s13 = scalar_lea.hbm %s3347_s7, 512  ;;  %s2486_s8 = scalar_lea.hbm %s3683_s16, 2048 }
 0x3fd   : > { %p2483_p6 = scmp.ne.s32.totalorder %s3347_s7, %s2482_s13  ;;  %p2487_p12 = scmp.lt.u32.totalorder %s3347_s7, %s3683_s16 }
 0x3fe   : > { %p2488_p13 = scmp.lt.u32.totalorder %s2486_s8, %s2482_s13  ;;  %p2490_p11 = scmp.lt.u32.totalorder %s2482_s13, %s3347_s7 }
 0x3ff   : > { %p2484_p1 = pnand %p2483_p6, %p3684_p0 }
 0x400   : > { %p2489_p8 = por %p2488_p13, %p2487_p12 }
 0x401   : > { %p2485_p5 = pneg %p2484_p1 }
 0x402   : > { %p2491_p9 = por %p2490_p11, %p2489_p8 }
 0x404   : > { %p2492_p10 = pnand %p2491_p9, %p2485_p5 }
 0x406   : > { %2495 = shalt.err (!%p2492_p10)
}
 0x407   : > { %s2725_s17 = smov 128   ;;  %s2726_s9 = smov 8   ;;  %vm1090_vm1 = vcmask 519168  }
 0x408   : > { %1918 = dma.vmem_to_hbm [thread:$0]  (%p3684_p0), %s3341_s21, 512, %s3347_s7, %s1298_s0, %s2725_s17, %s2725_s17, %s2726_s9  }
 0x409   : > { %s3374_s4 = sshll.u32 %s3254_s1, 4  ;;  %s3381_s21 = sshll.u32 %s3339_s30, 6 }
 0x40a   : > { %s3377_s10 = scalar_lea.vmem [#allocation23], %s3374_s4  ;;  %s743_s7 = scalar_lea.vmem [#allocation25], %s3374_s4 }
 0x40b   : > { %s1346_s24 = sshll.u32 %s3377_s10, 4  ;;  %s1364_s0 = sshll.u32 %s743_s7, 4  ;;  %s3385_s24 = int_to_ptr.vmem [resolvable:$true] %s1346_s24  ;;  %s3400_s0 = int_to_ptr.vmem [resolvable:$true] %s1364_s0 }
 0x40c   : > { %s3685_s6 = sld [smem:[#allocation60_spill]]  ;;  %s3686_s18 = sld [smem:[#allocation61_spill]] }
 0x40d   : > { %s3414_s30 = scalar_lea.sflag [#allocation24], %s634_s12  ;;  %s2496_s13 = scalar_lea.vmem %s3385_s24, 256 }
 0x40e   : > { %p2497_p7 = scmp.ne.s32.totalorder %s3385_s24, %s2496_s13 }
 0x410   : > { %p2498_p4 = pnand %p2497_p7, %p3684_p0 }
 0x412   : > { %s3395_s25 = scalar_lea.hbm %s3685_s6, %s3381_s21  ;;  %s3687_s17 = smov %s3686_s18 }
 0x413   : > { %s3408_s9 = scalar_lea.hbm %s3686_s18, %s3381_s21  ;;  %p2499_p3 = pneg %p2498_p4 }
 0x4bd   : > { %v1850_v43 = vpop.f32.mrb[0].mxu1  ;;  %v1862_v44 = vpop.f32.mrb[4].mxu0 }
 0x4be   : > { %v1072_v45 = vmul.f32 0.25, %v1850_v43  ;;  %v1798_v46 = vpack.c.bf16 %v1862_v44, %v1862_v44  ;;  %v1055_v47 = vpop.f32.mrb[1].mxu1  ;;  %v1161_v48 = vpop.f32.mrb[5].mxu0 }
 0x4bf   : > { %v1070_v49 = vmul.f32 0.25, %v1055_v47  ;;  %v1796_v50 = vpack.c.bf16 %v1161_v48, %v1161_v48  ;;  %v1851_v51 = vpop.f32.mrb[2].mxu1  ;;  %v1863_v52 = vpop.f32.mrb[6].mxu0 }
 0x4c0   : > { %v1794_v53 = vpack.c.bf16 %v1072_v45, %v1072_v45  ;;  %1194 = vst.msk [vmem:[%s743_s7 + $0x8] sm:$0xf] %vm1090_vm1, %v1798_v46  ;;  %v1073_v54 = vmul.f32 0.25, %v1851_v51  ;;  %v1799_v55 = vpack.c.bf16 %v1863_v52, %v1863_v52  ;;  %v1058_v56 = vpop.f32.mrb[3].mxu1  ;;  %v1164_v57 = vpop.f32.mrb[7].mxu0 }
 0x4c1   : > { %v1792_v58 = vpack.c.bf16 %v1070_v49, %v1070_v49  ;;  %1192 = vst.msk [vmem:[%s743_s7] sm:$0xf] %vm1090_vm1, %v1796_v50  ;;  %v1071_v59 = vmul.f32 0.25, %v1058_v56  ;;  %v1797_v60 = vpack.c.bf16 %v1164_v57, %v1164_v57 }
 0x4c2   : > { %1093 = vst.msk [vmem:[%s3377_s10 + $0x8] sm:$0xf] %vm1090_vm1, %v1794_v53  ;;  %v1795_v61 = vpack.c.bf16 %v1073_v54, %v1073_v54  ;;  %1195 = vst.msk [vmem:[%s743_s7 + $0xc] sm:$0xf] %vm1090_vm1, %v1799_v55 }
 0x4c3   : > { %1091 = vst.msk [vmem:[%s3377_s10] sm:$0xf] %vm1090_vm1, %v1792_v58  ;;  %v1793_v62 = vpack.c.bf16 %v1071_v59, %v1071_v59  ;;  %1193 = vst.msk [vmem:[%s743_s7 + $0x4] sm:$0xf] %vm1090_vm1, %v1797_v60  ;;  %s2727_s7 = smov [#allocation23]  }
 0x4c4   : > { %1094 = vst.msk [vmem:[%s3377_s10 + $0xc] sm:$0xf] %vm1090_vm1, %v1795_v61  ;;  %s2500_s2 = sshll.u32 %s2727_s7, 4  ;;  %s2501_s2 = int_to_ptr.vmem [resolvable:$false] %s2500_s2 }
 0x4c5   : > { %1092 = vst.msk [vmem:[%s3377_s10 + $0x4] sm:$0xf] %vm1090_vm1, %v1793_v62  ;;  %s2502_s11 = scalar_lea.vmem %s2501_s2, 512  ;;  %p2503_p2 = scmp.lt.s32.totalorder %s3385_s24, %s2501_s2 }
 0x4c6   : > { %p2504_p6 = scmp.lt.s32.totalorder %s2502_s11, %s2496_s13 }
 0x4c8   : > { %p2505_p1 = por %p2504_p6, %p2503_p2 }
 0x4ca   : > { %p2506_p5 = pnand %p2505_p1, %p2499_p3 }
 0x4cc   : > { %2509 = shalt.err (!%p2506_p5)
}
 0x4cd   : > { %s2510_s29 = scalar_lea.hbm %s3395_s25, 256  ;;  %s2514_s8 = scalar_lea.hbm %s3685_s6, 1024 }
 0x4ce   : > { %p2511_p12 = scmp.ne.s32.totalorder %s3395_s25, %s2510_s29  ;;  %p2515_p11 = scmp.lt.u32.totalorder %s3395_s25, %s3685_s6 }
 0x4cf   : > { %p2516_p9 = scmp.lt.u32.totalorder %s2514_s8, %s2510_s29  ;;  %p2518_p7 = scmp.lt.u32.totalorder %s2510_s29, %s3395_s25 }
 0x4d0   : > { %p2512_p13 = pnand %p2511_p12, %p3684_p0 }
 0x4d1   : > { %p2517_p10 = por %p2516_p9, %p2515_p11 }
 0x4d2   : > { %p2513_p8 = pneg %p2512_p13 }
 0x4d3   : > { %p2519_p4 = por %p2518_p7, %p2517_p10 }
 0x4d5   : > { %p2520_p3 = pnand %p2519_p4, %p2513_p8 }
 0x4d7   : > { %2523 = shalt.err (!%p2520_p3)
}
 0x4d8   : > { %s2728_s11 = smov 64   ;;  %s2729_s18 = smov 4  }
 0x4d9   : > { %1919 = dma.vmem_to_hbm [thread:$0]  (%p3684_p0), %s3385_s24, 256, %s3395_s25, %s3414_s30, %s2728_s11, %s2728_s11, %s2729_s18  }
 0x4da   : > { %s2524_s13 = scalar_lea.vmem %s3400_s0, 256  ;;  %s2730_s7 = smov [#allocation25]  }
 0x4db   : > { %p2525_p2 = scmp.ne.s32.totalorder %s3400_s0, %s2524_s13  ;;  %s2528_s29 = sshll.u32 %s2730_s7, 4  ;;  %s2529_s29 = int_to_ptr.vmem [resolvable:$false] %s2528_s29 }
 0x4dc   : > { %s2530_s12 = scalar_lea.vmem %s2529_s29, 512  ;;  %p2531_p5 = scmp.lt.s32.totalorder %s3400_s0, %s2529_s29 }
 0x4dd   : > { %p2526_p6 = pnand %p2525_p2, %p3684_p0  ;;  %p2532_p12 = scmp.lt.s32.totalorder %s2530_s12, %s2524_s13 }
 0x4df   : > { %p2527_p1 = pneg %p2526_p6  ;;  %p2533_p13 = por %p2532_p12, %p2531_p5 }
 0x4e1   : > { %p2534_p8 = pnand %p2533_p13, %p2527_p1 }
 0x4e3   : > { %2537 = shalt.err (!%p2534_p8)
}
 0x4e4   : > { %s2538_s24 = scalar_lea.hbm %s3408_s9, 256  ;;  %s2542_s8 = scalar_lea.hbm %s3687_s17, 1024 }
 0x4e5   : > { %p2539_p11 = scmp.ne.s32.totalorder %s3408_s9, %s2538_s24  ;;  %p2543_p7 = scmp.lt.u32.totalorder %s3408_s9, %s3687_s17 }
 0x4e6   : > { %p2544_p4 = scmp.lt.u32.totalorder %s2542_s8, %s2538_s24  ;;  %p2546_p2 = scmp.lt.u32.totalorder %s2538_s24, %s3408_s9 }
 0x4e7   : > { %p2540_p9 = pnand %p2539_p11, %p3684_p0 }
 0x4e8   : > { %p2545_p3 = por %p2544_p4, %p2543_p7 }
 0x4e9   : > { %p2541_p10 = pneg %p2540_p9 }
 0x4ea   : > { %p2547_p6 = por %p2546_p2, %p2545_p3 }
 0x4ec   : > { %p2548_p1 = pnand %p2547_p6, %p2541_p10 }
 0x4ee   : > { %2551 = shalt.err (!%p2548_p1)
}
 0x4ef   : > { %1920 = dma.vmem_to_hbm [thread:$0]  (%p3684_p0), %s3400_s0, 256, %s3408_s9, %s3414_s30, %s2728_s11, %s2728_s11, %s2729_s18   ;;  %v1874_v63 = vpop.f32.mrb[4].mxu1 }
 0x4f0   : > { %s750_s13 = scalar_lea.vmem [#allocation26], %s3374_s4  ;;  %v1802_v0 = vpack.c.bf16 %v1874_v63, %v1874_v63  ;;  %v1262_v1 = vpop.f32.mrb[5].mxu1  ;;  %s3688_s9 = sld [smem:[#allocation62_spill]] }
 0x4f1   : > { %s1382_s7 = sshll.u32 %s750_s13, 4  ;;  %v1800_v2 = vpack.c.bf16 %v1262_v1, %v1262_v1  ;;  %v1875_v3 = vpop.f32.mrb[6].mxu1  ;;  %s1313_s29 = scalar_lea.sflag [#allocation27], %s3254_s1  ;;  %s3468_s7 = int_to_ptr.vmem [resolvable:$true] %s1382_s7 }
 0x4f2   : > { %1295 = vst.msk [vmem:[%s750_s13 + $0x8] sm:$0xf] %vm1090_vm1, %v1802_v0  ;;  %v1803_v4 = vpack.c.bf16 %v1875_v3, %v1875_v3  ;;  %v1265_v5 = vpop.f32.mrb[7].mxu1  ;;  %s2552_s12 = scalar_lea.vmem %s3468_s7, 256  ;;  %s2731_s24 = smov [#allocation26]  }
 0x4f3   : > { %1293 = vst.msk [vmem:[%s750_s13] sm:$0xf] %vm1090_vm1, %v1800_v2  ;;  %v1801_v6 = vpack.c.bf16 %v1265_v5, %v1265_v5  ;;  %p2553_p5 = scmp.ne.s32.totalorder %s3468_s7, %s2552_s12  ;;  %s2556_s25 = sshll.u32 %s2731_s24, 4  ;;  %s2557_s25 = int_to_ptr.vmem [resolvable:$false] %s2556_s25 }
 0x4f4   : > { %1296 = vst.msk [vmem:[%s750_s13 + $0xc] sm:$0xf] %vm1090_vm1, %v1803_v4  ;;  %s2558_s10 = scalar_lea.vmem %s2557_s25, 512  ;;  %p2559_p8 = scmp.lt.s32.totalorder %s3468_s7, %s2557_s25 }
 0x4f5   : > { %1294 = vst.msk [vmem:[%s750_s13 + $0x4] sm:$0xf] %vm1090_vm1, %v1801_v6  ;;  %p2554_p12 = pnand %p2553_p5, %p3684_p0  ;;  %p2560_p11 = scmp.lt.s32.totalorder %s2558_s10, %s2552_s12 }
 0x4f6   : > { %s3475_s30 = scalar_lea.hbm %s3688_s9, %s3381_s21 }
 0x4f7   : > { %p2555_p13 = pneg %p2554_p12  ;;  %p2561_p9 = por %p2560_p11, %p2559_p8 }
 0x4f9   : > { %p2562_p10 = pnand %p2561_p9, %p2555_p13 }
 0x4fb   : > { %2565 = shalt.err (!%p2562_p10)
}
 0x4fc   : > { %s2566_s21 = scalar_lea.hbm %s3475_s30, 256  ;;  %s2570_s2 = scalar_lea.hbm %s3688_s9, 1024 }
 0x4fd   : > { %p2567_p7 = scmp.ne.s32.totalorder %s3475_s30, %s2566_s21  ;;  %p2571_p2 = scmp.lt.u32.totalorder %s3475_s30, %s3688_s9 }
 0x4fe   : > { %p2572_p6 = scmp.lt.u32.totalorder %s2570_s2, %s2566_s21  ;;  %p2574_p5 = scmp.lt.u32.totalorder %s2566_s21, %s3475_s30 }
 0x4ff   : > { %p2568_p4 = pnand %p2567_p7, %p3684_p0 }
 0x500   : > { %p2573_p1 = por %p2572_p6, %p2571_p2 }
 0x501   : > { %p2569_p3 = pneg %p2568_p4 }
 0x502   : > { %p2575_p12 = por %p2574_p5, %p2573_p1 }
 0x504   : > { %p2576_p13 = pnand %p2575_p12, %p2569_p3 }
 0x506   : > { %2579 = shalt.err (!%p2576_p13)
}
 0x507   : > { %1921 = dma.vmem_to_hbm [thread:$0]  (%p3684_p0), %s3468_s7, 256, %s3475_s30, %s1313_s29, %s2728_s11, %s2728_s11, %s2729_s18  }
 0x508 PF: > { %s3689_s4 = sld [smem:[#allocation42_spill]]  ;;  %s3690_s12 = sld [smem:[#allocation38_spill]] }
 0x509   : > { %s3691_s24 = sld [smem:[#allocation46_spill]] }
 0x50e   : > { %p1996_p8 = scmp.ge.s32.totalorder %s3689_s4, 2  ;;  %s1397_s25 = sand.u32 1, %s3690_s12  }
 0x50f   : > { %p3692_p11 = scmp.ne.s32.totalorder %s3691_s24, 0  ;;  %s1398_s10 = scalar_lea.sflag [#allocation4], %s1397_s25 }
 0x511   : > { %p1965_p9 = pnand %p1996_p8, %p3692_p11 }
 0x513   : > { %2653 = dma.done.wait (!%p1965_p9), %s1398_s10, 512  }
 0x514   : > { %2655 = vsyncadd (!%p1965_p9), %s1398_s10, 4294966784  ;;  %s3693_s26 = sadd.s32 4294967294, %s3689_s4  }
 0x515   : > { %s1406_s21 = sand.u32 1, %s3693_s26  }
 0x516   : > { %s1407_s8 = scalar_lea.sflag [#allocation24], %s1406_s21 }
 0x517   : > { %2657 = dma.done.wait (!%p1965_p9), %s1407_s8, 512  }
 0x518   : > { %2659 = vsyncadd (!%p1965_p9), %s1407_s8, 4294966784  ;;  %s1425_s1 = scalar_lea.sflag [#allocation27], %s1397_s25 }
 0x519   : > { %2661 = dma.done.wait (!%p1965_p9), %s1425_s1, 256  }
 0x51a   : > { %2663 = vsyncadd (!%p1965_p9), %s1425_s1, 4294967040  ;;  %s46_s11 = sadd.s32 1, %s3689_s4   ;;  %s3694_s24 = sld [smem:[#allocation41_spill]] }
 0x51b   : > { %p43_p0 = scmp.ge.s32.totalorder %s46_s11, 6   ;;  %s3695_s18 = smov %s2670_s19 }
 0x51c   : > { %s3696_s19 = smov %s2674_s20  ;;  %s3697_s20 = smov %s3196_s3 }
 0x51d   : > { %s3698_s21 = smov %s2682_s22  ;;  %s3699_s22 = smov %s2686_s23 }
 0x51e   : > { %s3700_s23 = smov %s3199_s28  ;;  %s3701_s25 = smov %s2702_s27 }
 0x51f   : > { %s3702_s26 = smov %s3706_s15  ;;  %s3703_s27 = smov %s3710_s14 }
 0x520   : > { %s3704_s28 = smov %s46_s11  ;;  %45 = sbr.rel (!%p43_p0) target bundleno = 37 (0x25), region = 222 }
 0x527   :  { %1430 = vsyncpa [#allocation3], 1 }
 0x528   :  { %1432 = vsyncpa [#allocation3 + $0x1], 1 }
 0x529   :  { %1433 = vsyncpa [#allocation6], 1 }
 0x52a   :  { %1435 = vsyncpa [#allocation6 + $0x1], 1 }
 0x52b   :  { %1436 = vsyncpa [#allocation9], 1 }
 0x52c   :  { %1437 = vsyncpa [#allocation12], 1 }
 0x52d   :  { %1438 = vsyncpa [#allocation15], 1 }
 0x52e   :  { %1439 = vsyncpa [#allocation18], 1 }
 0x52f   :  { %1440 = vsyncpa [#allocation21], 1 }
 0x530   :  { %1441 = vsyncpa [#allocation4], 1 }
 0x531   :  { %1443 = vsyncpa [#allocation4 + $0x1], 1 }
 0x532   :  { %1444 = vsyncpa [#allocation24], 1 }
 0x533   :  { %1446 = vsyncpa [#allocation24 + $0x1], 1 }
 0x534   :  { %1447 = vsyncpa [#allocation27], 1 }
 0x535   :  { %1449 = vsyncpa [#allocation27 + $0x1], 1 }

</bundles_post_ra>
